<compile_context>
chip_gen: v6e
topology: v6e:2x2x1
jax: 0.10.0
libtpu: 0.0.40
codegen_flags: <defaults>
</compile_context>

<pallas_src>
import math

import jax
import jax.numpy as jnp
from jax.experimental import pallas as pl
from jax.experimental.pallas import tpu as pltpu

# ---------------------------------------------------------------------------
# Config
# ---------------------------------------------------------------------------
B = 2          # batch
SEQ = 8        # seq_len
PAD = 32       # padding_size (d_model of DotAttention)
EMB = 32       # embedding_size (== PAD)
DK = 8         # d_k per head
NHEADS = 4     # num_heads
DFF = 64       # d_ff
NLAYERS = 2    # num_layers
HID = 32       # classifier hidden width
NCLS = 2       # num_classes
LN_EPS = 1e-5
LANE = 128     # lane-dense padded output width / bias-slab width

# Bias/PE slab row layout (all (1, width) vectors packed into one (32,128) f32)
R_D1B = 0                    # dense1 bias                 width EMB
R_PE = 1                     # rows R_PE..R_PE+SEQ-1: PE   width EMB
R_L1B = R_PE + SEQ           # linear1 bias                width HID
R_L2B = R_L1B + 1            # linear2 bias (zero-padded)  width LANE
R_BQKV = R_L2B + 1           # per-layer fused qkv bias    width 3*EMB
R_BO = R_BQKV + NLAYERS      # per-layer attn out bias     width EMB
R_LN1G = R_BO + NLAYERS
R_LN1B = R_LN1G + NLAYERS
R_FF1B = R_LN1B + NLAYERS    # width DFF
R_FF2B = R_FF1B + NLAYERS
R_LN2G = R_FF2B + NLAYERS
R_LN2B = R_LN2G + NLAYERS
BIAS_ROWS = 32
assert R_LN2B + NLAYERS <= BIAS_ROWS


# ---------------------------------------------------------------------------
# Pallas kernel: single invocation, whole batch in VMEM
# ---------------------------------------------------------------------------
def logrep_kernel(in1_ref, in2_ref, in3_ref,
                  attn_w_ref, ff1w_ref, ff2w_ref, dense_w_ref, bias_ref,
                  out_ref):
    f32 = jnp.float32
    bf16 = jnp.bfloat16

    def mmw(a, w):
        # (R, K) activation @ (K, N) weight, bf16 operands, f32 accumulation.
        return jax.lax.dot_general(
            a.astype(bf16), w.astype(bf16),
            dimension_numbers=(((1,), (0,)), ((), ())),
            preferred_element_type=f32)

    def bmm_qk(q, k):
        # (B,S,D) x (B,T,D) -> (B,S,T): contract last axes, no explicit .T
        return jnp.einsum('bqd,bkd->bqk', q.astype(bf16), k.astype(bf16),
                          preferred_element_type=f32)

    def bmm_pv(p, v):
        # (B,S,T) x (B,T,D) -> (B,S,D)
        return jnp.einsum('bqk,bkd->bqd', p.astype(bf16), v.astype(bf16),
                          preferred_element_type=f32)

    def softmax(s):
        m = jnp.max(s, axis=-1, keepdims=True)
        e = jnp.exp(s - m)
        return e * pl.reciprocal(jnp.sum(e, axis=-1, keepdims=True),
                                 approx=True)

    def layer_norm(x, g, beta):
        mu = jnp.mean(x, axis=-1, keepdims=True)
        var = jnp.mean((x - mu) ** 2, axis=-1, keepdims=True)
        return (x - mu) * jax.lax.rsqrt(var + LN_EPS) * g + beta

    bias = bias_ref[...]                 # (BIAS_ROWS, LANE) f32, load once
    in1 = in1_ref[...]                   # (B, SEQ, PAD)
    in2 = in2_ref[...]
    in3 = in3_ref[...]

    inv_sqrt_pad = 1.0 / math.sqrt(PAD)
    inv_sqrt_dk = 1.0 / math.sqrt(DK)

    # --- attention fusion: DotAttention1 -> dense1+relu -> DotAttention2 ---
    p1 = softmax(bmm_qk(in3, in2) * inv_sqrt_pad)          # (B, SEQ, SEQ)
    a1 = bmm_pv(p1, in2)                                   # (B, SEQ, PAD)
    a1f = jnp.maximum(
        mmw((a1 + in3).reshape(B * SEQ, PAD), dense_w_ref[:, :EMB])
        + bias[R_D1B:R_D1B + 1, :EMB], 0.0)                # (B*SEQ, EMB)
    a1 = a1f.reshape(B, SEQ, EMB)

    p2 = softmax(bmm_qk(a1, in1) * inv_sqrt_pad)           # (B, SEQ, SEQ)
    a2 = bmm_pv(p2, in1)                                   # (B, SEQ, EMB)

    # positional encoder on in1: in1*sqrt(d_model) + sinusoidal table
    pe = bias[R_PE:R_PE + SEQ, :EMB]                       # (SEQ, EMB)
    x = a2 + in1 * math.sqrt(EMB) + pe                     # classifier_input
    xf = x.reshape(B * SEQ, EMB)

    # --- transformer encoder, post-LN, fused QKV / output projections ---
    for l in range(NLAYERS):
        w = attn_w_ref[l]                                  # (EMB, 4*EMB) bf16
        qkv = (mmw(xf, w[:, :3 * EMB])
               + bias[R_BQKV + l:R_BQKV + l + 1, :3 * EMB])  # (B*SEQ, 3*EMB)
        q3 = qkv[:, 0 * EMB:1 * EMB].reshape(B, SEQ, EMB)
        k3 = qkv[:, 1 * EMB:2 * EMB].reshape(B, SEQ, EMB)
        v3 = qkv[:, 2 * EMB:3 * EMB].reshape(B, SEQ, EMB)

        heads = []
        for h in range(NHEADS):
            sl = slice(h * DK, (h + 1) * DK)
            sc = bmm_qk(q3[:, :, sl], k3[:, :, sl]) * inv_sqrt_dk
            heads.append(bmm_pv(softmax(sc), v3[:, :, sl]))  # (B, SEQ, DK)
        o = jnp.concatenate(heads, axis=-1).reshape(B * SEQ, EMB)

        attn = mmw(o, w[:, 3 * EMB:]) + bias[R_BO + l:R_BO + l + 1, :EMB]
        xf = layer_norm(xf + attn,
                        bias[R_LN1G + l:R_LN1G + l + 1, :EMB],
                        bias[R_LN1B + l:R_LN1B + l + 1, :EMB])

        ff = jnp.maximum(mmw(xf, ff1w_ref[l])
                         + bias[R_FF1B + l:R_FF1B + l + 1, :DFF], 0.0)
        ff = mmw(ff, ff2w_ref[l]) + bias[R_FF2B + l:R_FF2B + l + 1, :EMB]
        xf = layer_norm(xf + ff,
                        bias[R_LN2G + l:R_LN2G + l + 1, :EMB],
                        bias[R_LN2B + l:R_LN2B + l + 1, :EMB])

    # --- mean pool over sequence + classifier head ---
    pooled = jnp.mean(xf.reshape(B, SEQ, EMB), axis=1)       # (B, EMB)
    h1 = jnp.maximum(mmw(pooled, dense_w_ref[:, EMB:EMB + HID])
                     + bias[R_L1B:R_L1B + 1, :HID], 0.0)     # (B, HID)
    logits = (mmw(h1, dense_w_ref[:, EMB + HID:])
              + bias[R_L2B:R_L2B + 1, :])                    # (B, LANE)
    out_ref[...] = logits                                    # lane-dense store


# ---------------------------------------------------------------------------
# Wrapper
# ---------------------------------------------------------------------------
def logrep_forward(in1, in2, in3, packed):
    out = pl.pallas_call(
        logrep_kernel,
        out_shape=jax.ShapeDtypeStruct((B, LANE), jnp.float32),
        cost_estimate=pl.CostEstimate(
            flops=700_000, transcendentals=2_048, bytes_accessed=80_000),
    )(in1, in2, in3,
      packed["attn_w"], packed["ff1w"], packed["ff2w"],
      packed["dense_w"], packed["bias"])
    return out[:, :NCLS]


# ---------------------------------------------------------------------------
# Deterministic logical parameters (same shapes/semantics as the module)
# ---------------------------------------------------------------------------
def init_params(key):
    keys = jax.random.split(key, 24)

    def nrm(k, shape, scale=0.05):
        return jax.random.normal(k, shape, jnp.float32) * scale

    # Sinusoidal positional-encoding table (SEQ, EMB)
    pos = jnp.arange(SEQ, dtype=jnp.float32)[:, None]
    div = jnp.exp(
        jnp.arange(0, EMB, 2, dtype=jnp.float32) * (-math.log(10000.0) / EMB))
    pe = jnp.zeros((SEQ, EMB), jnp.float32)
    pe = pe.at[:, 0::2].set(jnp.sin(pos * div))
    pe = pe.at[:, 1::2].set(jnp.cos(pos * div))

    return {
        "d1w": nrm(keys[0], (PAD, EMB)),
        "d1b": nrm(keys[1], (1, EMB)),
        "pe": pe,
        "wq": nrm(keys[2], (NLAYERS, EMB, NHEADS * DK)),
        "bq": nrm(keys[3], (NLAYERS, 1, NHEADS * DK)),
        "wk": nrm(keys[4], (NLAYERS, EMB, NHEADS * DK)),
        "bk": nrm(keys[5], (NLAYERS, 1, NHEADS * DK)),
        "wv": nrm(keys[6], (NLAYERS, EMB, NHEADS * DK)),
        "bv": nrm(keys[7], (NLAYERS, 1, NHEADS * DK)),
        "wo": nrm(keys[8], (NLAYERS, NHEADS * DK, EMB)),
        "bo": nrm(keys[9], (NLAYERS, 1, EMB)),
        "ln1g": jnp.ones((NLAYERS, 1, EMB), jnp.float32),
        "ln1b": jnp.zeros((NLAYERS, 1, EMB), jnp.float32),
        "ff1w": nrm(keys[10], (NLAYERS, EMB, DFF)),
        "ff1b": nrm(keys[11], (NLAYERS, 1, DFF)),
        "ff2w": nrm(keys[12], (NLAYERS, DFF, EMB)),
        "ff2b": nrm(keys[13], (NLAYERS, 1, EMB)),
        "ln2g": jnp.ones((NLAYERS, 1, EMB), jnp.float32),
        "ln2b": jnp.zeros((NLAYERS, 1, EMB), jnp.float32),
        "l1w": nrm(keys[14], (EMB, HID)),
        "l1b": nrm(keys[15], (1, HID)),
        "l2w": nrm(keys[16], (HID, NCLS)),
        "l2b": nrm(keys[17], (1, NCLS)),
    }


def pack_params(p):
    """Pack the 22 logical arrays into 5 kernel operands (bf16 weights)."""
    bias = jnp.zeros((BIAS_ROWS, LANE), jnp.float32)
    bias = bias.at[R_D1B, :EMB].set(p["d1b"][0])
    bias = bias.at[R_PE:R_PE + SEQ, :EMB].set(p["pe"])
    bias = bias.at[R_L1B, :HID].set(p["l1b"][0])
    bias = bias.at[R_L2B, :NCLS].set(p["l2b"][0])
    for l in range(NLAYERS):
        bqkv = jnp.concatenate([p["bq"][l, 0], p["bk"][l, 0], p["bv"][l, 0]])
        bias = bias.at[R_BQKV + l, :3 * EMB].set(bqkv)
        bias = bias.at[R_BO + l, :EMB].set(p["bo"][l, 0])
        bias = bias.at[R_LN1G + l, :EMB].set(p["ln1g"][l, 0])
        bias = bias.at[R_LN1B + l, :EMB].set(p["ln1b"][l, 0])
        bias = bias.at[R_FF1B + l, :DFF].set(p["ff1b"][l, 0])
        bias = bias.at[R_FF2B + l, :EMB].set(p["ff2b"][l, 0])
        bias = bias.at[R_LN2G + l, :EMB].set(p["ln2g"][l, 0])
        bias = bias.at[R_LN2B + l, :EMB].set(p["ln2b"][l, 0])

    # Fused per-layer attention weights: [wq | wk | wv | wo] -> (L, EMB, 128)
    attn_w = jnp.concatenate([p["wq"], p["wk"], p["wv"], p["wo"]], axis=-1)

    # dense1 + classifier weights: [d1w | l1w | l2w(zero-padded to 128 lanes)]
    l2w_pad = jnp.zeros((HID, LANE), jnp.float32).at[:, :NCLS].set(p["l2w"])
    dense_w = jnp.concatenate([p["d1w"], p["l1w"], l2w_pad], axis=-1)

    return {
        "attn_w": attn_w.astype(jnp.bfloat16),
        "ff1w": p["ff1w"].astype(jnp.bfloat16),
        "ff2w": p["ff2w"].astype(jnp.bfloat16),
        "dense_w": dense_w.astype(jnp.bfloat16),
        "bias": bias,
    }


# ---------------------------------------------------------------------------
# Pure-JAX float32 reference (correctness check)
# ---------------------------------------------------------------------------
def _ref_single(in1, in2, in3, p):
    def softmax(s):
        s = s - jnp.max(s, axis=-1, keepdims=True)
        e = jnp.exp(s)
        return e / jnp.sum(e, axis=-1, keepdims=True)

    def ln(x, g, beta):
        mu = jnp.mean(x, -1, keepdims=True)
        var = jnp.mean((x - mu) ** 2, -1, keepdims=True)
        return (x - mu) * jax.lax.rsqrt(var + LN_EPS) * g + beta

    inv = 1.0 / math.sqrt(PAD)
    a1 = softmax(in3 @ in2.T * inv) @ in2
    a1 = jax.nn.relu((a1 + in3) @ p["d1w"] + p["d1b"])
    a2 = softmax(a1 @ in1.T * inv) @ in1
    x = a2 + in1 * math.sqrt(EMB) + p["pe"]
    for l in range(NLAYERS):
        acc = jnp.zeros((SEQ, EMB), jnp.float32)
        for h in range(NHEADS):
            sl = slice(h * DK, (h + 1) * DK)
            qh = x @ p["wq"][l][:, sl] + p["bq"][l][:, sl]
            kh = x @ p["wk"][l][:, sl] + p["bk"][l][:, sl]
            vh = x @ p["wv"][l][:, sl] + p["bv"][l][:, sl]
            oh = softmax(qh @ kh.T / math.sqrt(DK)) @ vh
            acc = acc + oh @ p["wo"][l][sl, :]
        x = ln(x + acc + p["bo"][l], p["ln1g"][l], p["ln1b"][l])
        ff = jax.nn.relu(x @ p["ff1w"][l] + p["ff1b"][l]) @ p["ff2w"][l] + p["ff2b"][l]
        x = ln(x + ff, p["ln2g"][l], p["ln2b"][l])
    pooled = jnp.mean(x, axis=0, keepdims=True)
    h1 = jax.nn.relu(pooled @ p["l1w"] + p["l1b"])
    return (h1 @ p["l2w"] + p["l2b"])[0]


# ---------------------------------------------------------------------------
if __name__ == "__main__":
    root = jax.random.PRNGKey(0)
    k_in, k_p = jax.random.split(root)
    k1, k2, k3 = jax.random.split(k_in, 3)

    # features[data_keys[i]] -> in1, in2, in3, each [B, seq_len, padding_size]
    in1 = jax.random.normal(k1, (B, SEQ, PAD), jnp.float32)
    in2 = jax.random.normal(k2, (B, SEQ, PAD), jnp.float32)
    in3 = jax.random.normal(k3, (B, SEQ, PAD), jnp.float32)

    params = init_params(k_p)
    packed = pack_params(params)

    out = logrep_forward(in1, in2, in3, packed)
    out = jax.block_until_ready(out)
    assert out.shape == (B, NCLS) and out.dtype == jnp.float32

    ref = jax.vmap(lambda a, b_, c: _ref_single(a, b_, c, params))(in1, in2, in3)
    if not jnp.allclose(out, ref, rtol=2e-2, atol=2e-2):
        raise AssertionError(f"kernel/reference mismatch:\n{out}\n{ref}")

    # TODO(synk): enc_mask handling (optional attention mask in forward) is not
    # implemented; this script covers the enc_mask=None path only.
    print("KERNEL_OK")
</pallas_src>

<mosaic_0001>
module attributes {stable_mosaic.version = 11 : i64} {
  func.func @logrep_kernel(%arg0: memref<2x8x32xf32, #tpu.memory_space<vmem>>, %arg1: memref<2x8x32xf32, #tpu.memory_space<vmem>>, %arg2: memref<2x8x32xf32, #tpu.memory_space<vmem>>, %arg3: memref<2x32x128xbf16, #tpu.memory_space<vmem>>, %arg4: memref<2x32x64xbf16, #tpu.memory_space<vmem>>, %arg5: memref<2x64x32xbf16, #tpu.memory_space<vmem>>, %arg6: memref<32x192xbf16, #tpu.memory_space<vmem>>, %arg7: memref<32x128xf32, #tpu.memory_space<vmem>>, %arg8: memref<2x128xf32, #tpu.memory_space<vmem>>) attributes {dimension_semantics = [], scalar_prefetch = 0 : i64, scratch_operands = 0 : i64, tpu.core_type = #tpu.core_type<tc>} {
    %c0 = arith.constant 0 : index
    %c0_0 = arith.constant 0 : index
    %0 = vector.load %arg7[%c0, %c0_0] : memref<32x128xf32, #tpu.memory_space<vmem>>, vector<32x128xf32>
    %c0_1 = arith.constant 0 : index
    %c0_2 = arith.constant 0 : index
    %c0_3 = arith.constant 0 : index
    %1 = vector.load %arg0[%c0_1, %c0_2, %c0_3] : memref<2x8x32xf32, #tpu.memory_space<vmem>>, vector<2x8x32xf32>
    %c0_4 = arith.constant 0 : index
    %c0_5 = arith.constant 0 : index
    %c0_6 = arith.constant 0 : index
    %2 = vector.load %arg1[%c0_4, %c0_5, %c0_6] : memref<2x8x32xf32, #tpu.memory_space<vmem>>, vector<2x8x32xf32>
    %c0_7 = arith.constant 0 : index
    %c0_8 = arith.constant 0 : index
    %c0_9 = arith.constant 0 : index
    %3 = vector.load %arg2[%c0_7, %c0_8, %c0_9] : memref<2x8x32xf32, #tpu.memory_space<vmem>>, vector<2x8x32xf32>
    %4 = arith.truncf %3 : vector<2x8x32xf32> to vector<2x8x32xbf16>
    %5 = arith.truncf %2 : vector<2x8x32xf32> to vector<2x8x32xbf16>
    "tpu.trace_start"() <{level = 10 : i32, message = "bqd,bkd->bqk"}> : () -> ()
    %cst = arith.constant dense<0.000000e+00> : vector<2x8x8xf32>
    %6 = tpu.matmul %4, %5, %cst {dimension_numbers = #tpu.dot_dimension_numbers<[2], [2], [1], [1], [0, 0, 0, 1, 1, 1], [0], [0]>} : vector<2x8x32xbf16>, vector<2x8x32xbf16>, vector<2x8x8xf32> -> vector<2x8x8xf32>
    "tpu.trace_stop"() : () -> ()
    %cst_10 = arith.constant 0.176776692 : f32
    %7 = vector.broadcast %cst_10 : f32 to vector<2x8x8xf32>
    %8 = arith.mulf %6, %7 : vector<2x8x8xf32>
    %cst_11 = arith.constant dense<0xFF800000> : vector<2x8xf32>
    %9 = vector.multi_reduction <maximumf>, %8, %cst_11 [2] : vector<2x8x8xf32> to vector<2x8xf32>
    %10 = vector.shape_cast %9 : vector<2x8xf32> to vector<2x8x1xf32>
    %11 = vector.broadcast %10 : vector<2x8x1xf32> to vector<2x8x8xf32>
    %12 = arith.subf %8, %11 : vector<2x8x8xf32>
    %13 = math.exp %12 : vector<2x8x8xf32>
    %cst_12 = arith.constant dense<0.000000e+00> : vector<2x8xf32>
    %14 = vector.multi_reduction <add>, %13, %cst_12 [2] : vector<2x8x8xf32> to vector<2x8xf32>
    %15 = vector.shape_cast %14 : vector<2x8xf32> to vector<2x8x1xf32>
    %16 = tpu.reciprocal %15 {approx = true} : vector<2x8x1xf32> -> vector<2x8x1xf32>
    %17 = vector.broadcast %16 : vector<2x8x1xf32> to vector<2x8x8xf32>
    %18 = arith.mulf %13, %17 : vector<2x8x8xf32>
    %19 = arith.truncf %18 : vector<2x8x8xf32> to vector<2x8x8xbf16>
    %20 = arith.truncf %2 : vector<2x8x32xf32> to vector<2x8x32xbf16>
    "tpu.trace_start"() <{level = 10 : i32, message = "bqk,bkd->bqd"}> : () -> ()
    %cst_13 = arith.constant dense<0.000000e+00> : vector<2x8x32xf32>
    %21 = tpu.matmul %19, %20, %cst_13 {dimension_numbers = #tpu.dot_dimension_numbers<[2], [1], [1], [2], [0, 0, 0, 1, 1, 2], [0], [0]>} : vector<2x8x8xbf16>, vector<2x8x32xbf16>, vector<2x8x32xf32> -> vector<2x8x32xf32>
    "tpu.trace_stop"() : () -> ()
    %22 = arith.addf %21, %3 : vector<2x8x32xf32>
    %23 = vector.shape_cast %22 : vector<2x8x32xf32> to vector<16x32xf32>
    %c0_14 = arith.constant 0 : index
    %c0_15 = arith.constant 0 : index
    %24 = vector.load %arg6[%c0_14, %c0_15] : memref<32x192xbf16, #tpu.memory_space<vmem>>, vector<32x32xbf16>
    %25 = arith.truncf %23 : vector<16x32xf32> to vector<16x32xbf16>
    %cst_16 = arith.constant dense<0.000000e+00> : vector<16x32xf32>
    %26 = tpu.matmul %25, %24, %cst_16 {dimension_numbers = #tpu.dot_dimension_numbers<[1], [0], [0], [1], [0, 0, 1, 1], [], []>} : vector<16x32xbf16>, vector<32x32xbf16>, vector<16x32xf32> -> vector<16x32xf32>
    %27 = vector.extract_strided_slice %0 {offsets = [0, 0], sizes = [1, 32], strides = [1, 1]} : vector<32x128xf32> to vector<1x32xf32>
    %28 = vector.broadcast %27 : vector<1x32xf32> to vector<16x32xf32>
    %29 = arith.addf %26, %28 : vector<16x32xf32>
    %cst_17 = arith.constant 0.000000e+00 : f32
    %30 = vector.broadcast %cst_17 : f32 to vector<16x32xf32>
    %31 = arith.maximumf %29, %30 : vector<16x32xf32>
    %32 = vector.shape_cast %31 : vector<16x32xf32> to vector<2x8x32xf32>
    %33 = arith.truncf %32 : vector<2x8x32xf32> to vector<2x8x32xbf16>
    %34 = arith.truncf %1 : vector<2x8x32xf32> to vector<2x8x32xbf16>
    "tpu.trace_start"() <{level = 10 : i32, message = "bqd,bkd->bqk"}> : () -> ()
    %cst_18 = arith.constant dense<0.000000e+00> : vector<2x8x8xf32>
    %35 = tpu.matmul %33, %34, %cst_18 {dimension_numbers = #tpu.dot_dimension_numbers<[2], [2], [1], [1], [0, 0, 0, 1, 1, 1], [0], [0]>} : vector<2x8x32xbf16>, vector<2x8x32xbf16>, vector<2x8x8xf32> -> vector<2x8x8xf32>
    "tpu.trace_stop"() : () -> ()
    %cst_19 = arith.constant 0.176776692 : f32
    %36 = vector.broadcast %cst_19 : f32 to vector<2x8x8xf32>
    %37 = arith.mulf %35, %36 : vector<2x8x8xf32>
    %cst_20 = arith.constant dense<0xFF800000> : vector<2x8xf32>
    %38 = vector.multi_reduction <maximumf>, %37, %cst_20 [2] : vector<2x8x8xf32> to vector<2x8xf32>
    %39 = vector.shape_cast %38 : vector<2x8xf32> to vector<2x8x1xf32>
    %40 = vector.broadcast %39 : vector<2x8x1xf32> to vector<2x8x8xf32>
    %41 = arith.subf %37, %40 : vector<2x8x8xf32>
    %42 = math.exp %41 : vector<2x8x8xf32>
    %cst_21 = arith.constant dense<0.000000e+00> : vector<2x8xf32>
    %43 = vector.multi_reduction <add>, %42, %cst_21 [2] : vector<2x8x8xf32> to vector<2x8xf32>
    %44 = vector.shape_cast %43 : vector<2x8xf32> to vector<2x8x1xf32>
    %45 = tpu.reciprocal %44 {approx = true} : vector<2x8x1xf32> -> vector<2x8x1xf32>
    %46 = vector.broadcast %45 : vector<2x8x1xf32> to vector<2x8x8xf32>
    %47 = arith.mulf %42, %46 : vector<2x8x8xf32>
    %48 = arith.truncf %47 : vector<2x8x8xf32> to vector<2x8x8xbf16>
    %49 = arith.truncf %1 : vector<2x8x32xf32> to vector<2x8x32xbf16>
    "tpu.trace_start"() <{level = 10 : i32, message = "bqk,bkd->bqd"}> : () -> ()
    %cst_22 = arith.constant dense<0.000000e+00> : vector<2x8x32xf32>
    %50 = tpu.matmul %48, %49, %cst_22 {dimension_numbers = #tpu.dot_dimension_numbers<[2], [1], [1], [2], [0, 0, 0, 1, 1, 2], [0], [0]>} : vector<2x8x8xbf16>, vector<2x8x32xbf16>, vector<2x8x32xf32> -> vector<2x8x32xf32>
    "tpu.trace_stop"() : () -> ()
    %51 = vector.extract_strided_slice %0 {offsets = [1, 0], sizes = [8, 32], strides = [1, 1]} : vector<32x128xf32> to vector<8x32xf32>
    %cst_23 = arith.constant 5.65685415 : f32
    %52 = vector.broadcast %cst_23 : f32 to vector<2x8x32xf32>
    %53 = arith.mulf %1, %52 : vector<2x8x32xf32>
    %54 = arith.addf %50, %53 : vector<2x8x32xf32>
    %55 = vector.shape_cast %51 : vector<8x32xf32> to vector<1x8x32xf32>
    %56 = vector.broadcast %55 : vector<1x8x32xf32> to vector<2x8x32xf32>
    %57 = arith.addf %54, %56 : vector<2x8x32xf32>
    %58 = vector.shape_cast %57 : vector<2x8x32xf32> to vector<16x32xf32>
    %c0_24 = arith.constant 0 : index
    %c0_25 = arith.constant 0 : index
    %c0_26 = arith.constant 0 : index
    %59 = vector.load %arg3[%c0_24, %c0_25, %c0_26] : memref<2x32x128xbf16, #tpu.memory_space<vmem>>, vector<1x32x128xbf16>
    %60 = vector.shape_cast %59 : vector<1x32x128xbf16> to vector<32x128xbf16>
    %61 = vector.extract_strided_slice %60 {offsets = [0, 0], sizes = [32, 96], strides = [1, 1]} : vector<32x128xbf16> to vector<32x96xbf16>
    %62 = arith.truncf %58 : vector<16x32xf32> to vector<16x32xbf16>
    %cst_27 = arith.constant dense<0.000000e+00> : vector<16x96xf32>
    %63 = tpu.matmul %62, %61, %cst_27 {dimension_numbers = #tpu.dot_dimension_numbers<[1], [0], [0], [1], [0, 0, 1, 1], [], []>} : vector<16x32xbf16>, vector<32x96xbf16>, vector<16x96xf32> -> vector<16x96xf32>
    %64 = vector.extract_strided_slice %0 {offsets = [11, 0], sizes = [1, 96], strides = [1, 1]} : vector<32x128xf32> to vector<1x96xf32>
    %65 = vector.broadcast %64 : vector<1x96xf32> to vector<16x96xf32>
    %66 = arith.addf %63, %65 : vector<16x96xf32>
    %67 = vector.extract_strided_slice %66 {offsets = [0, 0], sizes = [16, 32], strides = [1, 1]} : vector<16x96xf32> to vector<16x32xf32>
    %68 = vector.shape_cast %67 : vector<16x32xf32> to vector<2x8x32xf32>
    %69 = vector.extract_strided_slice %66 {offsets = [0, 32], sizes = [16, 32], strides = [1, 1]} : vector<16x96xf32> to vector<16x32xf32>
    %70 = vector.shape_cast %69 : vector<16x32xf32> to vector<2x8x32xf32>
    %71 = vector.extract_strided_slice %66 {offsets = [0, 64], sizes = [16, 32], strides = [1, 1]} : vector<16x96xf32> to vector<16x32xf32>
    %72 = vector.shape_cast %71 : vector<16x32xf32> to vector<2x8x32xf32>
    %73 = vector.extract_strided_slice %68 {offsets = [0, 0, 0], sizes = [2, 8, 8], strides = [1, 1, 1]} : vector<2x8x32xf32> to vector<2x8x8xf32>
    %74 = vector.extract_strided_slice %70 {offsets = [0, 0, 0], sizes = [2, 8, 8], strides = [1, 1, 1]} : vector<2x8x32xf32> to vector<2x8x8xf32>
    %75 = arith.truncf %73 : vector<2x8x8xf32> to vector<2x8x8xbf16>
    %76 = arith.truncf %74 : vector<2x8x8xf32> to vector<2x8x8xbf16>
    "tpu.trace_start"() <{level = 10 : i32, message = "bqd,bkd->bqk"}> : () -> ()
    %cst_28 = arith.constant dense<0.000000e+00> : vector<2x8x8xf32>
    %77 = tpu.matmul %75, %76, %cst_28 {dimension_numbers = #tpu.dot_dimension_numbers<[2], [2], [1], [1], [0, 0, 0, 1, 1, 1], [0], [0]>} : vector<2x8x8xbf16>, vector<2x8x8xbf16>, vector<2x8x8xf32> -> vector<2x8x8xf32>
    "tpu.trace_stop"() : () -> ()
    %cst_29 = arith.constant 0.353553385 : f32
    %78 = vector.broadcast %cst_29 : f32 to vector<2x8x8xf32>
    %79 = arith.mulf %77, %78 : vector<2x8x8xf32>
    %cst_30 = arith.constant dense<0xFF800000> : vector<2x8xf32>
    %80 = vector.multi_reduction <maximumf>, %79, %cst_30 [2] : vector<2x8x8xf32> to vector<2x8xf32>
    %81 = vector.shape_cast %80 : vector<2x8xf32> to vector<2x8x1xf32>
    %82 = vector.broadcast %81 : vector<2x8x1xf32> to vector<2x8x8xf32>
    %83 = arith.subf %79, %82 : vector<2x8x8xf32>
    %84 = math.exp %83 : vector<2x8x8xf32>
    %cst_31 = arith.constant dense<0.000000e+00> : vector<2x8xf32>
    %85 = vector.multi_reduction <add>, %84, %cst_31 [2] : vector<2x8x8xf32> to vector<2x8xf32>
    %86 = vector.shape_cast %85 : vector<2x8xf32> to vector<2x8x1xf32>
    %87 = tpu.reciprocal %86 {approx = true} : vector<2x8x1xf32> -> vector<2x8x1xf32>
    %88 = vector.broadcast %87 : vector<2x8x1xf32> to vector<2x8x8xf32>
    %89 = arith.mulf %84, %88 : vector<2x8x8xf32>
    %90 = vector.extract_strided_slice %72 {offsets = [0, 0, 0], sizes = [2, 8, 8], strides = [1, 1, 1]} : vector<2x8x32xf32> to vector<2x8x8xf32>
    %91 = arith.truncf %89 : vector<2x8x8xf32> to vector<2x8x8xbf16>
    %92 = arith.truncf %90 : vector<2x8x8xf32> to vector<2x8x8xbf16>
    "tpu.trace_start"() <{level = 10 : i32, message = "bqk,bkd->bqd"}> : () -> ()
    %cst_32 = arith.constant dense<0.000000e+00> : vector<2x8x8xf32>
    %93 = tpu.matmul %91, %92, %cst_32 {dimension_numbers = #tpu.dot_dimension_numbers<[2], [1], [1], [2], [0, 0, 0, 1, 1, 2], [0], [0]>} : vector<2x8x8xbf16>, vector<2x8x8xbf16>, vector<2x8x8xf32> -> vector<2x8x8xf32>
    "tpu.trace_stop"() : () -> ()
    %94 = vector.extract_strided_slice %68 {offsets = [0, 0, 8], sizes = [2, 8, 8], strides = [1, 1, 1]} : vector<2x8x32xf32> to vector<2x8x8xf32>
    %95 = vector.extract_strided_slice %70 {offsets = [0, 0, 8], sizes = [2, 8, 8], strides = [1, 1, 1]} : vector<2x8x32xf32> to vector<2x8x8xf32>
    %96 = arith.truncf %94 : vector<2x8x8xf32> to vector<2x8x8xbf16>
    %97 = arith.truncf %95 : vector<2x8x8xf32> to vector<2x8x8xbf16>
    "tpu.trace_start"() <{level = 10 : i32, message = "bqd,bkd->bqk"}> : () -> ()
    %cst_33 = arith.constant dense<0.000000e+00> : vector<2x8x8xf32>
    %98 = tpu.matmul %96, %97, %cst_33 {dimension_numbers = #tpu.dot_dimension_numbers<[2], [2], [1], [1], [0, 0, 0, 1, 1, 1], [0], [0]>} : vector<2x8x8xbf16>, vector<2x8x8xbf16>, vector<2x8x8xf32> -> vector<2x8x8xf32>
    "tpu.trace_stop"() : () -> ()
    %cst_34 = arith.constant 0.353553385 : f32
    %99 = vector.broadcast %cst_34 : f32 to vector<2x8x8xf32>
    %100 = arith.mulf %98, %99 : vector<2x8x8xf32>
    %cst_35 = arith.constant dense<0xFF800000> : vector<2x8xf32>
    %101 = vector.multi_reduction <maximumf>, %100, %cst_35 [2] : vector<2x8x8xf32> to vector<2x8xf32>
    %102 = vector.shape_cast %101 : vector<2x8xf32> to vector<2x8x1xf32>
    %103 = vector.broadcast %102 : vector<2x8x1xf32> to vector<2x8x8xf32>
    %104 = arith.subf %100, %103 : vector<2x8x8xf32>
    %105 = math.exp %104 : vector<2x8x8xf32>
    %cst_36 = arith.constant dense<0.000000e+00> : vector<2x8xf32>
    %106 = vector.multi_reduction <add>, %105, %cst_36 [2] : vector<2x8x8xf32> to vector<2x8xf32>
    %107 = vector.shape_cast %106 : vector<2x8xf32> to vector<2x8x1xf32>
    %108 = tpu.reciprocal %107 {approx = true} : vector<2x8x1xf32> -> vector<2x8x1xf32>
    %109 = vector.broadcast %108 : vector<2x8x1xf32> to vector<2x8x8xf32>
    %110 = arith.mulf %105, %109 : vector<2x8x8xf32>
    %111 = vector.extract_strided_slice %72 {offsets = [0, 0, 8], sizes = [2, 8, 8], strides = [1, 1, 1]} : vector<2x8x32xf32> to vector<2x8x8xf32>
    %112 = arith.truncf %110 : vector<2x8x8xf32> to vector<2x8x8xbf16>
    %113 = arith.truncf %111 : vector<2x8x8xf32> to vector<2x8x8xbf16>
    "tpu.trace_start"() <{level = 10 : i32, message = "bqk,bkd->bqd"}> : () -> ()
    %cst_37 = arith.constant dense<0.000000e+00> : vector<2x8x8xf32>
    %114 = tpu.matmul %112, %113, %cst_37 {dimension_numbers = #tpu.dot_dimension_numbers<[2], [1], [1], [2], [0, 0, 0, 1, 1, 2], [0], [0]>} : vector<2x8x8xbf16>, vector<2x8x8xbf16>, vector<2x8x8xf32> -> vector<2x8x8xf32>
    "tpu.trace_stop"() : () -> ()
    %115 = vector.extract_strided_slice %68 {offsets = [0, 0, 16], sizes = [2, 8, 8], strides = [1, 1, 1]} : vector<2x8x32xf32> to vector<2x8x8xf32>
    %116 = vector.extract_strided_slice %70 {offsets = [0, 0, 16], sizes = [2, 8, 8], strides = [1, 1, 1]} : vector<2x8x32xf32> to vector<2x8x8xf32>
    %117 = arith.truncf %115 : vector<2x8x8xf32> to vector<2x8x8xbf16>
    %118 = arith.truncf %116 : vector<2x8x8xf32> to vector<2x8x8xbf16>
    "tpu.trace_start"() <{level = 10 : i32, message = "bqd,bkd->bqk"}> : () -> ()
    %cst_38 = arith.constant dense<0.000000e+00> : vector<2x8x8xf32>
    %119 = tpu.matmul %117, %118, %cst_38 {dimension_numbers = #tpu.dot_dimension_numbers<[2], [2], [1], [1], [0, 0, 0, 1, 1, 1], [0], [0]>} : vector<2x8x8xbf16>, vector<2x8x8xbf16>, vector<2x8x8xf32> -> vector<2x8x8xf32>
    "tpu.trace_stop"() : () -> ()
    %cst_39 = arith.constant 0.353553385 : f32
    %120 = vector.broadcast %cst_39 : f32 to vector<2x8x8xf32>
    %121 = arith.mulf %119, %120 : vector<2x8x8xf32>
    %cst_40 = arith.constant dense<0xFF800000> : vector<2x8xf32>
    %122 = vector.multi_reduction <maximumf>, %121, %cst_40 [2] : vector<2x8x8xf32> to vector<2x8xf32>
    %123 = vector.shape_cast %122 : vector<2x8xf32> to vector<2x8x1xf32>
    %124 = vector.broadcast %123 : vector<2x8x1xf32> to vector<2x8x8xf32>
    %125 = arith.subf %121, %124 : vector<2x8x8xf32>
    %126 = math.exp %125 : vector<2x8x8xf32>
    %cst_41 = arith.constant dense<0.000000e+00> : vector<2x8xf32>
    %127 = vector.multi_reduction <add>, %126, %cst_41 [2] : vector<2x8x8xf32> to vector<2x8xf32>
    %128 = vector.shape_cast %127 : vector<2x8xf32> to vector<2x8x1xf32>
    %129 = tpu.reciprocal %128 {approx = true} : vector<2x8x1xf32> -> vector<2x8x1xf32>
    %130 = vector.broadcast %129 : vector<2x8x1xf32> to vector<2x8x8xf32>
    %131 = arith.mulf %126, %130 : vector<2x8x8xf32>
    %132 = vector.extract_strided_slice %72 {offsets = [0, 0, 16], sizes = [2, 8, 8], strides = [1, 1, 1]} : vector<2x8x32xf32> to vector<2x8x8xf32>
    %133 = arith.truncf %131 : vector<2x8x8xf32> to vector<2x8x8xbf16>
    %134 = arith.truncf %132 : vector<2x8x8xf32> to vector<2x8x8xbf16>
    "tpu.trace_start"() <{level = 10 : i32, message = "bqk,bkd->bqd"}> : () -> ()
    %cst_42 = arith.constant dense<0.000000e+00> : vector<2x8x8xf32>
    %135 = tpu.matmul %133, %134, %cst_42 {dimension_numbers = #tpu.dot_dimension_numbers<[2], [1], [1], [2], [0, 0, 0, 1, 1, 2], [0], [0]>} : vector<2x8x8xbf16>, vector<2x8x8xbf16>, vector<2x8x8xf32> -> vector<2x8x8xf32>
    "tpu.trace_stop"() : () -> ()
    %136 = vector.extract_strided_slice %68 {offsets = [0, 0, 24], sizes = [2, 8, 8], strides = [1, 1, 1]} : vector<2x8x32xf32> to vector<2x8x8xf32>
    %137 = vector.extract_strided_slice %70 {offsets = [0, 0, 24], sizes = [2, 8, 8], strides = [1, 1, 1]} : vector<2x8x32xf32> to vector<2x8x8xf32>
    %138 = arith.truncf %136 : vector<2x8x8xf32> to vector<2x8x8xbf16>
    %139 = arith.truncf %137 : vector<2x8x8xf32> to vector<2x8x8xbf16>
    "tpu.trace_start"() <{level = 10 : i32, message = "bqd,bkd->bqk"}> : () -> ()
    %cst_43 = arith.constant dense<0.000000e+00> : vector<2x8x8xf32>
    %140 = tpu.matmul %138, %139, %cst_43 {dimension_numbers = #tpu.dot_dimension_numbers<[2], [2], [1], [1], [0, 0, 0, 1, 1, 1], [0], [0]>} : vector<2x8x8xbf16>, vector<2x8x8xbf16>, vector<2x8x8xf32> -> vector<2x8x8xf32>
    "tpu.trace_stop"() : () -> ()
    %cst_44 = arith.constant 0.353553385 : f32
    %141 = vector.broadcast %cst_44 : f32 to vector<2x8x8xf32>
    %142 = arith.mulf %140, %141 : vector<2x8x8xf32>
    %cst_45 = arith.constant dense<0xFF800000> : vector<2x8xf32>
    %143 = vector.multi_reduction <maximumf>, %142, %cst_45 [2] : vector<2x8x8xf32> to vector<2x8xf32>
    %144 = vector.shape_cast %143 : vector<2x8xf32> to vector<2x8x1xf32>
    %145 = vector.broadcast %144 : vector<2x8x1xf32> to vector<2x8x8xf32>
    %146 = arith.subf %142, %145 : vector<2x8x8xf32>
    %147 = math.exp %146 : vector<2x8x8xf32>
    %cst_46 = arith.constant dense<0.000000e+00> : vector<2x8xf32>
    %148 = vector.multi_reduction <add>, %147, %cst_46 [2] : vector<2x8x8xf32> to vector<2x8xf32>
    %149 = vector.shape_cast %148 : vector<2x8xf32> to vector<2x8x1xf32>
    %150 = tpu.reciprocal %149 {approx = true} : vector<2x8x1xf32> -> vector<2x8x1xf32>
    %151 = vector.broadcast %150 : vector<2x8x1xf32> to vector<2x8x8xf32>
    %152 = arith.mulf %147, %151 : vector<2x8x8xf32>
    %153 = vector.extract_strided_slice %72 {offsets = [0, 0, 24], sizes = [2, 8, 8], strides = [1, 1, 1]} : vector<2x8x32xf32> to vector<2x8x8xf32>
    %154 = arith.truncf %152 : vector<2x8x8xf32> to vector<2x8x8xbf16>
    %155 = arith.truncf %153 : vector<2x8x8xf32> to vector<2x8x8xbf16>
    "tpu.trace_start"() <{level = 10 : i32, message = "bqk,bkd->bqd"}> : () -> ()
    %cst_47 = arith.constant dense<0.000000e+00> : vector<2x8x8xf32>
    %156 = tpu.matmul %154, %155, %cst_47 {dimension_numbers = #tpu.dot_dimension_numbers<[2], [1], [1], [2], [0, 0, 0, 1, 1, 2], [0], [0]>} : vector<2x8x8xbf16>, vector<2x8x8xbf16>, vector<2x8x8xf32> -> vector<2x8x8xf32>
    "tpu.trace_stop"() : () -> ()
    %157 = tpu.concatenate %93, %114, %135, %156 in 2 : vector<2x8x8xf32>, vector<2x8x8xf32>, vector<2x8x8xf32>, vector<2x8x8xf32> -> vector<2x8x32xf32>
    %158 = vector.shape_cast %157 : vector<2x8x32xf32> to vector<16x32xf32>
    %159 = vector.extract_strided_slice %60 {offsets = [0, 96], sizes = [32, 32], strides = [1, 1]} : vector<32x128xbf16> to vector<32x32xbf16>
    %160 = arith.truncf %158 : vector<16x32xf32> to vector<16x32xbf16>
    %cst_48 = arith.constant dense<0.000000e+00> : vector<16x32xf32>
    %161 = tpu.matmul %160, %159, %cst_48 {dimension_numbers = #tpu.dot_dimension_numbers<[1], [0], [0], [1], [0, 0, 1, 1], [], []>} : vector<16x32xbf16>, vector<32x32xbf16>, vector<16x32xf32> -> vector<16x32xf32>
    %162 = vector.extract_strided_slice %0 {offsets = [13, 0], sizes = [1, 32], strides = [1, 1]} : vector<32x128xf32> to vector<1x32xf32>
    %163 = vector.broadcast %162 : vector<1x32xf32> to vector<16x32xf32>
    %164 = arith.addf %161, %163 : vector<16x32xf32>
    %165 = arith.addf %58, %164 : vector<16x32xf32>
    %166 = vector.extract_strided_slice %0 {offsets = [15, 0], sizes = [1, 32], strides = [1, 1]} : vector<32x128xf32> to vector<1x32xf32>
    %167 = vector.extract_strided_slice %0 {offsets = [17, 0], sizes = [1, 32], strides = [1, 1]} : vector<32x128xf32> to vector<1x32xf32>
    %cst_49 = arith.constant dense<0.000000e+00> : vector<16xf32>
    %168 = vector.multi_reduction <add>, %165, %cst_49 [1] : vector<16x32xf32> to vector<16xf32>
    %169 = vector.shape_cast %168 : vector<16xf32> to vector<16x1xf32>
    %cst_50 = arith.constant 3.200000e+01 : f32
    %170 = vector.broadcast %cst_50 : f32 to vector<16x1xf32>
    %171 = arith.divf %169, %170 : vector<16x1xf32>
    %172 = vector.broadcast %171 : vector<16x1xf32> to vector<16x32xf32>
    %173 = arith.subf %165, %172 : vector<16x32xf32>
    %174 = arith.mulf %173, %173 : vector<16x32xf32>
    %cst_51 = arith.constant dense<0.000000e+00> : vector<16xf32>
    %175 = vector.multi_reduction <add>, %174, %cst_51 [1] : vector<16x32xf32> to vector<16xf32>
    %176 = vector.shape_cast %175 : vector<16xf32> to vector<16x1xf32>
    %cst_52 = arith.constant 3.200000e+01 : f32
    %177 = vector.broadcast %cst_52 : f32 to vector<16x1xf32>
    %178 = arith.divf %176, %177 : vector<16x1xf32>
    %179 = vector.broadcast %171 : vector<16x1xf32> to vector<16x32xf32>
    %180 = arith.subf %165, %179 : vector<16x32xf32>
    %cst_53 = arith.constant 9.99999974E-6 : f32
    %181 = vector.broadcast %cst_53 : f32 to vector<16x1xf32>
    %182 = arith.addf %178, %181 : vector<16x1xf32>
    %183 = math.rsqrt %182 : vector<16x1xf32>
    %184 = vector.broadcast %183 : vector<16x1xf32> to vector<16x32xf32>
    %185 = arith.mulf %180, %184 : vector<16x32xf32>
    %186 = vector.broadcast %166 : vector<1x32xf32> to vector<16x32xf32>
    %187 = arith.mulf %185, %186 : vector<16x32xf32>
    %188 = vector.broadcast %167 : vector<1x32xf32> to vector<16x32xf32>
    %189 = arith.addf %187, %188 : vector<16x32xf32>
    %c0_54 = arith.constant 0 : index
    %c0_55 = arith.constant 0 : index
    %c0_56 = arith.constant 0 : index
    %190 = vector.load %arg4[%c0_54, %c0_55, %c0_56] : memref<2x32x64xbf16, #tpu.memory_space<vmem>>, vector<1x32x64xbf16>
    %191 = vector.shape_cast %190 : vector<1x32x64xbf16> to vector<32x64xbf16>
    %192 = arith.truncf %189 : vector<16x32xf32> to vector<16x32xbf16>
    %cst_57 = arith.constant dense<0.000000e+00> : vector<16x64xf32>
    %193 = tpu.matmul %192, %191, %cst_57 {dimension_numbers = #tpu.dot_dimension_numbers<[1], [0], [0], [1], [0, 0, 1, 1], [], []>} : vector<16x32xbf16>, vector<32x64xbf16>, vector<16x64xf32> -> vector<16x64xf32>
    %194 = vector.extract_strided_slice %0 {offsets = [19, 0], sizes = [1, 64], strides = [1, 1]} : vector<32x128xf32> to vector<1x64xf32>
    %195 = vector.broadcast %194 : vector<1x64xf32> to vector<16x64xf32>
    %196 = arith.addf %193, %195 : vector<16x64xf32>
    %cst_58 = arith.constant 0.000000e+00 : f32
    %197 = vector.broadcast %cst_58 : f32 to vector<16x64xf32>
    %198 = arith.maximumf %196, %197 : vector<16x64xf32>
    %c0_59 = arith.constant 0 : index
    %c0_60 = arith.constant 0 : index
    %c0_61 = arith.constant 0 : index
    %199 = vector.load %arg5[%c0_59, %c0_60, %c0_61] : memref<2x64x32xbf16, #tpu.memory_space<vmem>>, vector<1x64x32xbf16>
    %200 = vector.shape_cast %199 : vector<1x64x32xbf16> to vector<64x32xbf16>
    %201 = arith.truncf %198 : vector<16x64xf32> to vector<16x64xbf16>
    %cst_62 = arith.constant dense<0.000000e+00> : vector<16x32xf32>
    %202 = tpu.matmul %201, %200, %cst_62 {dimension_numbers = #tpu.dot_dimension_numbers<[1], [0], [0], [1], [0, 0, 1, 1], [], []>} : vector<16x64xbf16>, vector<64x32xbf16>, vector<16x32xf32> -> vector<16x32xf32>
    %203 = vector.extract_strided_slice %0 {offsets = [21, 0], sizes = [1, 32], strides = [1, 1]} : vector<32x128xf32> to vector<1x32xf32>
    %204 = vector.broadcast %203 : vector<1x32xf32> to vector<16x32xf32>
    %205 = arith.addf %202, %204 : vector<16x32xf32>
    %206 = arith.addf %189, %205 : vector<16x32xf32>
    %207 = vector.extract_strided_slice %0 {offsets = [23, 0], sizes = [1, 32], strides = [1, 1]} : vector<32x128xf32> to vector<1x32xf32>
    %208 = vector.extract_strided_slice %0 {offsets = [25, 0], sizes = [1, 32], strides = [1, 1]} : vector<32x128xf32> to vector<1x32xf32>
    %cst_63 = arith.constant dense<0.000000e+00> : vector<16xf32>
    %209 = vector.multi_reduction <add>, %206, %cst_63 [1] : vector<16x32xf32> to vector<16xf32>
    %210 = vector.shape_cast %209 : vector<16xf32> to vector<16x1xf32>
    %cst_64 = arith.constant 3.200000e+01 : f32
    %211 = vector.broadcast %cst_64 : f32 to vector<16x1xf32>
    %212 = arith.divf %210, %211 : vector<16x1xf32>
    %213 = vector.broadcast %212 : vector<16x1xf32> to vector<16x32xf32>
    %214 = arith.subf %206, %213 : vector<16x32xf32>
    %215 = arith.mulf %214, %214 : vector<16x32xf32>
    %cst_65 = arith.constant dense<0.000000e+00> : vector<16xf32>
    %216 = vector.multi_reduction <add>, %215, %cst_65 [1] : vector<16x32xf32> to vector<16xf32>
    %217 = vector.shape_cast %216 : vector<16xf32> to vector<16x1xf32>
    %cst_66 = arith.constant 3.200000e+01 : f32
    %218 = vector.broadcast %cst_66 : f32 to vector<16x1xf32>
    %219 = arith.divf %217, %218 : vector<16x1xf32>
    %220 = vector.broadcast %212 : vector<16x1xf32> to vector<16x32xf32>
    %221 = arith.subf %206, %220 : vector<16x32xf32>
    %cst_67 = arith.constant 9.99999974E-6 : f32
    %222 = vector.broadcast %cst_67 : f32 to vector<16x1xf32>
    %223 = arith.addf %219, %222 : vector<16x1xf32>
    %224 = math.rsqrt %223 : vector<16x1xf32>
    %225 = vector.broadcast %224 : vector<16x1xf32> to vector<16x32xf32>
    %226 = arith.mulf %221, %225 : vector<16x32xf32>
    %227 = vector.broadcast %207 : vector<1x32xf32> to vector<16x32xf32>
    %228 = arith.mulf %226, %227 : vector<16x32xf32>
    %229 = vector.broadcast %208 : vector<1x32xf32> to vector<16x32xf32>
    %230 = arith.addf %228, %229 : vector<16x32xf32>
    %c1 = arith.constant 1 : index
    %c0_68 = arith.constant 0 : index
    %c0_69 = arith.constant 0 : index
    %231 = vector.load %arg3[%c1, %c0_68, %c0_69] : memref<2x32x128xbf16, #tpu.memory_space<vmem>>, vector<1x32x128xbf16>
    %232 = vector.shape_cast %231 : vector<1x32x128xbf16> to vector<32x128xbf16>
    %233 = vector.extract_strided_slice %232 {offsets = [0, 0], sizes = [32, 96], strides = [1, 1]} : vector<32x128xbf16> to vector<32x96xbf16>
    %234 = arith.truncf %230 : vector<16x32xf32> to vector<16x32xbf16>
    %cst_70 = arith.constant dense<0.000000e+00> : vector<16x96xf32>
    %235 = tpu.matmul %234, %233, %cst_70 {dimension_numbers = #tpu.dot_dimension_numbers<[1], [0], [0], [1], [0, 0, 1, 1], [], []>} : vector<16x32xbf16>, vector<32x96xbf16>, vector<16x96xf32> -> vector<16x96xf32>
    %236 = vector.extract_strided_slice %0 {offsets = [12, 0], sizes = [1, 96], strides = [1, 1]} : vector<32x128xf32> to vector<1x96xf32>
    %237 = vector.broadcast %236 : vector<1x96xf32> to vector<16x96xf32>
    %238 = arith.addf %235, %237 : vector<16x96xf32>
    %239 = vector.extract_strided_slice %238 {offsets = [0, 0], sizes = [16, 32], strides = [1, 1]} : vector<16x96xf32> to vector<16x32xf32>
    %240 = vector.shape_cast %239 : vector<16x32xf32> to vector<2x8x32xf32>
    %241 = vector.extract_strided_slice %238 {offsets = [0, 32], sizes = [16, 32], strides = [1, 1]} : vector<16x96xf32> to vector<16x32xf32>
    %242 = vector.shape_cast %241 : vector<16x32xf32> to vector<2x8x32xf32>
    %243 = vector.extract_strided_slice %238 {offsets = [0, 64], sizes = [16, 32], strides = [1, 1]} : vector<16x96xf32> to vector<16x32xf32>
    %244 = vector.shape_cast %243 : vector<16x32xf32> to vector<2x8x32xf32>
    %245 = vector.extract_strided_slice %240 {offsets = [0, 0, 0], sizes = [2, 8, 8], strides = [1, 1, 1]} : vector<2x8x32xf32> to vector<2x8x8xf32>
    %246 = vector.extract_strided_slice %242 {offsets = [0, 0, 0], sizes = [2, 8, 8], strides = [1, 1, 1]} : vector<2x8x32xf32> to vector<2x8x8xf32>
    %247 = arith.truncf %245 : vector<2x8x8xf32> to vector<2x8x8xbf16>
    %248 = arith.truncf %246 : vector<2x8x8xf32> to vector<2x8x8xbf16>
    "tpu.trace_start"() <{level = 10 : i32, message = "bqd,bkd->bqk"}> : () -> ()
    %cst_71 = arith.constant dense<0.000000e+00> : vector<2x8x8xf32>
    %249 = tpu.matmul %247, %248, %cst_71 {dimension_numbers = #tpu.dot_dimension_numbers<[2], [2], [1], [1], [0, 0, 0, 1, 1, 1], [0], [0]>} : vector<2x8x8xbf16>, vector<2x8x8xbf16>, vector<2x8x8xf32> -> vector<2x8x8xf32>
    "tpu.trace_stop"() : () -> ()
    %cst_72 = arith.constant 0.353553385 : f32
    %250 = vector.broadcast %cst_72 : f32 to vector<2x8x8xf32>
    %251 = arith.mulf %249, %250 : vector<2x8x8xf32>
    %cst_73 = arith.constant dense<0xFF800000> : vector<2x8xf32>
    %252 = vector.multi_reduction <maximumf>, %251, %cst_73 [2] : vector<2x8x8xf32> to vector<2x8xf32>
    %253 = vector.shape_cast %252 : vector<2x8xf32> to vector<2x8x1xf32>
    %254 = vector.broadcast %253 : vector<2x8x1xf32> to vector<2x8x8xf32>
    %255 = arith.subf %251, %254 : vector<2x8x8xf32>
    %256 = math.exp %255 : vector<2x8x8xf32>
    %cst_74 = arith.constant dense<0.000000e+00> : vector<2x8xf32>
    %257 = vector.multi_reduction <add>, %256, %cst_74 [2] : vector<2x8x8xf32> to vector<2x8xf32>
    %258 = vector.shape_cast %257 : vector<2x8xf32> to vector<2x8x1xf32>
    %259 = tpu.reciprocal %258 {approx = true} : vector<2x8x1xf32> -> vector<2x8x1xf32>
    %260 = vector.broadcast %259 : vector<2x8x1xf32> to vector<2x8x8xf32>
    %261 = arith.mulf %256, %260 : vector<2x8x8xf32>
    %262 = vector.extract_strided_slice %244 {offsets = [0, 0, 0], sizes = [2, 8, 8], strides = [1, 1, 1]} : vector<2x8x32xf32> to vector<2x8x8xf32>
    %263 = arith.truncf %261 : vector<2x8x8xf32> to vector<2x8x8xbf16>
    %264 = arith.truncf %262 : vector<2x8x8xf32> to vector<2x8x8xbf16>
    "tpu.trace_start"() <{level = 10 : i32, message = "bqk,bkd->bqd"}> : () -> ()
    %cst_75 = arith.constant dense<0.000000e+00> : vector<2x8x8xf32>
    %265 = tpu.matmul %263, %264, %cst_75 {dimension_numbers = #tpu.dot_dimension_numbers<[2], [1], [1], [2], [0, 0, 0, 1, 1, 2], [0], [0]>} : vector<2x8x8xbf16>, vector<2x8x8xbf16>, vector<2x8x8xf32> -> vector<2x8x8xf32>
    "tpu.trace_stop"() : () -> ()
    %266 = vector.extract_strided_slice %240 {offsets = [0, 0, 8], sizes = [2, 8, 8], strides = [1, 1, 1]} : vector<2x8x32xf32> to vector<2x8x8xf32>
    %267 = vector.extract_strided_slice %242 {offsets = [0, 0, 8], sizes = [2, 8, 8], strides = [1, 1, 1]} : vector<2x8x32xf32> to vector<2x8x8xf32>
    %268 = arith.truncf %266 : vector<2x8x8xf32> to vector<2x8x8xbf16>
    %269 = arith.truncf %267 : vector<2x8x8xf32> to vector<2x8x8xbf16>
    "tpu.trace_start"() <{level = 10 : i32, message = "bqd,bkd->bqk"}> : () -> ()
    %cst_76 = arith.constant dense<0.000000e+00> : vector<2x8x8xf32>
    %270 = tpu.matmul %268, %269, %cst_76 {dimension_numbers = #tpu.dot_dimension_numbers<[2], [2], [1], [1], [0, 0, 0, 1, 1, 1], [0], [0]>} : vector<2x8x8xbf16>, vector<2x8x8xbf16>, vector<2x8x8xf32> -> vector<2x8x8xf32>
    "tpu.trace_stop"() : () -> ()
    %cst_77 = arith.constant 0.353553385 : f32
    %271 = vector.broadcast %cst_77 : f32 to vector<2x8x8xf32>
    %272 = arith.mulf %270, %271 : vector<2x8x8xf32>
    %cst_78 = arith.constant dense<0xFF800000> : vector<2x8xf32>
    %273 = vector.multi_reduction <maximumf>, %272, %cst_78 [2] : vector<2x8x8xf32> to vector<2x8xf32>
    %274 = vector.shape_cast %273 : vector<2x8xf32> to vector<2x8x1xf32>
    %275 = vector.broadcast %274 : vector<2x8x1xf32> to vector<2x8x8xf32>
    %276 = arith.subf %272, %275 : vector<2x8x8xf32>
    %277 = math.exp %276 : vector<2x8x8xf32>
    %cst_79 = arith.constant dense<0.000000e+00> : vector<2x8xf32>
    %278 = vector.multi_reduction <add>, %277, %cst_79 [2] : vector<2x8x8xf32> to vector<2x8xf32>
    %279 = vector.shape_cast %278 : vector<2x8xf32> to vector<2x8x1xf32>
    %280 = tpu.reciprocal %279 {approx = true} : vector<2x8x1xf32> -> vector<2x8x1xf32>
    %281 = vector.broadcast %280 : vector<2x8x1xf32> to vector<2x8x8xf32>
    %282 = arith.mulf %277, %281 : vector<2x8x8xf32>
    %283 = vector.extract_strided_slice %244 {offsets = [0, 0, 8], sizes = [2, 8, 8], strides = [1, 1, 1]} : vector<2x8x32xf32> to vector<2x8x8xf32>
    %284 = arith.truncf %282 : vector<2x8x8xf32> to vector<2x8x8xbf16>
    %285 = arith.truncf %283 : vector<2x8x8xf32> to vector<2x8x8xbf16>
    "tpu.trace_start"() <{level = 10 : i32, message = "bqk,bkd->bqd"}> : () -> ()
    %cst_80 = arith.constant dense<0.000000e+00> : vector<2x8x8xf32>
    %286 = tpu.matmul %284, %285, %cst_80 {dimension_numbers = #tpu.dot_dimension_numbers<[2], [1], [1], [2], [0, 0, 0, 1, 1, 2], [0], [0]>} : vector<2x8x8xbf16>, vector<2x8x8xbf16>, vector<2x8x8xf32> -> vector<2x8x8xf32>
    "tpu.trace_stop"() : () -> ()
    %287 = vector.extract_strided_slice %240 {offsets = [0, 0, 16], sizes = [2, 8, 8], strides = [1, 1, 1]} : vector<2x8x32xf32> to vector<2x8x8xf32>
    %288 = vector.extract_strided_slice %242 {offsets = [0, 0, 16], sizes = [2, 8, 8], strides = [1, 1, 1]} : vector<2x8x32xf32> to vector<2x8x8xf32>
    %289 = arith.truncf %287 : vector<2x8x8xf32> to vector<2x8x8xbf16>
    %290 = arith.truncf %288 : vector<2x8x8xf32> to vector<2x8x8xbf16>
    "tpu.trace_start"() <{level = 10 : i32, message = "bqd,bkd->bqk"}> : () -> ()
    %cst_81 = arith.constant dense<0.000000e+00> : vector<2x8x8xf32>
    %291 = tpu.matmul %289, %290, %cst_81 {dimension_numbers = #tpu.dot_dimension_numbers<[2], [2], [1], [1], [0, 0, 0, 1, 1, 1], [0], [0]>} : vector<2x8x8xbf16>, vector<2x8x8xbf16>, vector<2x8x8xf32> -> vector<2x8x8xf32>
    "tpu.trace_stop"() : () -> ()
    %cst_82 = arith.constant 0.353553385 : f32
    %292 = vector.broadcast %cst_82 : f32 to vector<2x8x8xf32>
    %293 = arith.mulf %291, %292 : vector<2x8x8xf32>
    %cst_83 = arith.constant dense<0xFF800000> : vector<2x8xf32>
    %294 = vector.multi_reduction <maximumf>, %293, %cst_83 [2] : vector<2x8x8xf32> to vector<2x8xf32>
    %295 = vector.shape_cast %294 : vector<2x8xf32> to vector<2x8x1xf32>
    %296 = vector.broadcast %295 : vector<2x8x1xf32> to vector<2x8x8xf32>
    %297 = arith.subf %293, %296 : vector<2x8x8xf32>
    %298 = math.exp %297 : vector<2x8x8xf32>
    %cst_84 = arith.constant dense<0.000000e+00> : vector<2x8xf32>
    %299 = vector.multi_reduction <add>, %298, %cst_84 [2] : vector<2x8x8xf32> to vector<2x8xf32>
    %300 = vector.shape_cast %299 : vector<2x8xf32> to vector<2x8x1xf32>
    %301 = tpu.reciprocal %300 {approx = true} : vector<2x8x1xf32> -> vector<2x8x1xf32>
    %302 = vector.broadcast %301 : vector<2x8x1xf32> to vector<2x8x8xf32>
    %303 = arith.mulf %298, %302 : vector<2x8x8xf32>
    %304 = vector.extract_strided_slice %244 {offsets = [0, 0, 16], sizes = [2, 8, 8], strides = [1, 1, 1]} : vector<2x8x32xf32> to vector<2x8x8xf32>
    %305 = arith.truncf %303 : vector<2x8x8xf32> to vector<2x8x8xbf16>
    %306 = arith.truncf %304 : vector<2x8x8xf32> to vector<2x8x8xbf16>
    "tpu.trace_start"() <{level = 10 : i32, message = "bqk,bkd->bqd"}> : () -> ()
    %cst_85 = arith.constant dense<0.000000e+00> : vector<2x8x8xf32>
    %307 = tpu.matmul %305, %306, %cst_85 {dimension_numbers = #tpu.dot_dimension_numbers<[2], [1], [1], [2], [0, 0, 0, 1, 1, 2], [0], [0]>} : vector<2x8x8xbf16>, vector<2x8x8xbf16>, vector<2x8x8xf32> -> vector<2x8x8xf32>
    "tpu.trace_stop"() : () -> ()
    %308 = vector.extract_strided_slice %240 {offsets = [0, 0, 24], sizes = [2, 8, 8], strides = [1, 1, 1]} : vector<2x8x32xf32> to vector<2x8x8xf32>
    %309 = vector.extract_strided_slice %242 {offsets = [0, 0, 24], sizes = [2, 8, 8], strides = [1, 1, 1]} : vector<2x8x32xf32> to vector<2x8x8xf32>
    %310 = arith.truncf %308 : vector<2x8x8xf32> to vector<2x8x8xbf16>
    %311 = arith.truncf %309 : vector<2x8x8xf32> to vector<2x8x8xbf16>
    "tpu.trace_start"() <{level = 10 : i32, message = "bqd,bkd->bqk"}> : () -> ()
    %cst_86 = arith.constant dense<0.000000e+00> : vector<2x8x8xf32>
    %312 = tpu.matmul %310, %311, %cst_86 {dimension_numbers = #tpu.dot_dimension_numbers<[2], [2], [1], [1], [0, 0, 0, 1, 1, 1], [0], [0]>} : vector<2x8x8xbf16>, vector<2x8x8xbf16>, vector<2x8x8xf32> -> vector<2x8x8xf32>
    "tpu.trace_stop"() : () -> ()
    %cst_87 = arith.constant 0.353553385 : f32
    %313 = vector.broadcast %cst_87 : f32 to vector<2x8x8xf32>
    %314 = arith.mulf %312, %313 : vector<2x8x8xf32>
    %cst_88 = arith.constant dense<0xFF800000> : vector<2x8xf32>
    %315 = vector.multi_reduction <maximumf>, %314, %cst_88 [2] : vector<2x8x8xf32> to vector<2x8xf32>
    %316 = vector.shape_cast %315 : vector<2x8xf32> to vector<2x8x1xf32>
    %317 = vector.broadcast %316 : vector<2x8x1xf32> to vector<2x8x8xf32>
    %318 = arith.subf %314, %317 : vector<2x8x8xf32>
    %319 = math.exp %318 : vector<2x8x8xf32>
    %cst_89 = arith.constant dense<0.000000e+00> : vector<2x8xf32>
    %320 = vector.multi_reduction <add>, %319, %cst_89 [2] : vector<2x8x8xf32> to vector<2x8xf32>
    %321 = vector.shape_cast %320 : vector<2x8xf32> to vector<2x8x1xf32>
    %322 = tpu.reciprocal %321 {approx = true} : vector<2x8x1xf32> -> vector<2x8x1xf32>
    %323 = vector.broadcast %322 : vector<2x8x1xf32> to vector<2x8x8xf32>
    %324 = arith.mulf %319, %323 : vector<2x8x8xf32>
    %325 = vector.extract_strided_slice %244 {offsets = [0, 0, 24], sizes = [2, 8, 8], strides = [1, 1, 1]} : vector<2x8x32xf32> to vector<2x8x8xf32>
    %326 = arith.truncf %324 : vector<2x8x8xf32> to vector<2x8x8xbf16>
    %327 = arith.truncf %325 : vector<2x8x8xf32> to vector<2x8x8xbf16>
    "tpu.trace_start"() <{level = 10 : i32, message = "bqk,bkd->bqd"}> : () -> ()
    %cst_90 = arith.constant dense<0.000000e+00> : vector<2x8x8xf32>
    %328 = tpu.matmul %326, %327, %cst_90 {dimension_numbers = #tpu.dot_dimension_numbers<[2], [1], [1], [2], [0, 0, 0, 1, 1, 2], [0], [0]>} : vector<2x8x8xbf16>, vector<2x8x8xbf16>, vector<2x8x8xf32> -> vector<2x8x8xf32>
    "tpu.trace_stop"() : () -> ()
    %329 = tpu.concatenate %265, %286, %307, %328 in 2 : vector<2x8x8xf32>, vector<2x8x8xf32>, vector<2x8x8xf32>, vector<2x8x8xf32> -> vector<2x8x32xf32>
    %330 = vector.shape_cast %329 : vector<2x8x32xf32> to vector<16x32xf32>
    %331 = vector.extract_strided_slice %232 {offsets = [0, 96], sizes = [32, 32], strides = [1, 1]} : vector<32x128xbf16> to vector<32x32xbf16>
    %332 = arith.truncf %330 : vector<16x32xf32> to vector<16x32xbf16>
    %cst_91 = arith.constant dense<0.000000e+00> : vector<16x32xf32>
    %333 = tpu.matmul %332, %331, %cst_91 {dimension_numbers = #tpu.dot_dimension_numbers<[1], [0], [0], [1], [0, 0, 1, 1], [], []>} : vector<16x32xbf16>, vector<32x32xbf16>, vector<16x32xf32> -> vector<16x32xf32>
    %334 = vector.extract_strided_slice %0 {offsets = [14, 0], sizes = [1, 32], strides = [1, 1]} : vector<32x128xf32> to vector<1x32xf32>
    %335 = vector.broadcast %334 : vector<1x32xf32> to vector<16x32xf32>
    %336 = arith.addf %333, %335 : vector<16x32xf32>
    %337 = arith.addf %230, %336 : vector<16x32xf32>
    %338 = vector.extract_strided_slice %0 {offsets = [16, 0], sizes = [1, 32], strides = [1, 1]} : vector<32x128xf32> to vector<1x32xf32>
    %339 = vector.extract_strided_slice %0 {offsets = [18, 0], sizes = [1, 32], strides = [1, 1]} : vector<32x128xf32> to vector<1x32xf32>
    %cst_92 = arith.constant dense<0.000000e+00> : vector<16xf32>
    %340 = vector.multi_reduction <add>, %337, %cst_92 [1] : vector<16x32xf32> to vector<16xf32>
    %341 = vector.shape_cast %340 : vector<16xf32> to vector<16x1xf32>
    %cst_93 = arith.constant 3.200000e+01 : f32
    %342 = vector.broadcast %cst_93 : f32 to vector<16x1xf32>
    %343 = arith.divf %341, %342 : vector<16x1xf32>
    %344 = vector.broadcast %343 : vector<16x1xf32> to vector<16x32xf32>
    %345 = arith.subf %337, %344 : vector<16x32xf32>
    %346 = arith.mulf %345, %345 : vector<16x32xf32>
    %cst_94 = arith.constant dense<0.000000e+00> : vector<16xf32>
    %347 = vector.multi_reduction <add>, %346, %cst_94 [1] : vector<16x32xf32> to vector<16xf32>
    %348 = vector.shape_cast %347 : vector<16xf32> to vector<16x1xf32>
    %cst_95 = arith.constant 3.200000e+01 : f32
    %349 = vector.broadcast %cst_95 : f32 to vector<16x1xf32>
    %350 = arith.divf %348, %349 : vector<16x1xf32>
    %351 = vector.broadcast %343 : vector<16x1xf32> to vector<16x32xf32>
    %352 = arith.subf %337, %351 : vector<16x32xf32>
    %cst_96 = arith.constant 9.99999974E-6 : f32
    %353 = vector.broadcast %cst_96 : f32 to vector<16x1xf32>
    %354 = arith.addf %350, %353 : vector<16x1xf32>
    %355 = math.rsqrt %354 : vector<16x1xf32>
    %356 = vector.broadcast %355 : vector<16x1xf32> to vector<16x32xf32>
    %357 = arith.mulf %352, %356 : vector<16x32xf32>
    %358 = vector.broadcast %338 : vector<1x32xf32> to vector<16x32xf32>
    %359 = arith.mulf %357, %358 : vector<16x32xf32>
    %360 = vector.broadcast %339 : vector<1x32xf32> to vector<16x32xf32>
    %361 = arith.addf %359, %360 : vector<16x32xf32>
    %c1_97 = arith.constant 1 : index
    %c0_98 = arith.constant 0 : index
    %c0_99 = arith.constant 0 : index
    %362 = vector.load %arg4[%c1_97, %c0_98, %c0_99] : memref<2x32x64xbf16, #tpu.memory_space<vmem>>, vector<1x32x64xbf16>
    %363 = vector.shape_cast %362 : vector<1x32x64xbf16> to vector<32x64xbf16>
    %364 = arith.truncf %361 : vector<16x32xf32> to vector<16x32xbf16>
    %cst_100 = arith.constant dense<0.000000e+00> : vector<16x64xf32>
    %365 = tpu.matmul %364, %363, %cst_100 {dimension_numbers = #tpu.dot_dimension_numbers<[1], [0], [0], [1], [0, 0, 1, 1], [], []>} : vector<16x32xbf16>, vector<32x64xbf16>, vector<16x64xf32> -> vector<16x64xf32>
    %366 = vector.extract_strided_slice %0 {offsets = [20, 0], sizes = [1, 64], strides = [1, 1]} : vector<32x128xf32> to vector<1x64xf32>
    %367 = vector.broadcast %366 : vector<1x64xf32> to vector<16x64xf32>
    %368 = arith.addf %365, %367 : vector<16x64xf32>
    %cst_101 = arith.constant 0.000000e+00 : f32
    %369 = vector.broadcast %cst_101 : f32 to vector<16x64xf32>
    %370 = arith.maximumf %368, %369 : vector<16x64xf32>
    %c1_102 = arith.constant 1 : index
    %c0_103 = arith.constant 0 : index
    %c0_104 = arith.constant 0 : index
    %371 = vector.load %arg5[%c1_102, %c0_103, %c0_104] : memref<2x64x32xbf16, #tpu.memory_space<vmem>>, vector<1x64x32xbf16>
    %372 = vector.shape_cast %371 : vector<1x64x32xbf16> to vector<64x32xbf16>
    %373 = arith.truncf %370 : vector<16x64xf32> to vector<16x64xbf16>
    %cst_105 = arith.constant dense<0.000000e+00> : vector<16x32xf32>
    %374 = tpu.matmul %373, %372, %cst_105 {dimension_numbers = #tpu.dot_dimension_numbers<[1], [0], [0], [1], [0, 0, 1, 1], [], []>} : vector<16x64xbf16>, vector<64x32xbf16>, vector<16x32xf32> -> vector<16x32xf32>
    %375 = vector.extract_strided_slice %0 {offsets = [22, 0], sizes = [1, 32], strides = [1, 1]} : vector<32x128xf32> to vector<1x32xf32>
    %376 = vector.broadcast %375 : vector<1x32xf32> to vector<16x32xf32>
    %377 = arith.addf %374, %376 : vector<16x32xf32>
    %378 = arith.addf %361, %377 : vector<16x32xf32>
    %379 = vector.extract_strided_slice %0 {offsets = [24, 0], sizes = [1, 32], strides = [1, 1]} : vector<32x128xf32> to vector<1x32xf32>
    %380 = vector.extract_strided_slice %0 {offsets = [26, 0], sizes = [1, 32], strides = [1, 1]} : vector<32x128xf32> to vector<1x32xf32>
    %cst_106 = arith.constant dense<0.000000e+00> : vector<16xf32>
    %381 = vector.multi_reduction <add>, %378, %cst_106 [1] : vector<16x32xf32> to vector<16xf32>
    %382 = vector.shape_cast %381 : vector<16xf32> to vector<16x1xf32>
    %cst_107 = arith.constant 3.200000e+01 : f32
    %383 = vector.broadcast %cst_107 : f32 to vector<16x1xf32>
    %384 = arith.divf %382, %383 : vector<16x1xf32>
    %385 = vector.broadcast %384 : vector<16x1xf32> to vector<16x32xf32>
    %386 = arith.subf %378, %385 : vector<16x32xf32>
    %387 = arith.mulf %386, %386 : vector<16x32xf32>
    %cst_108 = arith.constant dense<0.000000e+00> : vector<16xf32>
    %388 = vector.multi_reduction <add>, %387, %cst_108 [1] : vector<16x32xf32> to vector<16xf32>
    %389 = vector.shape_cast %388 : vector<16xf32> to vector<16x1xf32>
    %cst_109 = arith.constant 3.200000e+01 : f32
    %390 = vector.broadcast %cst_109 : f32 to vector<16x1xf32>
    %391 = arith.divf %389, %390 : vector<16x1xf32>
    %392 = vector.broadcast %384 : vector<16x1xf32> to vector<16x32xf32>
    %393 = arith.subf %378, %392 : vector<16x32xf32>
    %cst_110 = arith.constant 9.99999974E-6 : f32
    %394 = vector.broadcast %cst_110 : f32 to vector<16x1xf32>
    %395 = arith.addf %391, %394 : vector<16x1xf32>
    %396 = math.rsqrt %395 : vector<16x1xf32>
    %397 = vector.broadcast %396 : vector<16x1xf32> to vector<16x32xf32>
    %398 = arith.mulf %393, %397 : vector<16x32xf32>
    %399 = vector.broadcast %379 : vector<1x32xf32> to vector<16x32xf32>
    %400 = arith.mulf %398, %399 : vector<16x32xf32>
    %401 = vector.broadcast %380 : vector<1x32xf32> to vector<16x32xf32>
    %402 = arith.addf %400, %401 : vector<16x32xf32>
    %403 = vector.shape_cast %402 : vector<16x32xf32> to vector<2x8x32xf32>
    %cst_111 = arith.constant dense<0.000000e+00> : vector<2x32xf32>
    %404 = vector.multi_reduction <add>, %403, %cst_111 [1] : vector<2x8x32xf32> to vector<2x32xf32>
    %cst_112 = arith.constant 8.000000e+00 : f32
    %405 = vector.broadcast %cst_112 : f32 to vector<2x32xf32>
    %406 = arith.divf %404, %405 : vector<2x32xf32>
    %c0_113 = arith.constant 0 : index
    %c32 = arith.constant 32 : index
    %407 = vector.load %arg6[%c0_113, %c32] : memref<32x192xbf16, #tpu.memory_space<vmem>>, vector<32x32xbf16>
    %408 = arith.truncf %406 : vector<2x32xf32> to vector<2x32xbf16>
    %cst_114 = arith.constant dense<0.000000e+00> : vector<2x32xf32>
    %409 = tpu.matmul %408, %407, %cst_114 {dimension_numbers = #tpu.dot_dimension_numbers<[1], [0], [0], [1], [0, 0, 1, 1], [], []>} : vector<2x32xbf16>, vector<32x32xbf16>, vector<2x32xf32> -> vector<2x32xf32>
    %410 = vector.extract_strided_slice %0 {offsets = [9, 0], sizes = [1, 32], strides = [1, 1]} : vector<32x128xf32> to vector<1x32xf32>
    %411 = vector.broadcast %410 : vector<1x32xf32> to vector<2x32xf32>
    %412 = arith.addf %409, %411 : vector<2x32xf32>
    %cst_115 = arith.constant 0.000000e+00 : f32
    %413 = vector.broadcast %cst_115 : f32 to vector<2x32xf32>
    %414 = arith.maximumf %412, %413 : vector<2x32xf32>
    %c0_116 = arith.constant 0 : index
    %c64 = arith.constant 64 : index
    %415 = vector.load %arg6[%c0_116, %c64] : memref<32x192xbf16, #tpu.memory_space<vmem>>, vector<32x128xbf16>
    %416 = arith.truncf %414 : vector<2x32xf32> to vector<2x32xbf16>
    %cst_117 = arith.constant dense<0.000000e+00> : vector<2x128xf32>
    %417 = tpu.matmul %416, %415, %cst_117 {dimension_numbers = #tpu.dot_dimension_numbers<[1], [0], [0], [1], [0, 0, 1, 1], [], []>} : vector<2x32xbf16>, vector<32x128xbf16>, vector<2x128xf32> -> vector<2x128xf32>
    %418 = vector.extract_strided_slice %0 {offsets = [10, 0], sizes = [1, 128], strides = [1, 1]} : vector<32x128xf32> to vector<1x128xf32>
    %419 = vector.broadcast %418 : vector<1x128xf32> to vector<2x128xf32>
    %420 = arith.addf %417, %419 : vector<2x128xf32>
    %c0_118 = arith.constant 0 : index
    %c0_119 = arith.constant 0 : index
    %421 = vector.load %arg8[%c0_118, %c0_119] : memref<2x128xf32, #tpu.memory_space<vmem>>, vector<2x128xf32>
    tpu.vector_store %arg8[%c0_118, %c0_119], %420 {strides = array<i32>} : memref<2x128xf32, #tpu.memory_space<vmem>>, vector<2x128xf32>,
    return
  }
}

</mosaic_0001>

<bundles_post_ra>
// kernel: tpu_custom_call.1
= control target key start
LH: loop header
LB: loop body
LE: loop exit
PB: predicated region body
PF: predicated region fallthrough
CT: control target
= control target key end

     0   :  { %13 = vsyncpa [#allocation3], 0  ;;  %s4932_s0 = inlined_call_operand.hbm [shape: f32[2,8,32], index: 0, kind: input, shape index: {}]   ;;  %s4933_s1 = inlined_call_operand.hbm [shape: f32[2,8,32], index: 1, kind: input, shape index: {}]   ;;  %s4934_s2 = inlined_call_operand.hbm [shape: f32[2,8,32], index: 2, kind: input, shape index: {}]   ;;  %s4935_s3 = inlined_call_operand.vmem [shape: bf16[2,32,128], index: 3, kind: input, shape index: {}]   ;;  %s4936_s4 = inlined_call_operand.vmem [shape: bf16[2,32,64], index: 4, kind: input, shape index: {}]   ;;  %s4937_s5 = inlined_call_operand.vmem [shape: bf16[2,64,32], index: 5, kind: input, shape index: {}]   ;;  %s4938_s6 = inlined_call_operand.vmem [shape: bf16[32,192], index: 6, kind: input, shape index: {}]   ;;  %s4939_s7 = inlined_call_operand.hbm [shape: f32[32,128], index: 7, kind: input, shape index: {}]   ;;  %s4940_s8 = inlined_call_operand.hbm [shape: f32[2,128], index: 8, kind: output, shape index: {}]  }
   0x1   :  { %14 = vsyncpa [#allocation6], 0 }
   0x2   :  { %15 = vsyncpa [#allocation9], 0 }
   0x3   :  { %16 = vsyncpa [#allocation4], 0  ;;  %s4163_s27 = smov [#allocation5]   ;;  %s4164_s29 = smov [#allocation2]  }
   0x4   :  { %s34_s28 = sshll.u32 %s4163_s27, 4  ;;  %s22_s30 = sshll.u32 %s4164_s29, 4  ;;  %s35_s28 = int_to_ptr.vmem [resolvable:$true] %s34_s28  ;;  %s23_s30 = int_to_ptr.vmem [resolvable:$true] %s22_s30 }
   0x5   :  { %s4063_s9 = scalar_lea.vmem %s35_s28, 256  ;;  %p4068_p1 = scmp.lt.s32.totalorder %s35_s28, %s35_s28 }
   0x6   :  { %p4064_p0 = scmp.ne.s32.totalorder %s35_s28, %s4063_s9  ;;  %p4069_p2 = scmp.lt.s32.totalorder %s4063_s9, %s4063_s9 }
   0x8   :  { %p4070_p3 = por %p4069_p2, %p4068_p1 }
   0xa   :  { %p4071_p4 = pnand %p4070_p3, %p4064_p0 }
   0xc   :  { %4074 = shalt.err (!%p4071_p4)
}
   0xd   :  { %s4165_s10 = smov 128   ;;  %s4166_s11 = smov 8  }
   0xe   :  { %40 = dma.hbm_to_vmem [thread:$0]  %s4933_s1, 256, %s35_s28, [#allocation6], %s4165_s10, %s4165_s10, %s4166_s11  }
   0xf   :  { %s4083_s14 = scalar_lea.vmem %s23_s30, 256  ;;  %p4088_p6 = scmp.lt.s32.totalorder %s23_s30, %s23_s30 }
  0x10   :  { %p4084_p5 = scmp.ne.s32.totalorder %s23_s30, %s4083_s14  ;;  %p4089_p7 = scmp.lt.s32.totalorder %s4083_s14, %s4083_s14 }
  0x12   :  { %p4090_p8 = por %p4089_p7, %p4088_p6 }
  0x14   :  { %p4091_p9 = pnand %p4090_p8, %p4084_p5 }
  0x16   :  { %4094 = shalt.err (!%p4091_p9)
}
  0x17   :  { %28 = dma.hbm_to_vmem [thread:$0]  %s4932_s0, 256, %s23_s30, [#allocation3], %s4165_s10, %s4165_s10, %s4166_s11  }
  0x18   :  { %s4167_s17 = smov [#allocation7]   ;;  %s4168_s19 = smov [#allocation8]  }
  0x19   :  { %s46_s18 = sshll.u32 %s4167_s17, 4  ;;  %s66_s20 = sshll.u32 %s4168_s19, 4  ;;  %s47_s18 = int_to_ptr.vmem [resolvable:$true] %s46_s18  ;;  %s67_s20 = int_to_ptr.vmem [resolvable:$true] %s66_s20 }
  0x1a   :  { %s4103_s1 = scalar_lea.vmem %s47_s18, 256  ;;  %p4108_p11 = scmp.lt.s32.totalorder %s47_s18, %s47_s18 }
  0x1b   :  { %p4104_p10 = scmp.ne.s32.totalorder %s47_s18, %s4103_s1  ;;  %p4109_p12 = scmp.lt.s32.totalorder %s4103_s1, %s4103_s1 }
  0x1d   :  { %p4110_p13 = por %p4109_p12, %p4108_p11 }
  0x1f   :  { %p4111_p0 = pnand %p4110_p13, %p4104_p10 }
  0x21   :  { %4114 = shalt.err (!%p4111_p0)
}
  0x22   :  { %52 = dma.hbm_to_vmem [thread:$0]  %s4934_s2, 256, %s47_s18, [#allocation6], %s4165_s10, %s4165_s10, %s4166_s11  }
  0x23   :  { %s4123_s0 = scalar_lea.vmem %s67_s20, 512  ;;  %p4128_p2 = scmp.lt.s32.totalorder %s67_s20, %s67_s20 }
  0x24   :  { %p4124_p1 = scmp.ne.s32.totalorder %s67_s20, %s4123_s0  ;;  %p4129_p3 = scmp.lt.s32.totalorder %s4123_s0, %s4123_s0 }
  0x26   :  { %p4130_p4 = por %p4129_p3, %p4128_p2 }
  0x28   :  { %p4131_p5 = pnand %p4130_p4, %p4124_p1 }
  0x2a   :  { %4134 = shalt.err (!%p4131_p5)
}
  0x2b   :  { %72 = dma.hbm_to_vmem [thread:$0]  %s4939_s7, 512, %s67_s20, [#allocation9], %s4165_s10, %s4165_s10, %s4166_s11  }
  0x2c   :  { %4155 = dma.done.wait [#allocation3], 256  }
  0x2d   :  { %4156 = vsyncadd [#allocation3], 4294967040 }
  0x2e   :  { %4157 = dma.done.wait [#allocation6], 512  }
  0x2f   :  { %4158 = vsyncadd [#allocation6], 4294966784 }
  0x30   :  { %4159 = dma.done.wait [#allocation9], 512  }
  0x31   :  { %4160 = vsyncadd [#allocation9], 4294966784  ;;  %v4169_v0 = vmov 0.0   ;;  %vm4170_vm0 = vmmov 0   ;;  %v92_v1 = vld [vmem:[#allocation5] sm:$0xff]  ;;  %vm100_vm1 = vcmask 261120   ;;  %v316_v62 = vlaneseq }
  0x32   :  { %3541 = vmatprep.subr.bf16.mxu0 %v4169_v0  ;;  %3547 = vmatprep.subr.bf16.mxu1 %v4169_v0  ;;  %v93_v2 = vld [vmem:[#allocation5 + $0x8] sm:$0xff]  ;;  %v98_v3 = vpack.c.bf16 %v92_v1, %v92_v1  ;;  %v4261_v5 = vld [vmem:[#allocation7] sm:$0xff]  ;;  %v4263_v6 = vld [vmem:[#allocation7 + $0x8] sm:$0xff]  ;;  %vm195_vm2 = vcmask 64512   ;;  %vm223_vm3 = vcmask 1043456   ;;  %vm594_vm4 = vcmask 1046528  }
  0x33   :  { %3543 = vmatprep.mubr.msk.bf16.mxu0 %vm4170_vm0, %v4169_v0  ;;  %3549 = vmatprep.mubr.msk.bf16.mxu1 %vm4170_vm0, %v4169_v0  ;;  %v99_v4 = vpack.c.bf16 %v93_v2, %v93_v2  ;;  %v96_v9 = vpack.c.bf16 %v4261_v5, %v4261_v5  ;;  %v97_v10 = vpack.c.bf16 %v4263_v6, %v4263_v6  ;;  %v3930_v43 = vld [vmem:[%s4938_s6 + $0x10] ss:$8 sps:$4 sm:$0xff]   ;;  %v3931_v44 = vld [vmem:[%s4938_s6] ss:$8 sps:$4 sm:$0xff]   ;;  %v4318_v63 = vshrl.u32 %v316_v62, 7  ;;  %s4171_s9 = smov 96  }
  0x34   :  { %v105_v7 = vsel %vm100_vm1, %v98_v3, 0  ;;  %v224_v33 = vsel %vm223_vm3, %v98_v3, 0  ;;  %v4306_v56 = vld [vmem:[#allocation2] sm:$0xff]  ;;  %v4311_v59 = vld [vmem:[#allocation2 + $0x8] sm:$0xff]  ;;  %v4323_v2 = vld [vmem:[#allocation8] sm:$0xff]  ;;  %s4172_s10 = smov 64  }
  0x35   :  { %v151_v8 = vsel %vm100_vm1, %v99_v4, 0  ;;  %3542 = vmatpush3.bf16.xpose.msra.mxu0 %v105_v7  ;;  %v269_v34 = vsel %vm223_vm3, %v99_v4, 0  ;;  %v380_v57 = vpack.c.bf16 %v4306_v56, %v4306_v56  ;;  %v381_v60 = vpack.c.bf16 %v4311_v59, %v4311_v59  ;;  %s4173_s12 = smov 88   ;;  %s4174_s13 = smov 120  }
  0x36   :  { %3548 = vmatpush3.bf16.xpose.msra.mxu1 %v151_v8  ;;  %3553 = vmatprep.subr.bf16.mxu0 %v4169_v0  ;;  %v4321_v1 = vsub.s32 0, %v4318_v63  ;;  %s4175_s14 = smov 56   ;;  %s4176_s15 = smov 80   ;;  %vm1580_vm5 = vcmask 130048   ;;  %vm1583_vm6 = vcmask 195584   ;;  %vm1786_vm7 = vcmask 523264  }
  0x37   :  { %3559 = vmatprep.subr.bf16.mxu1 %v4169_v0  ;;  %v386_v58 = vsel %vm100_vm1, %v380_v57, 0  ;;  %v432_v61 = vsel %vm100_vm1, %v381_v60, 0  ;;  %s4177_s16 = smov 112   ;;  %s4178_s17 = smov 48   ;;  %vm3171_vm8 = vcmask 1041409  }
  0x38   :  { %v319_v3 = vrot.slane %v4323_v2, %v4321_v1  ;;  %s4179_s18 = smov 72   ;;  %s4180_s19 = smov 104  }
  0x39   :  { %s4181_s20 = smov 40   ;;  %s4182_s1 = smov 32  }
  0x3a   :  { %s4183_s21 = smov 16   ;;  %s4184_s22 = smov 24  }
  0x3c   :  { %3544 = vmatmul.mubr.msk.bf16.vlgmr.msra.gmra.mxu0 %vm100_vm1, %v96_v9 }
  0x3d   :  { %3550 = vmatmul.mubr.msk.bf16.vlgmr.msra.gmra.mxu1 %vm100_vm1, %v97_v10  ;;  %3555 = vmatprep.mubr.msk.bf16.mxu0 %vm4170_vm0, %v4169_v0 }
  0x3e   :  { %3561 = vmatprep.mubr.msk.bf16.mxu1 %vm4170_vm0, %v4169_v0  ;;  %3554 = vmatpush3.bf16.msra.mxu0 %v224_v33 }
  0x3f   :  { %3560 = vmatpush3.bf16.msra.mxu1 %v269_v34  ;;  %3565 = vmatprep.subr.bf16.mxu0 %v4169_v0 }
  0x40   :  { %3573 = vmatprep.subr.bf16.mxu1 %v4169_v0 }
  0xfc   :  { %v141_v11 = vpop.f32.mrf.mxu0 }
  0xfd   :  { %v187_v12 = vpop.f32.mrf.mxu1  ;;  %v193_v13 = vmul.f32 0.17677669, %v141_v11 }
  0xfe   :  { %v194_v14 = vmul.f32 0.17677669, %v187_v12  ;;  %v3545_v15 = vpop.f32.mrf.mxu0 }
  0xff   :  { %v3551_v16 = vpop.f32.mrf.mxu1  ;;  %v196_v17 = vsel %vm195_vm2, %v193_v13, -inf }
 0x100   :  { %197 = vmax.xlane.f32.xlu0 %v196_v17  ;;  %v144_v19 = vpop.f32.mrf.mxu0  ;;  %v199_v20 = vsel %vm195_vm2, %v194_v14, -inf }
 0x101   :  { %v190_v18 = vpop.f32.mrf.mxu1 }
 0x102   :  { %v3546_v21 = vpop.f32.mrf.mxu0 }
 0x103   :  { %v3552_v22 = vpop.f32.mrf.mxu1 }
 0x104   :  { %200 = vmax.xlane.f32.xlu0 %v199_v20 }
 0x189   :  { %v198_v23 = vpop.xlane.xlu0 %197 }
 0x18a   :  { %v202_v24 = vsub.f32 %v193_v13, %v198_v23 }
 0x18c   :  { %v204_v25 = vmul.f32 1.442695, %v202_v24 }
 0x18d   :  { %v201_v26 = vpop.xlane.xlu0 %200 }
 0x18e   :  { %3956 = vpow2.f32 %v204_v25  ;;  %v203_v27 = vsub.f32 %v194_v14, %v201_v26 }
 0x190   :  { %v206_v28 = vmul.f32 1.442695, %v203_v27 }
 0x192   :  { %3958 = vpow2.f32 %v206_v28 }
 0x19b   :  { %v3957_v29 = vpop.eup %3956 }
 0x19c   :  { %v208_v30 = vsel %vm195_vm2, %v3957_v29, 0.0 }
 0x19d   :  { %209 = vadd.xlane.f32.xlu1 %v208_v30 }
 0x19f   :  { %v3959_v31 = vpop.eup %3958 }
 0x1a0   :  { %v211_v32 = vsel %vm195_vm2, %v3959_v31, 0.0 }
 0x1a1   :  { %212 = vadd.xlane.f32.xlu1 %v211_v32 }
 0x226   :  { %v210_v35 = vpop.xlane.xlu1 %209 }
 0x227   :  { %3960 = vrcp.f32 %v210_v35 }
 0x22a   :  { %v213_v36 = vpop.xlane.xlu1 %212 }
 0x22b   :  { %3962 = vrcp.f32 %v213_v36  ;;  %v505_v36 = vsel %vm223_vm3, %v380_v57, 0 }
 0x234   :  { %v3961_v37 = vpop.eup %3960 }
 0x235   :  { %v216_v38 = vmul.f32 %v3961_v37, %v3957_v29  ;;  %v550_v37 = vsel %vm223_vm3, %v381_v60, 0 }
 0x237   :  { %v218_v39 = vpack.c.bf16 %v216_v38, %v216_v38 }
 0x238   :  { %v3963_v40 = vpop.eup %3962 }
 0x239   :  { %3556 = vmatmul.mubr.msk.bf16.vlgmr.msra.gmra.mxu0 %vm195_vm2, %v218_v39  ;;  %v217_v41 = vmul.f32 %v3963_v40, %v3959_v31 }
 0x23a   :  { %3569 = vmatprep.mubr.msk.bf16.mxu0 %vm4170_vm0, %v4169_v0  ;;  %3566 = vmatpush3.bf16.msra.mxu0 %v3930_v43 }
 0x23b   :  { %v219_v42 = vpack.c.bf16 %v217_v41, %v217_v41  ;;  %3567 = vmatprep.subr.bf16.mxu0 %v4169_v0 }
 0x23d   :  { %3562 = vmatmul.mubr.msk.bf16.vlgmr.msra.gmra.mxu1 %vm195_vm2, %v219_v42 }
 0x23e   :  { %3575 = vmatprep.mubr.msk.bf16.mxu1 %vm4170_vm0, %v4169_v0  ;;  %3568 = vmatpush3.bf16.msra.mxu0 %v3931_v44 }
 0x23f   :  { %3579 = vmatprep.subr.bf16.mxu0 %v4169_v0  ;;  %3574 = vmatpush3.bf16.xpose.msra.mxu1 %v386_v58 }
 0x240   :  { %3585 = vmatprep.subr.bf16.mxu1 %v4169_v0 }
 0x2f9   :  { %v260_v45 = vpop.f32.mrf.mxu0 }
 0x2fa   :  { %v261_v49 = vadd.f32 %v260_v45, %v4261_v5 }
 0x2fb   :  { %v3557_v46 = vpop.f32.mrf.mxu0 }
 0x2fc   :  { %v4350_v46 = vld [vmem:[%s4935_s3 + $0x8] sm:$0xff]  }
 0x2fd   :  { %v263_v47 = vpop.f32.mrf.mxu0  ;;  %v305_v48 = vpop.f32.mrf.mxu1 }
 0x2fe   :  { %v306_v50 = vadd.f32 %v305_v48, %v4263_v6  ;;  %v4357_v47 = vld [vmem:[%s4935_s3] sm:$0xff]   ;;  %v4361_v48 = vld [vmem:[#allocation8 + $0x8] sm:$0xff] }
 0x2ff   :  { %v3558_v51 = vpop.f32.mrf.mxu0  ;;  %v3563_v52 = vpop.f32.mrf.mxu1 }
 0x300   :  { %v315_v53 = vpack.c.bf16 %v306_v50, %v261_v49  ;;  %v500_v49 = vmul.f32 5.656854, %v4306_v56  ;;  %v595_v50 = vrot.slane %v4323_v2, 1  ;;  %v596_v52 = vrot.slane %v4361_v48, 1 }
 0x301   :  { %v308_v54 = vpop.f32.mrf.mxu1 }
 0x302   :  { %3570 = vmatmul.mubr.msk.bf16.vlgmr.msra.gmra.mxu0 %vm100_vm1, %v315_v53  ;;  %v501_v53 = vmul.f32 5.656854, %v4311_v59  ;;  %v597_v57 = vsel %vm594_vm4, %v595_v50, %v596_v52  ;;  %v608_v59 = vsub.s32 3, %v4318_v63 }
 0x303   :  { %v3564_v55 = vpop.f32.mrf.mxu1  ;;  %3581 = vmatprep.mubr.msk.bf16.mxu0 %vm4170_vm0, %v4169_v0  ;;  %3580 = vmatpush3.bf16.xpose.msra.mxu0 %v432_v61 }
 0x304   :  { %3591 = vmatprep.subr.bf16.mxu0 %v4169_v0 }
 0x3c2   :  { %v369_v4 = vpop.f32.mrf.mxu0 }
 0x3c3   :  { %v370_v5 = vadd.f32 %v369_v4, %v319_v3 }
 0x3c4   :  { %v3571_v6 = vpop.f32.mrf.mxu0 }
 0x3c5   :  { %v376_v7 = vmax.f32 %v370_v5, 0.0 }
 0x3c6   :  { %v372_v8 = vpop.f32.mrf.mxu0 }
 0x3c7   :  { %v378_v9 = vpack.c.bf16 %v376_v7, %v376_v7  ;;  %v373_v10 = vadd.f32 %v372_v8, %v319_v3  ;;  %v609_v7 = vrot.slane %v4361_v48, %v608_v59 }
 0x3c8   :  { %v3572_v11 = vpop.f32.mrf.mxu0 }
 0x3c9   :  { %v377_v12 = vmax.f32 %v373_v10, 0.0  ;;  %3576 = vmatmul.mubr.msk.bf16.vlgmr.msra.gmra.mxu1 %vm100_vm1, %v378_v9 }
 0x3ca   :  { %3587 = vmatprep.mubr.msk.bf16.mxu1 %vm4170_vm0, %v4169_v0  ;;  %3586 = vmatpush3.bf16.msra.mxu1 %v505_v36 }
 0x3cb   :  { %v379_v13 = vpack.c.bf16 %v377_v12, %v377_v12  ;;  %3597 = vmatprep.subr.bf16.mxu1 %v4169_v0 }
 0x3cd   :  { %3582 = vmatmul.mubr.msk.bf16.vlgmr.msra.gmra.mxu0 %vm100_vm1, %v379_v13 }
 0x3ce   :  { %3593 = vmatprep.mubr.msk.bf16.mxu0 %vm4170_vm0, %v4169_v0  ;;  %3592 = vmatpush3.bf16.msra.mxu0 %v550_v37 }
 0x3cf   :  { %3605 = vmatprep.subr.bf16.mxu0 %v4169_v0 }
 0x489   :  { %v422_v14 = vpop.f32.mrf.mxu1 }
 0x48a   :  { %v474_v15 = vmul.f32 0.17677669, %v422_v14 }
 0x48b   :  { %v3577_v16 = vpop.f32.mrf.mxu1 }
 0x48c   :  { %v476_v17 = vsel %vm195_vm2, %v474_v15, -inf }
 0x48d   :  { %v468_v18 = vpop.f32.mrf.mxu0  ;;  %477 = vmax.xlane.f32.xlu0 %v476_v17  ;;  %v425_v19 = vpop.f32.mrf.mxu1 }
 0x48e   :  { %v475_v20 = vmul.f32 0.17677669, %v468_v18 }
 0x48f   :  { %v3578_v21 = vpop.f32.mrf.mxu1  ;;  %v3583_v22 = vpop.f32.mrf.mxu0 }
 0x490   :  { %v479_v23 = vsel %vm195_vm2, %v475_v20, -inf }
 0x491   :  { %480 = vmax.xlane.f32.xlu1 %v479_v23  ;;  %v471_v24 = vpop.f32.mrf.mxu0 }
 0x493   :  { %v3584_v25 = vpop.f32.mrf.mxu0 }
 0x516   :  { %v478_v26 = vpop.xlane.xlu0 %477 }
 0x517   :  { %v482_v27 = vsub.f32 %v474_v15, %v478_v26 }
 0x519   :  { %v484_v28 = vmul.f32 1.442695, %v482_v27 }
 0x51a   :  { %v481_v29 = vpop.xlane.xlu1 %480 }
 0x51b   :  { %3964 = vpow2.f32 %v484_v28  ;;  %v483_v30 = vsub.f32 %v475_v20, %v481_v29 }
 0x51d   :  { %v486_v31 = vmul.f32 1.442695, %v483_v30 }
 0x51f   :  { %3966 = vpow2.f32 %v486_v31 }
 0x528   :  { %v3965_v32 = vpop.eup %3964 }
 0x529   :  { %v488_v33 = vsel %vm195_vm2, %v3965_v32, 0.0 }
 0x52a   :  { %489 = vadd.xlane.f32.xlu0 %v488_v33 }
 0x52c   :  { %v3967_v34 = vpop.eup %3966 }
 0x52d   :  { %v491_v35 = vsel %vm195_vm2, %v3967_v34, 0.0 }
 0x52e   :  { %492 = vadd.xlane.f32.xlu1 %v491_v35 }
 0x5b3   :  { %v490_v38 = vpop.xlane.xlu0 %489 }
 0x5b4   :  { %3968 = vrcp.f32 %v490_v38 }
 0x5b7   :  { %v493_v39 = vpop.xlane.xlu1 %492 }
 0x5b8   :  { %3970 = vrcp.f32 %v493_v39 }
 0x5c1   :  { %v3969_v40 = vpop.eup %3968 }
 0x5c2   :  { %v496_v41 = vmul.f32 %v3969_v40, %v3965_v32 }
 0x5c4   :  { %v498_v42 = vpack.c.bf16 %v496_v41, %v496_v41 }
 0x5c5   :  { %v3971_v43 = vpop.eup %3970 }
 0x5c6   :  { %3588 = vmatmul.mubr.msk.bf16.vlgmr.msra.gmra.mxu1 %vm195_vm2, %v498_v42  ;;  %v497_v44 = vmul.f32 %v3971_v43, %v3967_v34 }
 0x5c7   :  { %3601 = vmatprep.mubr.msk.bf16.mxu1 %vm4170_vm0, %v4169_v0  ;;  %3598 = vmatpush3.bf16.msra.mxu1 %v4350_v46 }
 0x5c8   :  { %v499_v45 = vpack.c.bf16 %v497_v44, %v497_v44  ;;  %3599 = vmatprep.subr.bf16.mxu1 %v4169_v0 }
 0x5ca   :  { %3594 = vmatmul.mubr.msk.bf16.vlgmr.msra.gmra.mxu0 %vm195_vm2, %v499_v45 }
 0x5cb   :  { %3607 = vmatprep.mubr.msk.bf16.mxu0 %vm4170_vm0, %v4169_v0  ;;  %3600 = vmatpush3.bf16.msra.mxu1 %v4357_v47 }
 0x5cc   :  { %3611 = vmatprep.subr.bf16.mxu1 %v4169_v0 }
 0x686   :  { %v541_v51 = vpop.f32.mrf.mxu1 }
 0x687   :  { %v542_v55 = vadd.f32 %v541_v51, %v500_v49 }
 0x688   :  { %v3589_v54 = vpop.f32.mrf.mxu1 }
 0x689   :  { %v4367_v4 = vadd.f32 %v597_v57, %v542_v55 }
 0x68a   :  { %v544_v58 = vpop.f32.mrf.mxu1  ;;  %v586_v60 = vpop.f32.mrf.mxu0 }
 0x68b   :  { %v587_v61 = vadd.f32 %v586_v60, %v501_v53 }
 0x68c   :  { %v3590_v62 = vpop.f32.mrf.mxu1  ;;  %v3595_v3 = vpop.f32.mrf.mxu0 }
 0x68d   :  { %v4369_v5 = vadd.f32 %v597_v57, %v587_v61 }
 0x68e   :  { %v589_v56 = vpop.f32.mrf.mxu0 }
 0x68f   :  { %v605_v2 = vpack.c.bf16 %v4369_v5, %v4367_v4 }
 0x690   :  { %v3596_v6 = vpop.f32.mrf.mxu0 }
 0x691   :  { %3602 = vmatmul.mubr.msk.bf16.vlgmr.msra.gmra.mxu1 %vm100_vm1, %v605_v2 }
 0x692   :  { %3613 = vmatprep.mubr.msk.bf16.mxu1 %vm4170_vm0, %v4169_v0 }
 0x751   :  { %v659_v8 = vpop.f32.mrf.mxu1 }
 0x752   :  { %v660_v9 = vadd.f32 %v659_v8, %v609_v7 }
 0x753   :  { %v3603_v10 = vpop.f32.mrf.mxu1 }
 0x754   :  { %v4380_v11 = vpack.c.bf16 %v660_v9, %v660_v9 }
 0x755   :  { %v662_v12 = vpop.f32.mrf.mxu1 }
 0x756   :  { %v663_v13 = vadd.f32 %v662_v12, %v609_v7  ;;  %669 = vrot.lane.b32.xlu0 %v4380_v11, %s4171_s9 }
 0x757   :  { %v3604_v14 = vpop.f32.mrf.mxu1 }
 0x758   :  { %v4384_v15 = vpack.c.bf16 %v663_v13, %v663_v13 }
 0x75a   :  { %718 = vrot.lane.b32.xlu1 %v4384_v15, %s4171_s9 }
 0x7c8   :  { %v670_v16 = vpop.permute.xlu0 %669 }
 0x7c9   :  { %v675_v17 = vsel %vm195_vm2, %v670_v16, 0 }
 0x7ca   :  { %3606 = vmatpush3.bf16.xpose.msra.mxu0 %v675_v17 }
 0x7cb   :  { %3617 = vmatprep.subr.bf16.mxu0 %v4169_v0 }
 0x7cc   :  { %v719_v18 = vpop.permute.xlu1 %718 }
 0x7cd   :  { %v724_v19 = vsel %vm195_vm2, %v719_v18, 0 }
 0x7ce   :  { %3612 = vmatpush3.bf16.xpose.msra.mxu1 %v724_v19 }
 0x7cf   :  { %3623 = vmatprep.subr.bf16.mxu1 %v4169_v0 }
 0x7d1   :  { %3608 = vmatmul.mubr.msk.bf16.vlgmr.msra.gmra.mxu0 %vm195_vm2, %v4380_v11 }
 0x7d2   :  { %3619 = vmatprep.mubr.msk.bf16.mxu0 %vm4170_vm0, %v4169_v0 }
 0x7d5   :  { %3614 = vmatmul.mubr.msk.bf16.vlgmr.msra.gmra.mxu1 %vm195_vm2, %v4384_v15 }
 0x7d6   :  { %3625 = vmatprep.mubr.msk.bf16.mxu1 %vm4170_vm0, %v4169_v0 }
 0x891   :  { %v711_v20 = vpop.f32.mrf.mxu0 }
 0x892   :  { %v766_v21 = vmul.f32 0.35355338, %v711_v20 }
 0x893   :  { %v3609_v22 = vpop.f32.mrf.mxu0 }
 0x894   :  { %v768_v23 = vsel %vm195_vm2, %v766_v21, -inf }
 0x895   :  { %v714_v24 = vpop.f32.mrf.mxu0  ;;  %769 = vmax.xlane.f32.xlu1 %v768_v23  ;;  %v760_v25 = vpop.f32.mrf.mxu1 }
 0x896   :  { %v767_v26 = vmul.f32 0.35355338, %v760_v25 }
 0x897   :  { %v3610_v27 = vpop.f32.mrf.mxu0  ;;  %v3615_v28 = vpop.f32.mrf.mxu1 }
 0x898   :  { %v771_v29 = vsel %vm195_vm2, %v767_v26, -inf }
 0x899   :  { %772 = vmax.xlane.f32.xlu0 %v771_v29  ;;  %v763_v30 = vpop.f32.mrf.mxu1 }
 0x89b   :  { %v3616_v31 = vpop.f32.mrf.mxu1 }
 0x8a6   :  { %840 = vrot.lane.b32.xlu1 %v4384_v15, %s4172_s10 }
 0x8aa   :  { %890 = vrot.lane.b32.xlu1 %v4380_v11, %s4173_s12 }
 0x91e   :  { %v770_v32 = vpop.xlane.xlu1 %769 }
 0x91f   :  { %v774_v33 = vsub.f32 %v766_v21, %v770_v32 }
 0x921   :  { %v776_v34 = vmul.f32 1.442695, %v774_v33 }
 0x922   :  { %v841_v35 = vpop.permute.xlu1 %840  ;;  %v773_v36 = vpop.xlane.xlu0 %772 }
 0x923   :  { %3972 = vpow2.f32 %v776_v34  ;;  %v846_v37 = vsel %vm223_vm3, %v841_v35, 0  ;;  %v775_v38 = vsub.f32 %v767_v26, %v773_v36 }
 0x924   :  { %3624 = vmatpush3.bf16.msra.mxu1 %v846_v37 }
 0x925   :  { %v778_v39 = vmul.f32 1.442695, %v775_v38  ;;  %3635 = vmatprep.subr.bf16.mxu1 %v4169_v0 }
 0x926   :  { %v891_v44 = vpop.permute.xlu1 %890 }
 0x927   :  { %3974 = vpow2.f32 %v778_v39  ;;  %v896_v57 = vsel %vm195_vm2, %v891_v44, 0 }
 0x930   :  { %v3973_v40 = vpop.eup %3972 }
 0x931   :  { %v780_v41 = vsel %vm195_vm2, %v3973_v40, 0.0 }
 0x932   :  { %781 = vadd.xlane.f32.xlu0 %v780_v41 }
 0x934   :  { %v3975_v42 = vpop.eup %3974 }
 0x935   :  { %v783_v43 = vsel %vm195_vm2, %v3975_v42, 0.0 }
 0x936   :  { %784 = vadd.xlane.f32.xlu1 %v783_v43 }
 0x947   :  { %940 = vrot.lane.b32.xlu1 %v4384_v15, %s4173_s12 }
 0x948   :  { %792 = vrot.lane.b32.xlu0 %v4380_v11, %s4172_s10 }
 0x94b   :  { %938 = vrot.lane.b32.xlu1 %v4384_v15, %s4174_s13 }
 0x94c   :  { %888 = vrot.lane.b32.xlu0 %v4380_v11, %s4174_s13 }
 0x9bb   :  { %v782_v45 = vpop.xlane.xlu0 %781 }
 0x9bc   :  { %3976 = vrcp.f32 %v782_v45 }
 0x9bf   :  { %v785_v49 = vpop.xlane.xlu1 %784  ;;  %v793_v50 = vpop.permute.xlu0 %792 }
 0x9c0   :  { %3978 = vrcp.f32 %v785_v49  ;;  %v798_v51 = vsel %vm223_vm3, %v793_v50, 0 }
 0x9c1   :  { %3618 = vmatpush3.bf16.msra.mxu0 %v798_v51 }
 0x9c2   :  { %3629 = vmatprep.subr.bf16.mxu0 %v4169_v0 }
 0x9c3   :  { %v941_v60 = vpop.permute.xlu1 %940  ;;  %v889_v3 = vpop.permute.xlu0 %888 }
 0x9c4   :  { %v946_v62 = vsel %vm195_vm2, %v941_v60, 0 }
 0x9c7   :  { %v939_v56 = vpop.permute.xlu1 %938 }
 0x9c9   :  { %v3977_v52 = vpop.eup %3976 }
 0x9ca   :  { %v788_v53 = vmul.f32 %v3977_v52, %v3973_v40 }
 0x9cc   :  { %v790_v54 = vpack.c.bf16 %v788_v53, %v788_v53 }
 0x9cd   :  { %v3979_v55 = vpop.eup %3978 }
 0x9ce   :  { %3620 = vmatmul.mubr.msk.bf16.vlgmr.msra.gmra.mxu0 %vm195_vm2, %v790_v54  ;;  %v789_v58 = vmul.f32 %v3979_v55, %v3975_v42 }
 0x9cf   :  { %3630 = vmatpush3.bf16.xpose.msra.mxu0 %v896_v57  ;;  %3631 = vmatprep.mubr.msk.bf16.mxu0 %vm4170_vm0, %v4169_v0 }
 0x9d0   :  { %v791_v61 = vpack.c.bf16 %v789_v58, %v789_v58  ;;  %3641 = vmatprep.subr.bf16.mxu0 %v4169_v0 }
 0x9d2   :  { %3626 = vmatmul.mubr.msk.bf16.vlgmr.msra.gmra.mxu1 %vm195_vm2, %v791_v61 }
 0x9d3   :  { %3636 = vmatpush3.bf16.xpose.msra.mxu1 %v946_v62  ;;  %3637 = vmatprep.mubr.msk.bf16.mxu1 %vm4170_vm0, %v4169_v0 }
 0x9d4   :  { %3647 = vmatprep.subr.bf16.mxu1 %v4169_v0 }
 0x9d6   :  { %3632 = vmatmul.mubr.msk.bf16.vlgmr.msra.gmra.mxu0 %vm195_vm2, %v889_v3 }
 0x9d7   :  { %3643 = vmatprep.mubr.msk.bf16.mxu0 %vm4170_vm0, %v4169_v0 }
 0x9da   :  { %3638 = vmatmul.mubr.msk.bf16.vlgmr.msra.gmra.mxu1 %vm195_vm2, %v939_v56 }
 0x9db   :  { %3649 = vmatprep.mubr.msk.bf16.mxu1 %vm4170_vm0, %v4169_v0 }
 0xa8e   :  { %v4436_v2 = vpop.f32.mrf.mxu0 }
 0xa90   :  { %v3621_v6 = vpop.f32.mrf.mxu0 }
 0xa92   :  { %v837_v7 = vpop.f32.mrf.mxu0  ;;  %v4438_v8 = vpop.f32.mrf.mxu1 }
 0xa94   :  { %v3622_v9 = vpop.f32.mrf.mxu0  ;;  %v3627_v10 = vpop.f32.mrf.mxu1 }
 0xa96   :  { %v885_v12 = vpop.f32.mrf.mxu1  ;;  %v932_v13 = vpop.f32.mrf.mxu0 }
 0xa97   :  { %v988_v14 = vmul.f32 0.35355338, %v932_v13 }
 0xa98   :  { %v3628_v16 = vpop.f32.mrf.mxu1  ;;  %v3633_v17 = vpop.f32.mrf.mxu0 }
 0xa99   :  { %v990_v18 = vsel %vm195_vm2, %v988_v14, -inf }
 0xa9a   :  { %991 = vmax.xlane.f32.xlu0 %v990_v18  ;;  %v935_v19 = vpop.f32.mrf.mxu0  ;;  %v982_v20 = vpop.f32.mrf.mxu1 }
 0xa9b   :  { %v989_v21 = vmul.f32 0.35355338, %v982_v20 }
 0xa9c   :  { %v3634_v22 = vpop.f32.mrf.mxu0  ;;  %v3639_v23 = vpop.f32.mrf.mxu1 }
 0xa9d   :  { %v993_v24 = vsel %vm195_vm2, %v989_v21, -inf }
 0xa9e   :  { %994 = vmax.xlane.f32.xlu1 %v993_v24  ;;  %v985_v25 = vpop.f32.mrf.mxu1 }
 0xaa0   :  { %v3640_v26 = vpop.f32.mrf.mxu1 }
 0xaaf   :  { %1062 = vrot.lane.b32.xlu1 %v4384_v15, %s4175_s14 }
 0xab3   :  { %1112 = vrot.lane.b32.xlu1 %v4380_v11, %s4176_s15 }
 0xab7   :  { %1162 = vrot.lane.b32.xlu1 %v4384_v15, %s4176_s15 }
 0xabb   :  { %1160 = vrot.lane.b32.xlu1 %v4384_v15, %s4177_s16 }
 0xb23   :  { %v992_v27 = vpop.xlane.xlu0 %991 }
 0xb24   :  { %v996_v28 = vsub.f32 %v988_v14, %v992_v27 }
 0xb26   :  { %v998_v29 = vmul.f32 1.442695, %v996_v28 }
 0xb27   :  { %v995_v30 = vpop.xlane.xlu1 %994 }
 0xb28   :  { %3980 = vpow2.f32 %v998_v29  ;;  %v997_v31 = vsub.f32 %v989_v21, %v995_v30 }
 0xb2a   :  { %v1000_v32 = vmul.f32 1.442695, %v997_v31 }
 0xb2b   :  { %v1063_v33 = vpop.permute.xlu1 %1062 }
 0xb2c   :  { %3982 = vpow2.f32 %v1000_v32  ;;  %v1068_v34 = vsel %vm223_vm3, %v1063_v33, 0 }
 0xb2d   :  { %3648 = vmatpush3.bf16.msra.mxu1 %v1068_v34 }
 0xb2e   :  { %3659 = vmatprep.subr.bf16.mxu1 %v4169_v0 }
 0xb2f   :  { %v1113_v44 = vpop.permute.xlu1 %1112 }
 0xb30   :  { %v1118_v51 = vsel %vm195_vm2, %v1113_v44, 0 }
 0xb33   :  { %v1163_v53 = vpop.permute.xlu1 %1162 }
 0xb34   :  { %v1168_v55 = vsel %vm195_vm2, %v1163_v53, 0 }
 0xb35   :  { %v3981_v35 = vpop.eup %3980 }
 0xb36   :  { %v1002_v36 = vsel %vm195_vm2, %v3981_v35, 0.0 }
 0xb37   :  { %1003 = vadd.xlane.f32.xlu0 %v1002_v36  ;;  %v1161_v58 = vpop.permute.xlu1 %1160 }
 0xb39   :  { %v3983_v37 = vpop.eup %3982 }
 0xb3a   :  { %v1005_v38 = vsel %vm195_vm2, %v3983_v37, 0.0 }
 0xb3b   :  { %1006 = vadd.xlane.f32.xlu0 %v1005_v38 }
 0xb51   :  { %1014 = vrot.lane.b32.xlu0 %v4380_v11, %s4175_s14 }
 0xb55   :  { %1110 = vrot.lane.b32.xlu0 %v4380_v11, %s4177_s16 }
 0xbc0   :  { %v1004_v39 = vpop.xlane.xlu0 %1003 }
 0xbc1   :  { %3984 = vrcp.f32 %v1004_v39 }
 0xbc4   :  { %v1007_v40 = vpop.xlane.xlu0 %1006 }
 0xbc5   :  { %3986 = vrcp.f32 %v1007_v40 }
 0xbc8   :  { %v1015_v41 = vpop.permute.xlu0 %1014 }
 0xbc9   :  { %v1020_v42 = vsel %vm223_vm3, %v1015_v41, 0 }
 0xbca   :  { %3642 = vmatpush3.bf16.msra.mxu0 %v1020_v42 }
 0xbcb   :  { %3653 = vmatprep.subr.bf16.mxu0 %v4169_v0 }
 0xbcc   :  { %v1111_v57 = vpop.permute.xlu0 %1110 }
 0xbce   :  { %v3985_v43 = vpop.eup %3984 }
 0xbcf   :  { %v1010_v45 = vmul.f32 %v3985_v43, %v3981_v35 }
 0xbd1   :  { %v1012_v49 = vpack.c.bf16 %v1010_v45, %v1010_v45 }
 0xbd2   :  { %v3987_v50 = vpop.eup %3986 }
 0xbd3   :  { %3644 = vmatmul.mubr.msk.bf16.vlgmr.msra.gmra.mxu0 %vm195_vm2, %v1012_v49  ;;  %v1011_v52 = vmul.f32 %v3987_v50, %v3983_v37 }
 0xbd4   :  { %3654 = vmatpush3.bf16.xpose.msra.mxu0 %v1118_v51  ;;  %3655 = vmatprep.mubr.msk.bf16.mxu0 %vm4170_vm0, %v4169_v0 }
 0xbd5   :  { %v1013_v54 = vpack.c.bf16 %v1011_v52, %v1011_v52  ;;  %3665 = vmatprep.subr.bf16.mxu0 %v4169_v0 }
 0xbd7   :  { %3650 = vmatmul.mubr.msk.bf16.vlgmr.msra.gmra.mxu1 %vm195_vm2, %v1013_v54 }
 0xbd8   :  { %3660 = vmatpush3.bf16.xpose.msra.mxu1 %v1168_v55  ;;  %3661 = vmatprep.mubr.msk.bf16.mxu1 %vm4170_vm0, %v4169_v0 }
 0xbd9   :  { %3671 = vmatprep.subr.bf16.mxu1 %v4169_v0 }
 0xbdb   :  { %3656 = vmatmul.mubr.msk.bf16.vlgmr.msra.gmra.mxu0 %vm195_vm2, %v1111_v57 }
 0xbdc   :  { %3667 = vmatprep.mubr.msk.bf16.mxu0 %vm4170_vm0, %v4169_v0 }
 0xbdf   :  { %3662 = vmatmul.mubr.msk.bf16.vlgmr.msra.gmra.mxu1 %vm195_vm2, %v1161_v58 }
 0xbe0   :  { %3673 = vmatprep.mubr.msk.bf16.mxu1 %vm4170_vm0, %v4169_v0 }
 0xc93   :  { %v4476_v60 = vpop.f32.mrf.mxu0 }
 0xc95   :  { %v3645_v61 = vpop.f32.mrf.mxu0 }
 0xc97   :  { %v1059_v62 = vpop.f32.mrf.mxu0  ;;  %v4478_v3 = vpop.f32.mrf.mxu1 }
 0xc98   :  { %v3900_v56 = vpack.i.bf16 %v4478_v3, %v4476_v60 }
 0xc99   :  { %v3646_v6 = vpop.f32.mrf.mxu0  ;;  %v3651_v7 = vpop.f32.mrf.mxu1 }
 0xc9b   :  { %v1107_v9 = vpop.f32.mrf.mxu1  ;;  %v1154_v10 = vpop.f32.mrf.mxu0 }
 0xc9c   :  { %v1210_v12 = vmul.f32 0.35355338, %v1154_v10 }
 0xc9d   :  { %v3652_v13 = vpop.f32.mrf.mxu1  ;;  %v3657_v14 = vpop.f32.mrf.mxu0 }
 0xc9e   :  { %v1212_v16 = vsel %vm195_vm2, %v1210_v12, -inf }
 0xc9f   :  { %1213 = vmax.xlane.f32.xlu0 %v1212_v16  ;;  %v1157_v17 = vpop.f32.mrf.mxu0  ;;  %v1204_v18 = vpop.f32.mrf.mxu1 }
 0xca0   :  { %v1211_v19 = vmul.f32 0.35355338, %v1204_v18 }
 0xca1   :  { %v3658_v20 = vpop.f32.mrf.mxu0  ;;  %v3663_v21 = vpop.f32.mrf.mxu1 }
 0xca2   :  { %v1215_v22 = vsel %vm195_vm2, %v1211_v19, -inf }
 0xca3   :  { %1216 = vmax.xlane.f32.xlu1 %v1215_v22  ;;  %v1207_v23 = vpop.f32.mrf.mxu1 }
 0xca5   :  { %v3664_v24 = vpop.f32.mrf.mxu1 }
 0xcb4   :  { %1284 = vrot.lane.b32.xlu1 %v4384_v15, %s4178_s17 }
 0xcb8   :  { %1334 = vrot.lane.b32.xlu1 %v4380_v11, %s4179_s18 }
 0xcbc   :  { %1384 = vrot.lane.b32.xlu1 %v4384_v15, %s4179_s18 }
 0xcc0   :  { %1382 = vrot.lane.b32.xlu1 %v4384_v15, %s4180_s19 }
 0xd28   :  { %v1214_v25 = vpop.xlane.xlu0 %1213 }
 0xd29   :  { %v1218_v26 = vsub.f32 %v1210_v12, %v1214_v25 }
 0xd2b   :  { %v1220_v27 = vmul.f32 1.442695, %v1218_v26 }
 0xd2c   :  { %v1217_v28 = vpop.xlane.xlu1 %1216 }
 0xd2d   :  { %3988 = vpow2.f32 %v1220_v27  ;;  %v1219_v29 = vsub.f32 %v1211_v19, %v1217_v28 }
 0xd2f   :  { %v1222_v30 = vmul.f32 1.442695, %v1219_v29 }
 0xd30   :  { %v1285_v31 = vpop.permute.xlu1 %1284 }
 0xd31   :  { %3990 = vpow2.f32 %v1222_v30  ;;  %v1290_v32 = vsel %vm223_vm3, %v1285_v31, 0 }
 0xd32   :  { %3672 = vmatpush3.bf16.msra.mxu1 %v1290_v32 }
 0xd33   :  { %3683 = vmatprep.subr.bf16.mxu1 %v4169_v0 }
 0xd34   :  { %v1335_v42 = vpop.permute.xlu1 %1334 }
 0xd35   :  { %v1340_v49 = vsel %vm195_vm2, %v1335_v42, 0 }
 0xd38   :  { %v1385_v51 = vpop.permute.xlu1 %1384 }
 0xd39   :  { %v1390_v53 = vsel %vm195_vm2, %v1385_v51, 0 }
 0xd3a   :  { %v3989_v33 = vpop.eup %3988 }
 0xd3b   :  { %v1224_v34 = vsel %vm195_vm2, %v3989_v33, 0.0 }
 0xd3c   :  { %1225 = vadd.xlane.f32.xlu0 %v1224_v34  ;;  %v1383_v55 = vpop.permute.xlu1 %1382 }
 0xd3e   :  { %v3991_v35 = vpop.eup %3990 }
 0xd3f   :  { %v1227_v36 = vsel %vm195_vm2, %v3991_v35, 0.0 }
 0xd40   :  { %1228 = vadd.xlane.f32.xlu0 %v1227_v36 }
 0xd56   :  { %1236 = vrot.lane.b32.xlu0 %v4380_v11, %s4178_s17 }
 0xd5a   :  { %1332 = vrot.lane.b32.xlu0 %v4380_v11, %s4180_s19 }
 0xdc5   :  { %v1226_v37 = vpop.xlane.xlu0 %1225 }
 0xdc6   :  { %3992 = vrcp.f32 %v1226_v37 }
 0xdc9   :  { %v1229_v38 = vpop.xlane.xlu0 %1228 }
 0xdca   :  { %3994 = vrcp.f32 %v1229_v38 }
 0xdcd   :  { %v1237_v39 = vpop.permute.xlu0 %1236 }
 0xdce   :  { %v1242_v40 = vsel %vm223_vm3, %v1237_v39, 0 }
 0xdcf   :  { %3666 = vmatpush3.bf16.msra.mxu0 %v1242_v40 }
 0xdd0   :  { %3677 = vmatprep.subr.bf16.mxu0 %v4169_v0 }
 0xdd1   :  { %v1333_v54 = vpop.permute.xlu0 %1332 }
 0xdd3   :  { %v3993_v41 = vpop.eup %3992 }
 0xdd4   :  { %v1232_v43 = vmul.f32 %v3993_v41, %v3989_v33 }
 0xdd6   :  { %v1234_v44 = vpack.c.bf16 %v1232_v43, %v1232_v43 }
 0xdd7   :  { %v3995_v45 = vpop.eup %3994 }
 0xdd8   :  { %3668 = vmatmul.mubr.msk.bf16.vlgmr.msra.gmra.mxu0 %vm195_vm2, %v1234_v44  ;;  %v1233_v50 = vmul.f32 %v3995_v45, %v3991_v35 }
 0xdd9   :  { %3678 = vmatpush3.bf16.xpose.msra.mxu0 %v1340_v49  ;;  %3679 = vmatprep.mubr.msk.bf16.mxu0 %vm4170_vm0, %v4169_v0 }
 0xdda   :  { %v1235_v52 = vpack.c.bf16 %v1233_v50, %v1233_v50  ;;  %3689 = vmatprep.subr.bf16.mxu0 %v4169_v0 }
 0xddc   :  { %3674 = vmatmul.mubr.msk.bf16.vlgmr.msra.gmra.mxu1 %vm195_vm2, %v1235_v52 }
 0xddd   :  { %3684 = vmatpush3.bf16.xpose.msra.mxu1 %v1390_v53  ;;  %3685 = vmatprep.mubr.msk.bf16.mxu1 %vm4170_vm0, %v4169_v0 }
 0xdde   :  { %3695 = vmatprep.subr.bf16.mxu1 %v4169_v0 }
 0xde0   :  { %3680 = vmatmul.mubr.msk.bf16.vlgmr.msra.gmra.mxu0 %vm195_vm2, %v1333_v54 }
 0xde1   :  { %3691 = vmatprep.mubr.msk.bf16.mxu0 %vm4170_vm0, %v4169_v0 }
 0xde4   :  { %3686 = vmatmul.mubr.msk.bf16.vlgmr.msra.gmra.mxu1 %vm195_vm2, %v1383_v55 }
 0xde5   :  { %3697 = vmatprep.mubr.msk.bf16.mxu1 %vm4170_vm0, %v4169_v0 }
 0xe98   :  { %v1278_v57 = vpop.f32.mrf.mxu0 }
 0xe9a   :  { %v3669_v58 = vpop.f32.mrf.mxu0 }
 0xe9c   :  { %v1281_v61 = vpop.f32.mrf.mxu0  ;;  %v1326_v62 = vpop.f32.mrf.mxu1 }
 0xe9d   :  { %v3905_v6 = vpack.i.bf16 %v1326_v62, %v1278_v57 }
 0xe9e   :  { %v3670_v7 = vpop.f32.mrf.mxu0  ;;  %v3675_v9 = vpop.f32.mrf.mxu1 }
 0xea0   :  { %v1329_v10 = vpop.f32.mrf.mxu1  ;;  %v1376_v12 = vpop.f32.mrf.mxu0 }
 0xea1   :  { %v1432_v13 = vmul.f32 0.35355338, %v1376_v12 }
 0xea2   :  { %v3676_v14 = vpop.f32.mrf.mxu1  ;;  %v3681_v16 = vpop.f32.mrf.mxu0 }
 0xea3   :  { %v1434_v17 = vsel %vm195_vm2, %v1432_v13, -inf }
 0xea4   :  { %1435 = vmax.xlane.f32.xlu0 %v1434_v17  ;;  %v1379_v18 = vpop.f32.mrf.mxu0  ;;  %v1426_v19 = vpop.f32.mrf.mxu1 }
 0xea5   :  { %v1433_v20 = vmul.f32 0.35355338, %v1426_v19 }
 0xea6   :  { %v3682_v21 = vpop.f32.mrf.mxu0  ;;  %v3687_v22 = vpop.f32.mrf.mxu1 }
 0xea7   :  { %v1437_v23 = vsel %vm195_vm2, %v1433_v20, -inf }
 0xea8   :  { %1438 = vmax.xlane.f32.xlu1 %v1437_v23  ;;  %v1429_v24 = vpop.f32.mrf.mxu1 }
 0xeaa   :  { %v3688_v25 = vpop.f32.mrf.mxu1 }
 0xeb9   :  { %1506 = vrot.lane.b32.xlu1 %v4384_v15, %s4181_s20 }
 0xebd   :  { %1593 = vrot.lane.b32.xlu1 %v4350_v46, %s4182_s1 }
 0xec1   :  { %3901 = vrot.lane.b32.xlu1 %v3900_v56, %s4166_s11 }
 0xf2d   :  { %v1436_v26 = vpop.xlane.xlu0 %1435 }
 0xf2e   :  { %v1440_v27 = vsub.f32 %v1432_v13, %v1436_v26 }
 0xf30   :  { %v1442_v28 = vmul.f32 1.442695, %v1440_v27 }
 0xf31   :  { %v1439_v29 = vpop.xlane.xlu1 %1438 }
 0xf32   :  { %3996 = vpow2.f32 %v1442_v28  ;;  %v1441_v30 = vsub.f32 %v1433_v20, %v1439_v29 }
 0xf34   :  { %v1444_v31 = vmul.f32 1.442695, %v1441_v30 }
 0xf35   :  { %v1507_v32 = vpop.permute.xlu1 %1506 }
 0xf36   :  { %3998 = vpow2.f32 %v1444_v31  ;;  %v1512_v15 = vsel %vm223_vm3, %v1507_v32, 0 }
 0xf37   :  { %3696 = vmatpush3.bf16.msra.mxu1 %v1512_v15 }
 0xf38   :  { %3709 = vmatprep.subr.bf16.mxu1 %v4169_v0 }
 0xf39   :  { %v1594_v40 = vpop.permute.xlu1 %1593 }
 0xf3d   :  { %v3902_v57 = vpop.permute.xlu1 %3901 }
 0xf3e   :  { %v3904_v58 = vunpack.i.h.bf16 %v3902_v57  ;;  %v3903_v61 = vunpack.i.l.bf16 %v3902_v57 }
 0xf3f   :  { %v3997_v46 = vpop.eup %3996 }
 0xf40   :  { %v1446_v33 = vsel %vm195_vm2, %v3997_v46, 0.0  ;;  %v1579_v9 = vsel %vm195_vm2, %v4438_v8, %v3904_v58  ;;  %v1578_v10 = vsel %vm195_vm2, %v4436_v2, %v3903_v61  ;;  %v1589_v8 = vsub.s32 5, %v4318_v63  ;;  %v3938_v58 = vld [vmem:[%s4937_s5 + $0x8] sm:$0xff]   ;;  %v3939_v61 = vld [vmem:[%s4937_s5] sm:$0xff]  }
 0xf41   :  { %1447 = vadd.xlane.f32.xlu0 %v1446_v33 }
 0xf42   :  { %v1590_v2 = vrot.slane %v4361_v48, %v1589_v8 }
 0xf43   :  { %v3999_v60 = vpop.eup %3998 }
 0xf44   :  { %v1449_v3 = vsel %vm195_vm2, %v3999_v60, 0.0 }
 0xf45   :  { %1450 = vadd.xlane.f32.xlu0 %v1449_v3 }
 0xf5b   :  { %1458 = vrot.lane.b32.xlu0 %v4380_v11, %s4181_s20 }
 0xf5f   :  { %3906 = vrot.lane.b32.xlu0 %v3905_v6, %s4183_s21 }
 0xf63   :  { %1591 = vrot.lane.b32.xlu0 %v4357_v47, %s4182_s1 }
 0xfca   :  { %v1448_v56 = vpop.xlane.xlu0 %1447 }
 0xfcb   :  { %4000 = vrcp.f32 %v1448_v56 }
 0xfce   :  { %v1451_v34 = vpop.xlane.xlu0 %1450 }
 0xfcf   :  { %4002 = vrcp.f32 %v1451_v34  ;;  %v3935_v34 = vld [vmem:[%s4936_s4] sm:$0xff]  }
 0xfd2   :  { %v1459_v35 = vpop.permute.xlu0 %1458 }
 0xfd3   :  { %v1464_v36 = vsel %vm223_vm3, %v1459_v35, 0  ;;  %v3936_v35 = vld [vmem:[%s4937_s5 + $0x18] sm:$0xff]  }
 0xfd4   :  { %3690 = vmatpush3.bf16.msra.mxu0 %v1464_v36 }
 0xfd5   :  { %3701 = vmatprep.subr.bf16.mxu0 %v4169_v0 }
 0xfd6   :  { %v3907_v42 = vpop.permute.xlu0 %3906 }
 0xfd7   :  { %v3909_v62 = vunpack.i.h.bf16 %v3907_v42  ;;  %v3908_v6 = vunpack.i.l.bf16 %v3907_v42 }
 0xfd8   :  { %v4001_v37 = vpop.eup %4000 }
 0xfd9   :  { %v1454_v38 = vmul.f32 %v4001_v37, %v3997_v46  ;;  %v1581_v14 = vsel %vm1580_vm5, %v1578_v10, %v3908_v6  ;;  %v1582_v16 = vsel %vm1580_vm5, %v1579_v9, %v3909_v62 }
 0xfda   :  { %v1592_v43 = vpop.permute.xlu0 %1591 }
 0xfdb   :  { %v1456_v39 = vpack.c.bf16 %v1454_v38, %v1454_v38 }
 0xfdc   :  { %v4003_v11 = vpop.eup %4002 }
 0xfdd   :  { %3692 = vmatmul.mubr.msk.bf16.vlgmr.msra.gmra.mxu0 %vm195_vm2, %v1456_v39  ;;  %v1455_v41 = vmul.f32 %v4003_v11, %v3999_v60 }
 0xfde   :  { %3702 = vmatpush3.bf16.msra.mxu0 %v1594_v40  ;;  %3705 = vmatprep.mubr.msk.bf16.mxu0 %vm4170_vm0, %v4169_v0 }
 0xfdf   :  { %v1457_v47 = vpack.c.bf16 %v1455_v41, %v1455_v41  ;;  %3703 = vmatprep.subr.bf16.mxu0 %v4169_v0  ;;  %v1672_v41 = vsub.s32 7, %v4318_v63 }
 0xfe1   :  { %3698 = vmatmul.mubr.msk.bf16.vlgmr.msra.gmra.mxu1 %vm195_vm2, %v1457_v47 }
 0xfe2   :  { %3713 = vmatprep.mubr.msk.bf16.mxu1 %vm4170_vm0, %v4169_v0  ;;  %3704 = vmatpush3.bf16.msra.mxu0 %v1592_v43  ;;  %v1673_v43 = vrot.slane %v4361_v48, %v1672_v41  ;;  %v3937_v48 = vld [vmem:[%s4937_s5 + $0x10] sm:$0xff]  }
 0xfe3   :  { %3717 = vmatprep.subr.bf16.mxu0 %v4169_v0 }
0x109d   :  { %v1500_v44 = vpop.f32.mrf.mxu0 }
0x109f   :  { %v3693_v45 = vpop.f32.mrf.mxu0 }
0x10a0   :  { %v4588_v45 = vld [vmem:[#allocation8 + $0x10] sm:$0xff] }
0x10a1   :  { %v1503_v49 = vpop.f32.mrf.mxu0  ;;  %v1548_v50 = vpop.f32.mrf.mxu1  ;;  %v1690_v62 = vrot.slane %v4588_v45, %v608_v59 }
0x10a2   :  { %v3910_v51 = vpack.i.bf16 %v1548_v50, %v1500_v44  ;;  %v4586_v44 = vsub.s32 1, %v4318_v63 }
0x10a3   :  { %v3694_v52 = vpop.f32.mrf.mxu0  ;;  %v3699_v53 = vpop.f32.mrf.mxu1 }
0x10a4   :  { %3911 = vrot.lane.b32.xlu1 %v3910_v51, %s4184_s22  ;;  %v1679_v52 = vrot.slane %v4588_v45, %v4586_v44 }
0x10a5   :  { %v1551_v54 = vpop.f32.mrf.mxu1 }
0x10a7   :  { %v3700_v55 = vpop.f32.mrf.mxu1 }
0x1116   :  { %v3912_v7 = vpop.permute.xlu1 %3911 }
0x1117   :  { %v3914_v12 = vunpack.i.h.bf16 %v3912_v7  ;;  %v3913_v13 = vunpack.i.l.bf16 %v3912_v7 }
0x1119   :  { %v1585_v17 = vsel %vm1583_vm6, %v1582_v16, %v3914_v12  ;;  %v1584_v18 = vsel %vm1583_vm6, %v1581_v14, %v3913_v13 }
0x111a   :  { %v1586_v19 = vpack.c.bf16 %v1585_v17, %v1584_v18  ;;  %v1761_v18 = vrot.slane %v4588_v45, %v1589_v8 }
0x111c   :  { %3706 = vmatmul.mubr.msk.bf16.vlgmr.msra.gmra.mxu0 %vm100_vm1, %v1586_v19 }
0x111d   :  { %3725 = vmatprep.mubr.msk.bf16.mxu0 %vm4170_vm0, %v4169_v0  ;;  %3718 = vmatpush3.bf16.msra.mxu0 %v3936_v35 }
0x111e   :  { %3719 = vmatprep.subr.bf16.mxu0 %v4169_v0 }
0x1121   :  { %3720 = vmatpush3.bf16.msra.mxu0 %v3937_v48 }
0x1122   :  { %3721 = vmatprep.subr.bf16.mxu0 %v4169_v0 }
0x1125   :  { %3722 = vmatpush3.bf16.msra.mxu0 %v3938_v58 }
0x1126   :  { %3723 = vmatprep.subr.bf16.mxu0 %v4169_v0 }
0x1129   :  { %3724 = vmatpush3.bf16.msra.mxu0 %v3939_v61 }
0x112a   :  { %3743 = vmatprep.subr.bf16.mxu0 %v4169_v0 }
0x11dc   :  { %v1634_v20 = vpop.f32.mrf.mxu0 }
0x11dd   :  { %v1635_v21 = vadd.f32 %v1634_v20, %v1590_v2 }
0x11de   :  { %v3707_v22 = vpop.f32.mrf.mxu0 }
0x11df   :  { %v1641_v23 = vadd.f32 %v1635_v21, %v4367_v4 }
0x11e0   :  { %v1637_v24 = vpop.f32.mrf.mxu0 }
0x11e1   :  { %v1638_v25 = vadd.f32 %v1637_v24, %v1590_v2  ;;  %v1643_v26 = vsel %vm100_vm1, %v1641_v23, 0.0 }
0x11e2   :  { %1644 = vadd.xlane.f32.xlu1 %v1643_v26  ;;  %v3708_v27 = vpop.f32.mrf.mxu0 }
0x11e3   :  { %v1642_v28 = vadd.f32 %v1638_v25, %v4369_v5  ;;  %v3934_v5 = vld [vmem:[%s4936_s4 + $0x8] sm:$0xff]  }
0x11e4   :  { %3710 = vmatpush3.bf16.msra.mxu1 %v3934_v5 }
0x11e5   :  { %v1646_v29 = vsel %vm100_vm1, %v1642_v28, 0.0  ;;  %3711 = vmatprep.subr.bf16.mxu1 %v4169_v0 }
0x11e6   :  { %1647 = vadd.xlane.f32.xlu0 %v1646_v29 }
0x11e8   :  { %3712 = vmatpush3.bf16.msra.mxu1 %v3935_v34 }
0x11e9   :  { %3729 = vmatprep.subr.bf16.mxu1 %v4169_v0 }
0x126b   :  { %v1645_v30 = vpop.xlane.xlu1 %1644 }
0x126c   :  { %v1650_v31 = vmul.f32 0.03125, %v1645_v30 }
0x126e   :  { %v1652_v32 = vsub.f32 %v1641_v23, %v1650_v31 }
0x126f   :  { %v1648_v15 = vpop.xlane.xlu0 %1647 }
0x1270   :  { %v1651_v46 = vmul.f32 0.03125, %v1648_v15  ;;  %v1654_v33 = vmul.f32 %v1652_v32, %v1652_v32 }
0x1272   :  { %v1653_v60 = vsub.f32 %v1642_v28, %v1651_v46  ;;  %v1656_v4 = vsel %vm100_vm1, %v1654_v33, 0.0 }
0x1273   :  { %1657 = vadd.xlane.f32.xlu0 %v1656_v4  ;;  %v4629_v4 = vld [vmem:[%s4935_s3 + $0x10] sm:$0xff]  }
0x1274   :  { %v1655_v3 = vmul.f32 %v1653_v60, %v1653_v60 }
0x1276   :  { %v1659_v56 = vsel %vm100_vm1, %v1655_v3, 0.0 }
0x1277   :  { %1660 = vadd.xlane.f32.xlu0 %v1659_v56 }
0x12fc   :  { %v1658_v36 = vpop.xlane.xlu0 %1657 }
0x12fd   :  { %v1662_v37 = vmul.f32 0.03125, %v1658_v36 }
0x12ff   :  { %v1664_v38 = vadd.f32 1e-05, %v1662_v37 }
0x1300   :  { %v1661_v39 = vpop.xlane.xlu0 %1660 }
0x1301   :  { %4004 = vrsqrt.f32 %v1664_v38  ;;  %v1663_v11 = vmul.f32 0.03125, %v1661_v39  ;;  %v1862_v39 = vrot.slane %v4588_v45, %v1672_v41  ;;  %v1879_v41 = vsub.s32 4, %v4318_v63 }
0x1303   :  { %v1665_v40 = vadd.f32 1e-05, %v1663_v11  ;;  %v4637_v11 = vld [vmem:[#allocation8 + $0x18] sm:$0xff] }
0x1305   :  { %4006 = vrsqrt.f32 %v1665_v40 }
0x130e   :  { %v4005_v47 = vpop.eup %4004 }
0x130f   :  { %v1668_v42 = vmul.f32 %v4005_v47, %v1652_v32 }
0x1311   :  { %v1674_v51 = vmul.f32 %v1673_v43, %v1668_v42 }
0x1312   :  { %v4007_v49 = vpop.eup %4006 }
0x1313   :  { %v1669_v50 = vmul.f32 %v4007_v49, %v1653_v60  ;;  %v1680_v54 = vadd.f32 %v1679_v52, %v1674_v51  ;;  %v4623_v60 = vld [vmem:[%s4935_s3 + $0x18] sm:$0xff]  }
0x1315   :  { %v1675_v53 = vmul.f32 %v1673_v43, %v1669_v50  ;;  %v1868_v43 = vrot.slane %v4637_v11, %v4586_v44 }
0x1317   :  { %v1681_v55 = vadd.f32 %v1679_v52, %v1675_v53  ;;  %v4651_v53 = vld [vmem:[#allocation8 + $0x8] sm:$0xff] }
0x1319   :  { %v1686_v57 = vpack.c.bf16 %v1681_v55, %v1680_v54 }
0x131b   :  { %3714 = vmatmul.mubr.msk.bf16.vlgmr.msra.gmra.mxu1 %vm100_vm1, %v1686_v57 }
0x131c   :  { %3733 = vmatprep.mubr.msk.bf16.mxu1 %vm4170_vm0, %v4169_v0  ;;  %3730 = vmatpush3.bf16.msra.mxu1 %v4623_v60 }
0x131d   :  { %3731 = vmatprep.subr.bf16.mxu1 %v4169_v0 }
0x1320   :  { %3732 = vmatpush3.bf16.msra.mxu1 %v4629_v4 }
0x1321   :  { %3737 = vmatprep.subr.bf16.mxu1 %v4169_v0 }
0x13db   :  { %v1740_v6 = vpop.f32.mrf.mxu1 }
0x13dc   :  { %v1741_v9 = vadd.f32 %v1740_v6, %v1690_v62 }
0x13dd   :  { %v3715_v7 = vpop.f32.mrf.mxu1 }
0x13de   :  { %v1747_v14 = vmax.f32 %v1741_v9, 0.0 }
0x13df   :  { %v1743_v10 = vpop.f32.mrf.mxu1 }
0x13e0   :  { %v1744_v12 = vadd.f32 %v1743_v10, %v1690_v62 }
0x13e1   :  { %v3716_v13 = vpop.f32.mrf.mxu1 }
0x13e2   :  { %v1748_v16 = vmax.f32 %v1744_v12, 0.0 }
0x13e4   :  { %v1757_v17 = vpack.c.bf16 %v1748_v16, %v1747_v14 }
0x13e6   :  { %3726 = vmatmul.mubr.msk.bf16.vlgmr.msra.gmra.mxu0 %vm1786_vm7, %v1757_v17 }
0x13e7   :  { %3745 = vmatprep.mubr.msk.bf16.mxu0 %vm4170_vm0, %v4169_v0 }
0x14a6   :  { %v1824_v59 = vpop.f32.mrf.mxu0 }
0x14a7   :  { %v1825_v19 = vadd.f32 %v1824_v59, %v1761_v18 }
0x14a8   :  { %v3727_v2 = vpop.f32.mrf.mxu0 }
0x14a9   :  { %v1831_v20 = vadd.f32 %v1825_v19, %v1680_v54  ;;  %v1880_v54 = vrot.slane %v4651_v53, %v1879_v41 }
0x14aa   :  { %v1827_v21 = vpop.f32.mrf.mxu0 }
0x14ab   :  { %v1828_v22 = vadd.f32 %v1827_v21, %v1761_v18  ;;  %v1833_v23 = vsel %vm100_vm1, %v1831_v20, 0.0 }
0x14ac   :  { %1834 = vadd.xlane.f32.xlu1 %v1833_v23  ;;  %v3728_v24 = vpop.f32.mrf.mxu0 }
0x14ad   :  { %v1832_v25 = vadd.f32 %v1828_v22, %v1681_v55 }
0x14af   :  { %v1836_v26 = vsel %vm100_vm1, %v1832_v25, 0.0 }
0x14b0   :  { %1837 = vadd.xlane.f32.xlu0 %v1836_v26 }
0x1535   :  { %v1835_v27 = vpop.xlane.xlu1 %1834 }
0x1536   :  { %v1839_v28 = vmul.f32 0.03125, %v1835_v27 }
0x1538   :  { %v1841_v29 = vsub.f32 %v1831_v20, %v1839_v28 }
0x1539   :  { %v1838_v30 = vpop.xlane.xlu0 %1837 }
0x153a   :  { %v1840_v31 = vmul.f32 0.03125, %v1838_v30  ;;  %v1843_v8 = vmul.f32 %v1841_v29, %v1841_v29 }
0x153c   :  { %v1842_v32 = vsub.f32 %v1832_v25, %v1840_v31  ;;  %v1845_v15 = vsel %vm100_vm1, %v1843_v8, 0.0 }
0x153d   :  { %1846 = vadd.xlane.f32.xlu1 %v1845_v15 }
0x153e   :  { %v1844_v46 = vmul.f32 %v1842_v32, %v1842_v32 }
0x1540   :  { %v1848_v33 = vsel %vm100_vm1, %v1844_v46, 0.0 }
0x1541   :  { %1849 = vadd.xlane.f32.xlu0 %v1848_v33 }
0x15c6   :  { %v1847_v3 = vpop.xlane.xlu1 %1846 }
0x15c7   :  { %v1851_v56 = vmul.f32 0.03125, %v1847_v3 }
0x15c9   :  { %v1853_v5 = vadd.f32 1e-05, %v1851_v56 }
0x15ca   :  { %v1850_v34 = vpop.xlane.xlu0 %1849 }
0x15cb   :  { %4008 = vrsqrt.f32 %v1853_v5  ;;  %v1852_v35 = vmul.f32 0.03125, %v1850_v34 }
0x15cd   :  { %v1854_v36 = vadd.f32 1e-05, %v1852_v35 }
0x15cf   :  { %4010 = vrsqrt.f32 %v1854_v36 }
0x15d8   :  { %v4009_v37 = vpop.eup %4008 }
0x15d9   :  { %v1857_v38 = vmul.f32 %v4009_v37, %v1841_v29 }
0x15db   :  { %v1863_v42 = vmul.f32 %v1862_v39, %v1857_v38 }
0x15dc   :  { %v4011_v40 = vpop.eup %4010 }
0x15dd   :  { %v1858_v47 = vmul.f32 %v4011_v40, %v1842_v32  ;;  %v4641_v50 = vadd.f32 %v1868_v43, %v1863_v42 }
0x15df   :  { %v1864_v49 = vmul.f32 %v1862_v39, %v1858_v47 }
0x15e1   :  { %v4643_v51 = vadd.f32 %v1868_v43, %v1864_v49 }
0x15e3   :  { %v1876_v52 = vpack.c.bf16 %v4643_v51, %v4641_v50 }
0x15e5   :  { %3734 = vmatmul.mubr.msk.bf16.vlgmr.msra.gmra.mxu1 %vm100_vm1, %v1876_v52 }
0x15e6   :  { %3739 = vmatprep.mubr.msk.bf16.mxu1 %vm4170_vm0, %v4169_v0 }
0x16a5   :  { %v1930_v55 = vpop.f32.mrf.mxu1 }
0x16a6   :  { %v1931_v57 = vadd.f32 %v1930_v55, %v1880_v54 }
0x16a7   :  { %v3735_v48 = vpop.f32.mrf.mxu1 }
0x16a8   :  { %v4656_v58 = vpack.c.bf16 %v1931_v57, %v1931_v57 }
0x16a9   :  { %v1933_v61 = vpop.f32.mrf.mxu1 }
0x16aa   :  { %v1934_v62 = vadd.f32 %v1933_v61, %v1880_v54  ;;  %1940 = vrot.lane.b32.xlu1 %v4656_v58, %s4171_s9 }
0x16ab   :  { %v3736_v6 = vpop.f32.mrf.mxu1 }
0x16ac   :  { %v4660_v7 = vpack.c.bf16 %v1934_v62, %v1934_v62 }
0x16ae   :  { %1989 = vrot.lane.b32.xlu0 %v4660_v7, %s4171_s9 }
0x171c   :  { %v1941_v9 = vpop.permute.xlu1 %1940 }
0x171d   :  { %v1946_v10 = vsel %vm195_vm2, %v1941_v9, 0 }
0x171e   :  { %3738 = vmatpush3.bf16.xpose.msra.mxu1 %v1946_v10 }
0x171f   :  { %3749 = vmatprep.subr.bf16.mxu1 %v4169_v0 }
0x1720   :  { %v1990_v12 = vpop.permute.xlu0 %1989 }
0x1721   :  { %v1995_v13 = vsel %vm195_vm2, %v1990_v12, 0 }
0x1722   :  { %3744 = vmatpush3.bf16.xpose.msra.mxu0 %v1995_v13 }
0x1723   :  { %3755 = vmatprep.subr.bf16.mxu0 %v4169_v0 }
0x1725   :  { %3740 = vmatmul.mubr.msk.bf16.vlgmr.msra.gmra.mxu1 %vm195_vm2, %v4656_v58 }
0x1726   :  { %3751 = vmatprep.mubr.msk.bf16.mxu1 %vm4170_vm0, %v4169_v0 }
0x1729   :  { %3746 = vmatmul.mubr.msk.bf16.vlgmr.msra.gmra.mxu0 %vm195_vm2, %v4660_v7 }
0x172a   :  { %3757 = vmatprep.mubr.msk.bf16.mxu0 %vm4170_vm0, %v4169_v0 }
0x17e5   :  { %v1982_v14 = vpop.f32.mrf.mxu1 }
0x17e6   :  { %v2037_v16 = vmul.f32 0.35355338, %v1982_v14 }
0x17e7   :  { %v3741_v17 = vpop.f32.mrf.mxu1 }
0x17e8   :  { %v2039_v18 = vsel %vm195_vm2, %v2037_v16, -inf }
0x17e9   :  { %v2031_v59 = vpop.f32.mrf.mxu0  ;;  %2040 = vmax.xlane.f32.xlu1 %v2039_v18  ;;  %v1985_v19 = vpop.f32.mrf.mxu1 }
0x17ea   :  { %v2038_v2 = vmul.f32 0.35355338, %v2031_v59 }
0x17eb   :  { %v3742_v20 = vpop.f32.mrf.mxu1  ;;  %v3747_v21 = vpop.f32.mrf.mxu0 }
0x17ec   :  { %v2042_v22 = vsel %vm195_vm2, %v2038_v2, -inf }
0x17ed   :  { %2043 = vmax.xlane.f32.xlu0 %v2042_v22  ;;  %v2034_v23 = vpop.f32.mrf.mxu0 }
0x17ef   :  { %v3748_v24 = vpop.f32.mrf.mxu0 }
0x17fa   :  { %2063 = vrot.lane.b32.xlu1 %v4656_v58, %s4172_s10 }
0x1872   :  { %v2041_v25 = vpop.xlane.xlu1 %2040 }
0x1873   :  { %v2045_v26 = vsub.f32 %v2037_v16, %v2041_v25 }
0x1875   :  { %v2047_v27 = vmul.f32 1.442695, %v2045_v26 }
0x1876   :  { %v2044_v28 = vpop.xlane.xlu0 %2043  ;;  %v2064_v29 = vpop.permute.xlu1 %2063 }
0x1877   :  { %4012 = vpow2.f32 %v2047_v27  ;;  %v2046_v30 = vsub.f32 %v2038_v2, %v2044_v28  ;;  %v2069_v31 = vsel %vm223_vm3, %v2064_v29, 0 }
0x1878   :  { %3750 = vmatpush3.bf16.msra.mxu1 %v2069_v31 }
0x1879   :  { %v2049_v8 = vmul.f32 1.442695, %v2046_v30  ;;  %3761 = vmatprep.subr.bf16.mxu1 %v4169_v0 }
0x187b   :  { %4014 = vpow2.f32 %v2049_v8 }
0x1884   :  { %v4013_v32 = vpop.eup %4012 }
0x1885   :  { %v2051_v15 = vsel %vm195_vm2, %v4013_v32, 0.0 }
0x1886   :  { %2052 = vadd.xlane.f32.xlu1 %v2051_v15 }
0x1888   :  { %v4015_v46 = vpop.eup %4014 }
0x1889   :  { %v2054_v33 = vsel %vm195_vm2, %v4015_v46, 0.0 }
0x188a   :  { %2055 = vadd.xlane.f32.xlu0 %v2054_v33 }
0x1897   :  { %2161 = vrot.lane.b32.xlu1 %v4656_v58, %s4173_s12 }
0x189b   :  { %2211 = vrot.lane.b32.xlu1 %v4660_v7, %s4173_s12 }
0x189f   :  { %2159 = vrot.lane.b32.xlu1 %v4656_v58, %s4174_s13 }
0x18a0   :  { %2111 = vrot.lane.b32.xlu0 %v4660_v7, %s4172_s10 }
0x18a4   :  { %2209 = vrot.lane.b32.xlu0 %v4660_v7, %s4174_s13 }
0x190f   :  { %v2053_v3 = vpop.xlane.xlu1 %2052 }
0x1910   :  { %4016 = vrcp.f32 %v2053_v3 }
0x1913   :  { %v2056_v56 = vpop.xlane.xlu0 %2055  ;;  %v2162_v36 = vpop.permute.xlu1 %2161 }
0x1914   :  { %4018 = vrcp.f32 %v2056_v56  ;;  %v2167_v40 = vsel %vm195_vm2, %v2162_v36, 0 }
0x1917   :  { %v2112_v5 = vpop.permute.xlu0 %2111  ;;  %v2212_v42 = vpop.permute.xlu1 %2211 }
0x1918   :  { %v2117_v34 = vsel %vm223_vm3, %v2112_v5, 0  ;;  %v2217_v49 = vsel %vm195_vm2, %v2212_v42, 0 }
0x1919   :  { %3756 = vmatpush3.bf16.msra.mxu0 %v2117_v34 }
0x191a   :  { %3767 = vmatprep.subr.bf16.mxu0 %v4169_v0 }
0x191b   :  { %v2160_v52 = vpop.permute.xlu1 %2159  ;;  %v2210_v54 = vpop.permute.xlu0 %2209 }
0x191d   :  { %v4017_v35 = vpop.eup %4016 }
0x191e   :  { %v2059_v37 = vmul.f32 %v4017_v35, %v4013_v32 }
0x1920   :  { %v2061_v38 = vpack.c.bf16 %v2059_v37, %v2059_v37 }
0x1921   :  { %v4019_v39 = vpop.eup %4018 }
0x1922   :  { %3752 = vmatmul.mubr.msk.bf16.vlgmr.msra.gmra.mxu1 %vm195_vm2, %v2061_v38  ;;  %v2060_v47 = vmul.f32 %v4019_v39, %v4015_v46 }
0x1923   :  { %3762 = vmatpush3.bf16.xpose.msra.mxu1 %v2167_v40  ;;  %3763 = vmatprep.mubr.msk.bf16.mxu1 %vm4170_vm0, %v4169_v0 }
0x1924   :  { %v2062_v43 = vpack.c.bf16 %v2060_v47, %v2060_v47  ;;  %3773 = vmatprep.subr.bf16.mxu1 %v4169_v0 }
0x1926   :  { %3758 = vmatmul.mubr.msk.bf16.vlgmr.msra.gmra.mxu0 %vm195_vm2, %v2062_v43 }
0x1927   :  { %3768 = vmatpush3.bf16.xpose.msra.mxu0 %v2217_v49  ;;  %3769 = vmatprep.mubr.msk.bf16.mxu0 %vm4170_vm0, %v4169_v0 }
0x1928   :  { %3779 = vmatprep.subr.bf16.mxu0 %v4169_v0 }
0x192a   :  { %3764 = vmatmul.mubr.msk.bf16.vlgmr.msra.gmra.mxu1 %vm195_vm2, %v2160_v52 }
0x192b   :  { %3775 = vmatprep.mubr.msk.bf16.mxu1 %vm4170_vm0, %v4169_v0 }
0x192e   :  { %3770 = vmatmul.mubr.msk.bf16.vlgmr.msra.gmra.mxu0 %vm195_vm2, %v2210_v54 }
0x192f   :  { %3781 = vmatprep.mubr.msk.bf16.mxu0 %vm4170_vm0, %v4169_v0 }
0x19e2   :  { %v4712_v55 = vpop.f32.mrf.mxu1 }
0x19e4   :  { %v3753_v57 = vpop.f32.mrf.mxu1 }
0x19e6   :  { %v2108_v48 = vpop.f32.mrf.mxu1  ;;  %v4714_v61 = vpop.f32.mrf.mxu0 }
0x19e8   :  { %v3754_v62 = vpop.f32.mrf.mxu1  ;;  %v3759_v6 = vpop.f32.mrf.mxu0 }
0x19ea   :  { %v2156_v9 = vpop.f32.mrf.mxu0  ;;  %v2203_v10 = vpop.f32.mrf.mxu1 }
0x19eb   :  { %v2259_v12 = vmul.f32 0.35355338, %v2203_v10 }
0x19ec   :  { %v3760_v13 = vpop.f32.mrf.mxu0  ;;  %v3765_v14 = vpop.f32.mrf.mxu1 }
0x19ed   :  { %v2261_v16 = vsel %vm195_vm2, %v2259_v12, -inf }
0x19ee   :  { %v2253_v17 = vpop.f32.mrf.mxu0  ;;  %2262 = vmax.xlane.f32.xlu1 %v2261_v16  ;;  %v2206_v18 = vpop.f32.mrf.mxu1 }
0x19ef   :  { %v2260_v59 = vmul.f32 0.35355338, %v2253_v17 }
0x19f0   :  { %v3766_v19 = vpop.f32.mrf.mxu1  ;;  %v3771_v2 = vpop.f32.mrf.mxu0 }
0x19f1   :  { %v2264_v20 = vsel %vm195_vm2, %v2260_v59, -inf }
0x19f2   :  { %2265 = vmax.xlane.f32.xlu0 %v2264_v20  ;;  %v2256_v21 = vpop.f32.mrf.mxu0 }
0x19f4   :  { %v3772_v22 = vpop.f32.mrf.mxu0 }
0x19ff   :  { %2285 = vrot.lane.b32.xlu1 %v4656_v58, %s4175_s14 }
0x1a03   :  { %2383 = vrot.lane.b32.xlu1 %v4656_v58, %s4176_s15 }
0x1a07   :  { %2433 = vrot.lane.b32.xlu1 %v4660_v7, %s4176_s15 }
0x1a0b   :  { %2381 = vrot.lane.b32.xlu1 %v4656_v58, %s4177_s16 }
0x1a77   :  { %v2263_v23 = vpop.xlane.xlu1 %2262 }
0x1a78   :  { %v2267_v24 = vsub.f32 %v2259_v12, %v2263_v23 }
0x1a7a   :  { %v2269_v25 = vmul.f32 1.442695, %v2267_v24 }
0x1a7b   :  { %v2266_v26 = vpop.xlane.xlu0 %2265  ;;  %v2286_v27 = vpop.permute.xlu1 %2285 }
0x1a7c   :  { %4020 = vpow2.f32 %v2269_v25  ;;  %v2268_v28 = vsub.f32 %v2260_v59, %v2266_v26  ;;  %v2291_v29 = vsel %vm223_vm3, %v2286_v27, 0 }
0x1a7d   :  { %3774 = vmatpush3.bf16.msra.mxu1 %v2291_v29 }
0x1a7e   :  { %v2271_v30 = vmul.f32 1.442695, %v2268_v28  ;;  %3785 = vmatprep.subr.bf16.mxu1 %v4169_v0 }
0x1a7f   :  { %v2384_v34 = vpop.permute.xlu1 %2383 }
0x1a80   :  { %4022 = vpow2.f32 %v2271_v30  ;;  %v2389_v38 = vsel %vm195_vm2, %v2384_v34, 0 }
0x1a83   :  { %v2434_v40 = vpop.permute.xlu1 %2433 }
0x1a84   :  { %v2439_v42 = vsel %vm195_vm2, %v2434_v40, 0 }
0x1a87   :  { %v2382_v43 = vpop.permute.xlu1 %2381 }
0x1a89   :  { %v4021_v31 = vpop.eup %4020 }
0x1a8a   :  { %v2273_v8 = vsel %vm195_vm2, %v4021_v31, 0.0 }
0x1a8b   :  { %2274 = vadd.xlane.f32.xlu0 %v2273_v8 }
0x1a8d   :  { %v4023_v32 = vpop.eup %4022 }
0x1a8e   :  { %v2276_v15 = vsel %vm195_vm2, %v4023_v32, 0.0 }
0x1a8f   :  { %2277 = vadd.xlane.f32.xlu0 %v2276_v15 }
0x1aa5   :  { %2333 = vrot.lane.b32.xlu0 %v4660_v7, %s4175_s14 }
0x1aa9   :  { %2431 = vrot.lane.b32.xlu0 %v4660_v7, %s4177_s16 }
0x1b14   :  { %v2275_v46 = vpop.xlane.xlu0 %2274 }
0x1b15   :  { %4024 = vrcp.f32 %v2275_v46 }
0x1b18   :  { %v2278_v33 = vpop.xlane.xlu0 %2277 }
0x1b19   :  { %4026 = vrcp.f32 %v2278_v33 }
0x1b1c   :  { %v2334_v3 = vpop.permute.xlu0 %2333 }
0x1b1d   :  { %v2339_v56 = vsel %vm223_vm3, %v2334_v3, 0 }
0x1b1e   :  { %3780 = vmatpush3.bf16.msra.mxu0 %v2339_v56 }
0x1b1f   :  { %3791 = vmatprep.subr.bf16.mxu0 %v4169_v0 }
0x1b20   :  { %v2432_v49 = vpop.permute.xlu0 %2431 }
0x1b22   :  { %v4025_v5 = vpop.eup %4024 }
0x1b23   :  { %v2281_v35 = vmul.f32 %v4025_v5, %v4021_v31 }
0x1b25   :  { %v2283_v36 = vpack.c.bf16 %v2281_v35, %v2281_v35 }
0x1b26   :  { %v4027_v37 = vpop.eup %4026 }
0x1b27   :  { %3776 = vmatmul.mubr.msk.bf16.vlgmr.msra.gmra.mxu1 %vm195_vm2, %v2283_v36  ;;  %v2282_v39 = vmul.f32 %v4027_v37, %v4023_v32 }
0x1b28   :  { %3786 = vmatpush3.bf16.xpose.msra.mxu1 %v2389_v38  ;;  %3787 = vmatprep.mubr.msk.bf16.mxu1 %vm4170_vm0, %v4169_v0 }
0x1b29   :  { %v2284_v47 = vpack.c.bf16 %v2282_v39, %v2282_v39  ;;  %3797 = vmatprep.subr.bf16.mxu1 %v4169_v0 }
0x1b2b   :  { %3782 = vmatmul.mubr.msk.bf16.vlgmr.msra.gmra.mxu0 %vm195_vm2, %v2284_v47 }
0x1b2c   :  { %3792 = vmatpush3.bf16.xpose.msra.mxu0 %v2439_v42  ;;  %3793 = vmatprep.mubr.msk.bf16.mxu0 %vm4170_vm0, %v4169_v0 }
0x1b2d   :  { %3803 = vmatprep.subr.bf16.mxu0 %v4169_v0 }
0x1b2f   :  { %3788 = vmatmul.mubr.msk.bf16.vlgmr.msra.gmra.mxu1 %vm195_vm2, %v2382_v43 }
0x1b30   :  { %3799 = vmatprep.mubr.msk.bf16.mxu1 %vm4170_vm0, %v4169_v0 }
0x1b33   :  { %3794 = vmatmul.mubr.msk.bf16.vlgmr.msra.gmra.mxu0 %vm195_vm2, %v2432_v49 }
0x1b34   :  { %3805 = vmatprep.mubr.msk.bf16.mxu0 %vm4170_vm0, %v4169_v0 }
0x1be7   :  { %v4752_v52 = vpop.f32.mrf.mxu1 }
0x1be9   :  { %v3777_v54 = vpop.f32.mrf.mxu1 }
0x1beb   :  { %v2330_v57 = vpop.f32.mrf.mxu1  ;;  %v4754_v48 = vpop.f32.mrf.mxu0 }
0x1bec   :  { %v3915_v62 = vpack.i.bf16 %v4754_v48, %v4752_v52 }
0x1bed   :  { %v3778_v6 = vpop.f32.mrf.mxu1  ;;  %v3783_v9 = vpop.f32.mrf.mxu0 }
0x1bef   :  { %v2378_v10 = vpop.f32.mrf.mxu0  ;;  %v2425_v12 = vpop.f32.mrf.mxu1 }
0x1bf0   :  { %v2481_v13 = vmul.f32 0.35355338, %v2425_v12 }
0x1bf1   :  { %v3784_v14 = vpop.f32.mrf.mxu0  ;;  %v3789_v16 = vpop.f32.mrf.mxu1 }
0x1bf2   :  { %v2483_v17 = vsel %vm195_vm2, %v2481_v13, -inf }
0x1bf3   :  { %v2475_v18 = vpop.f32.mrf.mxu0  ;;  %2484 = vmax.xlane.f32.xlu1 %v2483_v17  ;;  %v2428_v59 = vpop.f32.mrf.mxu1 }
0x1bf4   :  { %v2482_v19 = vmul.f32 0.35355338, %v2475_v18 }
0x1bf5   :  { %v3790_v2 = vpop.f32.mrf.mxu1  ;;  %v3795_v20 = vpop.f32.mrf.mxu0 }
0x1bf6   :  { %v2486_v21 = vsel %vm195_vm2, %v2482_v19, -inf }
0x1bf7   :  { %2487 = vmax.xlane.f32.xlu0 %v2486_v21  ;;  %v2478_v22 = vpop.f32.mrf.mxu0 }
0x1bf9   :  { %v3796_v23 = vpop.f32.mrf.mxu0 }
0x1c04   :  { %2507 = vrot.lane.b32.xlu1 %v4656_v58, %s4178_s17 }
0x1c08   :  { %2605 = vrot.lane.b32.xlu1 %v4656_v58, %s4179_s18 }
0x1c0c   :  { %2655 = vrot.lane.b32.xlu1 %v4660_v7, %s4179_s18 }
0x1c10   :  { %2603 = vrot.lane.b32.xlu1 %v4656_v58, %s4180_s19 }
0x1c7c   :  { %v2485_v24 = vpop.xlane.xlu1 %2484 }
0x1c7d   :  { %v2489_v25 = vsub.f32 %v2481_v13, %v2485_v24 }
0x1c7f   :  { %v2491_v26 = vmul.f32 1.442695, %v2489_v25 }
0x1c80   :  { %v2488_v27 = vpop.xlane.xlu0 %2487  ;;  %v2508_v28 = vpop.permute.xlu1 %2507 }
0x1c81   :  { %4028 = vpow2.f32 %v2491_v26  ;;  %v2490_v29 = vsub.f32 %v2482_v19, %v2488_v27  ;;  %v2513_v30 = vsel %vm223_vm3, %v2508_v28, 0 }
0x1c82   :  { %3798 = vmatpush3.bf16.msra.mxu1 %v2513_v30 }
0x1c83   :  { %v2493_v31 = vmul.f32 1.442695, %v2490_v29  ;;  %3809 = vmatprep.subr.bf16.mxu1 %v4169_v0 }
0x1c84   :  { %v2606_v35 = vpop.permute.xlu1 %2605 }
0x1c85   :  { %4030 = vpow2.f32 %v2493_v31  ;;  %v2611_v39 = vsel %vm195_vm2, %v2606_v35, 0 }
0x1c88   :  { %v2656_v47 = vpop.permute.xlu1 %2655 }
0x1c89   :  { %v2661_v43 = vsel %vm195_vm2, %v2656_v47, 0 }
0x1c8c   :  { %v2604_v49 = vpop.permute.xlu1 %2603 }
0x1c8e   :  { %v4029_v8 = vpop.eup %4028 }
0x1c8f   :  { %v2495_v32 = vsel %vm195_vm2, %v4029_v8, 0.0 }
0x1c90   :  { %2496 = vadd.xlane.f32.xlu0 %v2495_v32 }
0x1c92   :  { %v4031_v15 = vpop.eup %4030 }
0x1c93   :  { %v2498_v46 = vsel %vm195_vm2, %v4031_v15, 0.0 }
0x1c94   :  { %2499 = vadd.xlane.f32.xlu0 %v2498_v46 }
0x1caa   :  { %2555 = vrot.lane.b32.xlu0 %v4660_v7, %s4178_s17 }
0x1cae   :  { %2653 = vrot.lane.b32.xlu0 %v4660_v7, %s4180_s19 }
0x1d19   :  { %v2497_v33 = vpop.xlane.xlu0 %2496 }
0x1d1a   :  { %4032 = vrcp.f32 %v2497_v33 }
0x1d1d   :  { %v2500_v3 = vpop.xlane.xlu0 %2499 }
0x1d1e   :  { %4034 = vrcp.f32 %v2500_v3 }
0x1d21   :  { %v2556_v56 = vpop.permute.xlu0 %2555 }
0x1d22   :  { %v2561_v5 = vsel %vm223_vm3, %v2556_v56, 0 }
0x1d23   :  { %3804 = vmatpush3.bf16.msra.mxu0 %v2561_v5 }
0x1d24   :  { %3815 = vmatprep.subr.bf16.mxu0 %v4169_v0 }
0x1d25   :  { %v2654_v54 = vpop.permute.xlu0 %2653 }
0x1d27   :  { %v4033_v34 = vpop.eup %4032 }
0x1d28   :  { %v2503_v36 = vmul.f32 %v4033_v34, %v4029_v8 }
0x1d2a   :  { %v2505_v37 = vpack.c.bf16 %v2503_v36, %v2503_v36 }
0x1d2b   :  { %v4035_v38 = vpop.eup %4034 }
0x1d2c   :  { %3800 = vmatmul.mubr.msk.bf16.vlgmr.msra.gmra.mxu1 %vm195_vm2, %v2505_v37  ;;  %v2504_v40 = vmul.f32 %v4035_v38, %v4031_v15 }
0x1d2d   :  { %3810 = vmatpush3.bf16.xpose.msra.mxu1 %v2611_v39  ;;  %3811 = vmatprep.mubr.msk.bf16.mxu1 %vm4170_vm0, %v4169_v0 }
0x1d2e   :  { %v2506_v42 = vpack.c.bf16 %v2504_v40, %v2504_v40  ;;  %3821 = vmatprep.subr.bf16.mxu1 %v4169_v0 }
0x1d30   :  { %3806 = vmatmul.mubr.msk.bf16.vlgmr.msra.gmra.mxu0 %vm195_vm2, %v2506_v42 }
0x1d31   :  { %3816 = vmatpush3.bf16.xpose.msra.mxu0 %v2661_v43  ;;  %3817 = vmatprep.mubr.msk.bf16.mxu0 %vm4170_vm0, %v4169_v0 }
0x1d32   :  { %3827 = vmatprep.subr.bf16.mxu0 %v4169_v0 }
0x1d34   :  { %3812 = vmatmul.mubr.msk.bf16.vlgmr.msra.gmra.mxu1 %vm195_vm2, %v2604_v49 }
0x1d35   :  { %3823 = vmatprep.mubr.msk.bf16.mxu1 %vm4170_vm0, %v4169_v0 }
0x1d38   :  { %3818 = vmatmul.mubr.msk.bf16.vlgmr.msra.gmra.mxu0 %vm195_vm2, %v2654_v54 }
0x1d39   :  { %3829 = vmatprep.mubr.msk.bf16.mxu0 %vm4170_vm0, %v4169_v0 }
0x1dec   :  { %v2549_v57 = vpop.f32.mrf.mxu1 }
0x1dee   :  { %v3801_v6 = vpop.f32.mrf.mxu1 }
0x1df0   :  { %v2552_v9 = vpop.f32.mrf.mxu1  ;;  %v2597_v10 = vpop.f32.mrf.mxu0 }
0x1df1   :  { %v3920_v27 = vpack.i.bf16 %v2597_v10, %v2549_v57 }
0x1df2   :  { %v3802_v12 = vpop.f32.mrf.mxu1  ;;  %v3807_v13 = vpop.f32.mrf.mxu0 }
0x1df4   :  { %v2600_v14 = vpop.f32.mrf.mxu0  ;;  %v2647_v16 = vpop.f32.mrf.mxu1 }
0x1df5   :  { %v2703_v17 = vmul.f32 0.35355338, %v2647_v16 }
0x1df6   :  { %v3808_v18 = vpop.f32.mrf.mxu0  ;;  %v3813_v59 = vpop.f32.mrf.mxu1 }
0x1df7   :  { %v2705_v19 = vsel %vm195_vm2, %v2703_v17, -inf }
0x1df8   :  { %v2697_v2 = vpop.f32.mrf.mxu0  ;;  %2706 = vmax.xlane.f32.xlu1 %v2705_v19  ;;  %v2650_v20 = vpop.f32.mrf.mxu1 }
0x1df9   :  { %v2704_v21 = vmul.f32 0.35355338, %v2697_v2 }
0x1dfa   :  { %v3814_v22 = vpop.f32.mrf.mxu1  ;;  %v3819_v23 = vpop.f32.mrf.mxu0 }
0x1dfb   :  { %v2708_v24 = vsel %vm195_vm2, %v2704_v21, -inf }
0x1dfc   :  { %2709 = vmax.xlane.f32.xlu0 %v2708_v24  ;;  %v2700_v25 = vpop.f32.mrf.mxu0 }
0x1dfe   :  { %v3820_v26 = vpop.f32.mrf.mxu0 }
0x1e09   :  { %2729 = vrot.lane.b32.xlu1 %v4656_v58, %s4181_s20 }
0x1e0d   :  { %2862 = vrot.lane.b32.xlu1 %v4623_v60, %s4182_s1 }
0x1e11   :  { %3916 = vrot.lane.b32.xlu1 %v3915_v62, %s4166_s11 }
0x1e15   :  { %3921 = vrot.lane.b32.xlu1 %v3920_v27, %s4183_s21 }
0x1e19   :  { %2860 = vrot.lane.b32.xlu1 %v4629_v4, %s4182_s1 }
0x1e81   :  { %v2707_v28 = vpop.xlane.xlu1 %2706 }
0x1e82   :  { %v2711_v29 = vsub.f32 %v2703_v17, %v2707_v28 }
0x1e84   :  { %v2713_v30 = vmul.f32 1.442695, %v2711_v29 }
0x1e85   :  { %v2710_v31 = vpop.xlane.xlu0 %2709  ;;  %v2730_v8 = vpop.permute.xlu1 %2729 }
0x1e86   :  { %4036 = vpow2.f32 %v2713_v30  ;;  %v2712_v58 = vsub.f32 %v2704_v21, %v2710_v31  ;;  %v2735_v60 = vsel %vm223_vm3, %v2730_v8, 0 }
0x1e87   :  { %3822 = vmatpush3.bf16.msra.mxu1 %v2735_v60 }
0x1e88   :  { %v2715_v32 = vmul.f32 1.442695, %v2712_v58  ;;  %3833 = vmatprep.subr.bf16.mxu1 %v4169_v0 }
0x1e89   :  { %v2863_v36 = vpop.permute.xlu1 %2862 }
0x1e8a   :  { %4038 = vpow2.f32 %v2715_v32 }
0x1e8d   :  { %v3917_v38 = vpop.permute.xlu1 %3916 }
0x1e8e   :  { %v3919_v12 = vunpack.i.h.bf16 %v3917_v38  ;;  %v3918_v13 = vunpack.i.l.bf16 %v3917_v38 }
0x1e90   :  { %v2850_v18 = vsel %vm195_vm2, %v4714_v61, %v3919_v12  ;;  %v2849_v59 = vsel %vm195_vm2, %v4712_v55, %v3918_v13  ;;  %v2858_v61 = vsub.s32 6, %v4318_v63  ;;  %v3945_v12 = vld [vmem:[%s4937_s5 + $0x30] sm:$0xff]   ;;  %v3946_v13 = vld [vmem:[%s4937_s5 + $0x28] sm:$0xff]  }
0x1e91   :  { %v3922_v39 = vpop.permute.xlu1 %3921 }
0x1e92   :  { %v3924_v14 = vunpack.i.h.bf16 %v3922_v39  ;;  %v3923_v16 = vunpack.i.l.bf16 %v3922_v39  ;;  %v2859_v55 = vrot.slane %v4651_v53, %v2858_v61  ;;  %v2941_v39 = vrot.slane %v4588_v45, %v4321_v1 }
0x1e93   :  { %v4037_v52 = vpop.eup %4036 }
0x1e94   :  { %v2717_v48 = vsel %vm195_vm2, %v4037_v52, 0.0  ;;  %v2851_v20 = vsel %vm1580_vm5, %v2849_v59, %v3923_v16  ;;  %v2852_v21 = vsel %vm1580_vm5, %v2850_v18, %v3924_v14  ;;  %v3947_v14 = vld [vmem:[%s4937_s5 + $0x20] sm:$0xff]   ;;  %v2959_v16 = vrot.slane %v4588_v45, %v1879_v41 }
0x1e95   :  { %2718 = vadd.xlane.f32.xlu0 %v2717_v48  ;;  %v2861_v40 = vpop.permute.xlu1 %2860 }
0x1e97   :  { %v4039_v62 = vpop.eup %4038 }
0x1e98   :  { %v2720_v4 = vsel %vm195_vm2, %v4039_v62, 0.0 }
0x1e99   :  { %2721 = vadd.xlane.f32.xlu0 %v2720_v4 }
0x1eaf   :  { %2777 = vrot.lane.b32.xlu0 %v4660_v7, %s4181_s20 }
0x1f1e   :  { %v2719_v15 = vpop.xlane.xlu0 %2718 }
0x1f1f   :  { %4040 = vrcp.f32 %v2719_v15 }
0x1f22   :  { %v2722_v46 = vpop.xlane.xlu0 %2721 }
0x1f23   :  { %4042 = vrcp.f32 %v2722_v46 }
0x1f26   :  { %v2778_v33 = vpop.permute.xlu0 %2777 }
0x1f27   :  { %v2783_v3 = vsel %vm223_vm3, %v2778_v33, 0 }
0x1f28   :  { %3828 = vmatpush3.bf16.msra.mxu0 %v2783_v3  ;;  %v3943_v3 = vld [vmem:[%s4936_s4 + $0x10] sm:$0xff]  }
0x1f29   :  { %3841 = vmatprep.subr.bf16.mxu0 %v4169_v0 }
0x1f2c   :  { %v4041_v56 = vpop.eup %4040 }
0x1f2d   :  { %v2725_v5 = vmul.f32 %v4041_v56, %v4037_v52  ;;  %v3944_v56 = vld [vmem:[%s4937_s5 + $0x38] sm:$0xff]  }
0x1f2f   :  { %v2727_v34 = vpack.c.bf16 %v2725_v5, %v2725_v5 }
0x1f30   :  { %v4043_v35 = vpop.eup %4042 }
0x1f31   :  { %3824 = vmatmul.mubr.msk.bf16.vlgmr.msra.gmra.mxu1 %vm195_vm2, %v2727_v34  ;;  %v2726_v37 = vmul.f32 %v4043_v35, %v4039_v62 }
0x1f32   :  { %3834 = vmatpush3.bf16.msra.mxu1 %v2863_v36  ;;  %3837 = vmatprep.mubr.msk.bf16.mxu1 %vm4170_vm0, %v4169_v0 }
0x1f33   :  { %v2728_v7 = vpack.c.bf16 %v2726_v37, %v2726_v37  ;;  %3835 = vmatprep.subr.bf16.mxu1 %v4169_v0 }
0x1f35   :  { %3830 = vmatmul.mubr.msk.bf16.vlgmr.msra.gmra.mxu0 %vm195_vm2, %v2728_v7 }
0x1f36   :  { %3845 = vmatprep.mubr.msk.bf16.mxu0 %vm4170_vm0, %v4169_v0  ;;  %3836 = vmatpush3.bf16.msra.mxu1 %v2861_v40  ;;  %v4860_v40 = vsub.s32 2, %v4318_v63 }
0x1f37   :  { %3849 = vmatprep.subr.bf16.mxu1 %v4169_v0 }
0x1ff1   :  { %v2771_v47 = vpop.f32.mrf.mxu1 }
0x1ff3   :  { %v3825_v42 = vpop.f32.mrf.mxu1 }
0x1ff5   :  { %v2774_v43 = vpop.f32.mrf.mxu1  ;;  %v2819_v49 = vpop.f32.mrf.mxu0 }
0x1ff6   :  { %v3925_v54 = vpack.i.bf16 %v2819_v49, %v2771_v47 }
0x1ff7   :  { %v3826_v57 = vpop.f32.mrf.mxu1  ;;  %v3831_v6 = vpop.f32.mrf.mxu0 }
0x1ff8   :  { %3926 = vrot.lane.b32.xlu0 %v3925_v54, %s4184_s22  ;;  %v2947_v54 = vrot.slane %v4588_v45, %v4860_v40 }
0x1ff9   :  { %v2822_v9 = vpop.f32.mrf.mxu0 }
0x1ffb   :  { %v3832_v10 = vpop.f32.mrf.mxu0 }
0x206a   :  { %v3927_v17 = vpop.permute.xlu0 %3926 }
0x206b   :  { %v3929_v19 = vunpack.i.h.bf16 %v3927_v17  ;;  %v3928_v2 = vunpack.i.l.bf16 %v3927_v17 }
0x206d   :  { %v2854_v22 = vsel %vm1583_vm6, %v2852_v21, %v3929_v19  ;;  %v2853_v23 = vsel %vm1583_vm6, %v2851_v20, %v3928_v2 }
0x206e   :  { %v2855_v24 = vpack.c.bf16 %v2854_v22, %v2853_v23 }
0x2070   :  { %3838 = vmatmul.mubr.msk.bf16.vlgmr.msra.gmra.mxu1 %vm100_vm1, %v2855_v24  ;;  %v4053_v24 = vld [vmem:[#allocation8 + $0x10] sm:$0xff] }
0x2071   :  { %3857 = vmatprep.mubr.msk.bf16.mxu1 %vm4170_vm0, %v4169_v0  ;;  %3850 = vmatpush3.bf16.msra.mxu1 %v3944_v56 }
0x2072   :  { %3851 = vmatprep.subr.bf16.mxu1 %v4169_v0 }
0x2075   :  { %3852 = vmatpush3.bf16.msra.mxu1 %v3945_v12 }
0x2076   :  { %3853 = vmatprep.subr.bf16.mxu1 %v4169_v0 }
0x2079   :  { %3854 = vmatpush3.bf16.msra.mxu1 %v3946_v13 }
0x207a   :  { %3855 = vmatprep.subr.bf16.mxu1 %v4169_v0 }
0x207d   :  { %3856 = vmatpush3.bf16.msra.mxu1 %v3947_v14 }
0x2130   :  { %v2903_v25 = vpop.f32.mrf.mxu1 }
0x2131   :  { %v2904_v26 = vadd.f32 %v2903_v25, %v2859_v55 }
0x2132   :  { %v3839_v27 = vpop.f32.mrf.mxu1 }
0x2133   :  { %v2910_v28 = vadd.f32 %v2904_v26, %v4641_v50 }
0x2134   :  { %v2906_v29 = vpop.f32.mrf.mxu1 }
0x2135   :  { %v2907_v30 = vadd.f32 %v2906_v29, %v2859_v55  ;;  %v2912_v31 = vsel %vm100_vm1, %v2910_v28, 0.0  ;;  %v3031_v55 = vrot.slane %v4053_v24, %v2858_v61 }
0x2136   :  { %2913 = vadd.xlane.f32.xlu0 %v2912_v31  ;;  %v3840_v8 = vpop.f32.mrf.mxu1 }
0x2137   :  { %v2911_v58 = vadd.f32 %v2907_v30, %v4643_v51  ;;  %v3942_v51 = vld [vmem:[%s4936_s4 + $0x18] sm:$0xff]  }
0x2138   :  { %3842 = vmatpush3.bf16.msra.mxu0 %v3942_v51  ;;  %v3952_v51 = vld [vmem:[%s4938_s6 + $0x14] ss:$8 sps:$4 sm:$0xff]  }
0x2139   :  { %v2915_v60 = vsel %vm100_vm1, %v2911_v58, 0.0  ;;  %3843 = vmatprep.subr.bf16.mxu0 %v4169_v0 }
0x213a   :  { %2916 = vadd.xlane.f32.xlu1 %v2915_v60 }
0x213c   :  { %3844 = vmatpush3.bf16.msra.mxu0 %v3943_v3  ;;  %v3955_v3 = vld [vmem:[%s4938_s6 + $0x4] ss:$8 sps:$4 sm:$0xff]  }
0x213d   :  { %3861 = vmatprep.subr.bf16.mxu0 %v4169_v0 }
0x21bf   :  { %v2914_v32 = vpop.xlane.xlu0 %2913 }
0x21c0   :  { %v2918_v52 = vmul.f32 0.03125, %v2914_v32 }
0x21c2   :  { %v2920_v48 = vsub.f32 %v2910_v28, %v2918_v52 }
0x21c3   :  { %v2917_v53 = vpop.xlane.xlu1 %2916 }
0x21c4   :  { %v2919_v62 = vmul.f32 0.03125, %v2917_v53  ;;  %v2922_v4 = vmul.f32 %v2920_v48, %v2920_v48 }
0x21c6   :  { %v2921_v15 = vsub.f32 %v2911_v58, %v2919_v62  ;;  %v2924_v50 = vsel %vm100_vm1, %v2922_v4, 0.0 }
0x21c7   :  { %2925 = vadd.xlane.f32.xlu0 %v2924_v50  ;;  %v3948_v50 = vld [vmem:[%s4938_s6 + $0x10] ss:$8 sps:$4 sm:$0xff]  }
0x21c8   :  { %v2923_v46 = vmul.f32 %v2921_v15, %v2921_v15 }
0x21ca   :  { %v2927_v33 = vsel %vm100_vm1, %v2923_v46, 0.0  ;;  %v3950_v46 = vld [vmem:[%s4938_s6 + $0x10] ss:$8 sps:$4 sm:$0xff]  }
0x21cb   :  { %2928 = vadd.xlane.f32.xlu0 %v2927_v33  ;;  %v3953_v33 = vld [vmem:[%s4938_s6] ss:$8 sps:$4 sm:$0xff]  }
0x2250   :  { %v2926_v5 = vpop.xlane.xlu0 %2925 }
0x2251   :  { %v2930_v34 = vmul.f32 0.03125, %v2926_v5 }
0x2253   :  { %v2932_v35 = vadd.f32 1e-05, %v2930_v34 }
0x2254   :  { %v2929_v36 = vpop.xlane.xlu0 %2928 }
0x2255   :  { %4044 = vrsqrt.f32 %v2932_v35  ;;  %v2931_v37 = vmul.f32 0.03125, %v2929_v36 }
0x2257   :  { %v2933_v7 = vadd.f32 1e-05, %v2931_v37 }
0x2259   :  { %4046 = vrsqrt.f32 %v2933_v7 }
0x2262   :  { %v4045_v38 = vpop.eup %4044 }
0x2263   :  { %v2936_v47 = vmul.f32 %v4045_v38, %v2920_v48 }
0x2265   :  { %v2942_v49 = vmul.f32 %v2941_v39, %v2936_v47 }
0x2266   :  { %v4047_v42 = vpop.eup %4046 }
0x2267   :  { %v2937_v43 = vmul.f32 %v4047_v42, %v2921_v15  ;;  %v2948_v6 = vadd.f32 %v2947_v54, %v2942_v49  ;;  %v3949_v15 = vld [vmem:[%s4938_s6] ss:$8 sps:$4 sm:$0xff]   ;;  %v3137_v42 = vrot.slane %v4637_v11, %v4860_v40  ;;  %s4185_s6 = smov [#allocation10]  }
0x2269   :  { %v2943_v57 = vmul.f32 %v2941_v39, %v2937_v43  ;;  %v3131_v39 = vrot.slane %v4637_v11, %v4321_v1 }
0x226b   :  { %v2949_v9 = vadd.f32 %v2947_v54, %v2943_v57 }
0x226d   :  { %v2955_v10 = vpack.c.bf16 %v2949_v9, %v2948_v6 }
0x226f   :  { %3846 = vmatmul.mubr.msk.bf16.vlgmr.msra.gmra.mxu0 %vm100_vm1, %v2955_v10 }
0x2270   :  { %3865 = vmatprep.mubr.msk.bf16.mxu0 %vm4170_vm0, %v4169_v0 }
0x232f   :  { %v3009_v17 = vpop.f32.mrf.mxu0 }
0x2330   :  { %v3010_v59 = vadd.f32 %v3009_v17, %v2959_v16 }
0x2331   :  { %v3847_v18 = vpop.f32.mrf.mxu0 }
0x2332   :  { %v3016_v21 = vmax.f32 %v3010_v59, 0.0 }
0x2333   :  { %v3012_v19 = vpop.f32.mrf.mxu0 }
0x2334   :  { %v3013_v2 = vadd.f32 %v3012_v19, %v2959_v16 }
0x2335   :  { %v3848_v20 = vpop.f32.mrf.mxu0 }
0x2336   :  { %v3017_v22 = vmax.f32 %v3013_v2, 0.0 }
0x2338   :  { %v3027_v23 = vpack.c.bf16 %v3017_v22, %v3016_v21 }
0x233a   :  { %3858 = vmatmul.mubr.msk.bf16.vlgmr.msra.gmra.mxu1 %vm1786_vm7, %v3027_v23 }
0x23fa   :  { %v3093_v25 = vpop.f32.mrf.mxu1 }
0x23fb   :  { %v3094_v26 = vadd.f32 %v3093_v25, %v3031_v55 }
0x23fc   :  { %v3859_v27 = vpop.f32.mrf.mxu1 }
0x23fd   :  { %v3100_v28 = vadd.f32 %v3094_v26, %v2948_v6 }
0x23fe   :  { %v3096_v45 = vpop.f32.mrf.mxu1 }
0x23ff   :  { %v3097_v41 = vadd.f32 %v3096_v45, %v3031_v55  ;;  %v3102_v29 = vsel %vm100_vm1, %v3100_v28, 0.0 }
0x2400   :  { %3103 = vadd.xlane.f32.xlu0 %v3102_v29  ;;  %v3860_v30 = vpop.f32.mrf.mxu1 }
0x2401   :  { %v3101_v31 = vadd.f32 %v3097_v41, %v2949_v9 }
0x2403   :  { %v3105_v8 = vsel %vm100_vm1, %v3101_v31, 0.0 }
0x2404   :  { %3106 = vadd.xlane.f32.xlu1 %v3105_v8 }
0x2489   :  { %v3104_v58 = vpop.xlane.xlu0 %3103 }
0x248a   :  { %v3108_v60 = vmul.f32 0.03125, %v3104_v58 }
0x248c   :  { %v3110_v32 = vsub.f32 %v3100_v28, %v3108_v60  ;;  %v4054_v60 = vld [vmem:[#allocation8 + $0x8] sm:$0xff] }
0x248d   :  { %v3107_v52 = vpop.xlane.xlu1 %3106 }
0x248e   :  { %v3109_v63 = vmul.f32 0.03125, %v3107_v52  ;;  %v3112_v61 = vmul.f32 %v3110_v32, %v3110_v32 }
0x2490   :  { %v3111_v48 = vsub.f32 %v3101_v31, %v3109_v63  ;;  %v3114_v53 = vsel %vm100_vm1, %v3112_v61, 0.0 }
0x2491   :  { %3115 = vadd.xlane.f32.xlu0 %v3114_v53 }
0x2492   :  { %v3113_v62 = vmul.f32 %v3111_v48, %v3111_v48 }
0x2494   :  { %v3117_v4 = vsel %vm100_vm1, %v3113_v62, 0.0 }
0x2495   :  { %3118 = vadd.xlane.f32.xlu1 %v3117_v4 }
0x24a6   :  { %3184 = vrot.lane.b32.xlu1 %v3949_v15, %s4171_s9  ;;  %v3242_v15 = vrot.slane %v4054_v60, %v4860_v40 }
0x24a7   :  { %3186 = vrot.lane.b32.xlu0 %v3948_v50, %s4171_s9 }
0x24aa   :  { %3263 = vrot.lane.b32.xlu1 %v3950_v46, %s4172_s10 }
0x24ab   :  { %3259 = vrot.lane.b32.xlu0 %v3953_v33, %s4172_s10 }
0x24ae   :  { %3265 = vrot.lane.b32.xlu1 %v3952_v51, %s4172_s10 }
0x24b2   :  { %3261 = vrot.lane.b32.xlu1 %v3955_v3, %s4172_s10  ;;  %s3322_s10 = sshll.u32 %s4185_s6, 4  ;;  %s3323_s10 = int_to_ptr.vmem [resolvable:$true] %s3322_s10 }
0x24b3   :  { %s4135_s23 = scalar_lea.vmem %s3323_s10, 32  ;;  %p4140_p7 = scmp.lt.s32.totalorder %s3323_s10, %s3323_s10 }
0x24b4   :  { %p4136_p6 = scmp.ne.s32.totalorder %s3323_s10, %s4135_s23  ;;  %p4141_p8 = scmp.lt.s32.totalorder %s4135_s23, %s4135_s23 }
0x24b6   :  { %p4142_p9 = por %p4141_p8, %p4140_p7 }
0x24b8   :  { %p4143_p10 = pnand %p4142_p9, %p4136_p6 }
0x251a   :  { %v3116_v56 = vpop.xlane.xlu0 %3115 }
0x251b   :  { %v3120_v5 = vmul.f32 0.03125, %v3116_v56 }
0x251d   :  { %v3122_v34 = vadd.f32 1e-05, %v3120_v5 }
0x251e   :  { %v3119_v35 = vpop.xlane.xlu1 %3118  ;;  %v3187_v36 = vpop.permute.xlu0 %3186 }
0x251f   :  { %4048 = vrsqrt.f32 %v3122_v34  ;;  %v3121_v37 = vmul.f32 0.03125, %v3119_v35  ;;  %3862 = vmatpush3.bf16.msra.mxu0 %v3187_v36 }
0x2520   :  { %3863 = vmatprep.subr.bf16.mxu0 %v4169_v0 }
0x2521   :  { %v3123_v7 = vadd.f32 1e-05, %v3121_v37 }
0x2522   :  { %v3185_v38 = vpop.permute.xlu1 %3184  ;;  %v3260_v31 = vpop.permute.xlu0 %3259 }
0x2523   :  { %4050 = vrsqrt.f32 %v3123_v7  ;;  %3864 = vmatpush3.bf16.msra.mxu0 %v3185_v38 }
0x2524   :  { %3869 = vmatprep.subr.bf16.mxu0 %v4169_v0 }
0x2526   :  { %v3264_v24 = vpop.permute.xlu1 %3263 }
0x252a   :  { %v3266_v45 = vpop.permute.xlu1 %3265 }
0x252b   :  { %v3269_v30 = vsel %vm1786_vm7, %v3264_v24, %v3266_v45 }
0x252c   :  { %v4049_v47 = vpop.eup %4048 }
0x252d   :  { %v3126_v43 = vmul.f32 %v4049_v47, %v3110_v32  ;;  %v3166_v32 = vrot.slane %v4054_v60, %v4586_v44 }
0x252e   :  { %v3262_v8 = vpop.permute.xlu1 %3261 }
0x252f   :  { %v3132_v49 = vmul.f32 %v3131_v39, %v3126_v43  ;;  %v3268_v58 = vsel %vm1786_vm7, %v3260_v31, %v3262_v8 }
0x2530   :  { %v4051_v54 = vpop.eup %4050 }
0x2531   :  { %v3138_v57 = vadd.f32 %v3137_v42, %v3132_v49  ;;  %v3127_v6 = vmul.f32 %v4051_v54, %v3111_v48 }
0x2533   :  { %v3140_v9 = vsel %vm100_vm1, %v3138_v57, 0.0  ;;  %v3133_v10 = vmul.f32 %v3131_v39, %v3127_v6 }
0x2534   :  { %v3141_v12 = vrot.slane %v3140_v9, 4 }
0x2535   :  { %v3139_v13 = vadd.f32 %v3137_v42, %v3133_v10 }
0x2536   :  { %v3142_v14 = vadd.f32 %v3141_v12, %v3140_v9 }
0x2537   :  { %v3147_v16 = vsel %vm100_vm1, %v3139_v13, 0.0 }
0x2538   :  { %v3148_v17 = vrot.slane %v3147_v16, 4  ;;  %v3143_v18 = vrot.slane %v3142_v14, 2 }
0x253a   :  { %v3144_v1 = vadd.f32 %v3143_v18, %v3142_v14  ;;  %v3149_v59 = vadd.f32 %v3148_v17, %v3147_v16 }
0x253c   :  { %v3145_v19 = vrot.slane %v3144_v1, 1  ;;  %v3150_v2 = vrot.slane %v3149_v59, 2 }
0x253e   :  { %v3146_v11 = vadd.f32 %v3145_v19, %v3144_v1  ;;  %v3151_v20 = vadd.f32 %v3150_v2, %v3149_v59 }
0x2540   :  { %v3152_v21 = vrot.slane %v3151_v20, 1  ;;  %v3155_v22 = vmul.f32 0.125, %v3146_v11 }
0x2542   :  { %v3153_v23 = vadd.f32 %v3152_v21, %v3151_v20  ;;  %v3161_v25 = vpack.c.bf16 %v3155_v22, %v3155_v22 }
0x2544   :  { %v3156_v55 = vmul.f32 0.125, %v3153_v23  ;;  %v3169_v27 = vunpack.c.l.b16 %v3161_v25 }
0x2546   :  { %v3162_v26 = vpack.c.bf16 %v3156_v55, %v3156_v55 }
0x2548   :  { %v3170_v28 = vunpack.c.l.b16 %v3162_v26 }
0x254a   :  { %v3172_v41 = vsel %vm3171_vm8, %v3170_v28, %v3169_v27 }
0x254b   :  { %v3173_v29 = vpack.c.b16 %v3172_v41, %v3172_v41 }
0x254d   :  { %3866 = vmatmul.mubr.msk.bf16.vlgmr.msra.gmra.mxu0 %vm100_vm1, %v3173_v29 }
0x254e   :  { %3870 = vmatpush3.bf16.msra.mxu0 %v3269_v30  ;;  %3873 = vmatprep.mubr.msk.bf16.mxu0 %vm4170_vm0, %v4169_v0 }
0x254f   :  { %3871 = vmatprep.subr.bf16.mxu0 %v4169_v0 }
0x2552   :  { %3872 = vmatpush3.bf16.msra.mxu0 %v3268_v58 }
0x260d   :  { %v3227_v52 = vpop.f32.mrf.mxu0 }
0x260e   :  { %v3228_v63 = vadd.f32 %v3227_v52, %v3166_v32 }
0x260f   :  { %v3867_v61 = vpop.f32.mrf.mxu0 }
0x2610   :  { %v3233_v48 = vmax.f32 %v3228_v63, 0.0 }
0x2611   :  { %v3230_v53 = vpop.f32.mrf.mxu0 }
0x2612   :  { %v3238_v62 = vpack.c.bf16 %v3233_v48, %v3233_v48 }
0x2613   :  { %v3868_v4 = vpop.f32.mrf.mxu0 }
0x2614   :  { %3874 = vmatmul.mubr.msk.bf16.vlgmr.msra.gmra.mxu0 %vm100_vm1, %v3238_v62 }
0x26d4   :  { %v3309_v0 = vpop.f32.mrf.mxu0 }
0x26d5   :  { %v3310_v50 = vadd.f32 %v3309_v0, %v3242_v15 }
0x26d6   :  { %v3875_v46 = vpop.f32.mrf.mxu0 }
0x26d7   :  { %3315 = vst [vmem:[#allocation10] sm:$0x3] %v3310_v50 }
0x26d8   :  { %v3312_v33 = vpop.f32.mrf.mxu0 }
0x26d9   :  { %4146 = shalt.err (!%p4143_p10)
}
0x26da   :  { %3325 = dma.vmem_to_hbm [thread:$0]  %s3323_s10, 32, %s4940_s8, [#allocation4]   ;;  %v3876_v44 = vpop.f32.mrf.mxu0 }
0x26db   :  { %4161 = dma.done.wait [#allocation4], 32  }
0x26dc   :  { %4162 = vsyncadd [#allocation4], 4294967264 }
0x26dd   :  { %3329 = vsyncpa [#allocation3], 1 }
0x26de   :  { %3330 = vsyncpa [#allocation6], 1 }
0x26df   :  { %3331 = vsyncpa [#allocation9], 1 }
0x26e0   :  { %3332 = vsyncpa [#allocation4], 1 }

</bundles_post_ra>
